<compile_context>
chip_gen: v7x
topology: tpu7x:2x2x1
jax: 0.10.0
libtpu: 0.0.40
codegen_flags: <defaults>
</compile_context>

<pallas_src>
import functools

import jax
import jax.numpy as jnp
from jax.experimental import pallas as pl
from jax.experimental.pallas import tpu as pltpu

HIDDEN = 128          # hidden width of the stand-in per-point MLP
ACTOR_OUT_PAD = 128   # lane-padded actor output width (real width is 6)


# ----------------------------------------------------------------------------
# Backbone Pallas kernel (channels-first, tiled over points, bf16 writeback)
# ----------------------------------------------------------------------------
def _backbone_kernel(x_ref, w1t_ref, b1_ref, w2t_ref, b2_ref, o_ref, net_ref):
    # x_ref : (8, TILE_N) bf16   (3 real point channels, zero-padded to 8)
    # w1t   : (HIDDEN, 8) bf16 ; b1 : (HIDDEN, 1) f32
    # w2t   : (F, HIDDEN) bf16 ; b2 : (F, 1) f32
    # o_ref : (F, TILE_N) bf16   (lane-dense: TILE_N on the 128-lane axis)
    # net_ref: (F, 1) f32        (column 0 of the batch's features)
    x = x_ref[...]
    h = jnp.dot(w1t_ref[...], x, preferred_element_type=jnp.float32)
    h = jnp.maximum(h + b1_ref[...], 0.0)          # ReLU in f32
    h = h.astype(jnp.bfloat16)                     # bf16 feed for 2nd MXU pass
    o = jnp.dot(w2t_ref[...], h, preferred_element_type=jnp.float32)
    o = jnp.maximum(o + b2_ref[...], 0.0)          # fc_layer ReLU (f32)
    o_ref[...] = o.astype(o_ref.dtype)             # bf16 writeback (halved bytes)

    @pl.when(pl.program_id(1) == 0)                # column 0 lives in tile j==0
    def _():
        net_ref[...] = o[:, 0:1]                   # keep f32 for the heads


def backbone_pallas(pcs_cf, w1, b1, w2, b2, *, feat_dim, tile_n):
    """pcs_cf: (B, 8, N) bf16 -> (whole_feats (B, F, N) bf16, net (B, F, 1) f32)."""
    batch, _, num_pts = pcs_cf.shape
    w1t = jnp.transpose(w1).astype(jnp.bfloat16)           # (HIDDEN, 8)
    w2t = jnp.transpose(w2).astype(jnp.bfloat16)           # (F, HIDDEN)
    b1c = b1.reshape(-1, 1).astype(jnp.float32)            # (HIDDEN, 1)
    b2c = b2.reshape(-1, 1).astype(jnp.float32)            # (F, 1)
    grid = (batch, pl.cdiv(num_pts, tile_n))
    out_shape = (
        jax.ShapeDtypeStruct((batch, feat_dim, num_pts), jnp.bfloat16),
        jax.ShapeDtypeStruct((batch, feat_dim, 1), jnp.float32),
    )
    return pl.pallas_call(
        _backbone_kernel,
        out_shape=out_shape,
        grid_spec=pltpu.PrefetchScalarGridSpec(
            num_scalar_prefetch=0,
            grid=grid,
            in_specs=[
                pl.BlockSpec((None, 8, tile_n), lambda b, j: (b, 0, j)),
                pl.BlockSpec((HIDDEN, 8), lambda b, j: (0, 0)),
                pl.BlockSpec((HIDDEN, 1), lambda b, j: (0, 0)),
                pl.BlockSpec((feat_dim, HIDDEN), lambda b, j: (0, 0)),
                pl.BlockSpec((feat_dim, 1), lambda b, j: (0, 0)),
            ],
            out_specs=(
                pl.BlockSpec((None, feat_dim, tile_n), lambda b, j: (b, 0, j)),
                pl.BlockSpec((None, feat_dim, 1), lambda b, j: (b, 0, 0)),
            ),
        ),
        # batch axis "parallel" (splits across v7x's 2 TCs); lane-tile axis
        # "arbitrary" because the `net` output block is revisited along it.
        compiler_params=pltpu.CompilerParams(
            dimension_semantics=("parallel", "arbitrary")),
    )(pcs_cf, w1t, b1c, w2t, b2c)


# ----------------------------------------------------------------------------
# Fused heads Pallas kernel: grasp_depth + critic + actor + action_score
# (single launch; everything resident in VMEM; concatenated inputs replaced by
#  split-weight partial contractions)
# ----------------------------------------------------------------------------
def _heads_kernel(net_ref, d1_ref, d2_ref, enet_ref, rvs_ref,
                  gdw1, gdb1, gdw2r, gdb2,
                  crw1n, crw1d1, crw1d2, crw1gd, crb1, crw2r, crb2,
                  acw1n, acw1rv, acb1, acw2p, acb2p,
                  asw1, asb1, asw2r, asb2,
                  gd_out, cr_out, ac_out, as_out):
    def leaky(x):
        return jnp.where(x >= 0, x, 0.01 * x)     # PyTorch default slope

    def small_k_dot(x, w):
        # x: (M, K), w: (K, F) with tiny K -> K broadcast-FMAs on the VPU
        out = x[:, 0:1] * w[0:1, :]
        for k in range(1, w.shape[0]):
            out = out + x[:, k:k + 1] * w[k:k + 1, :]
        return out

    def row_out(h, w_row, b):
        # (M, F) @ (F, 1) done as a lane reduction: sum(h * w_row) + b
        return jnp.sum(h * w_row, axis=-1, keepdims=True) + b

    net = net_ref[...]                                               # (B, F)

    # --- grasp_depth head: Linear -> leaky -> Linear
    h = leaky(jnp.dot(net, gdw1[...], preferred_element_type=jnp.float32)
              + gdb1[...])
    gd = row_out(h, gdw2r[...], gdb2[...])                           # (B, 1)
    gd_out[...] = gd

    # --- critic on the ground-truth query: input is [net, dirs1, dirs2, gd];
    #     W1 is split along its input dim so the concat is never materialized.
    h = (jnp.dot(net, crw1n[...], preferred_element_type=jnp.float32)
         + small_k_dot(d1_ref[...], crw1d1[...])
         + small_k_dot(d2_ref[...], crw1d2[...])
         + gd * crw1gd[...]
         + crb1[...])
    h = leaky(h)
    cr_out[...] = row_out(h, crw2r[...], crb2[...])                  # (B, 1)

    # --- actor: input is [expanded_net, rvs]; split weights again.
    h = leaky(jnp.dot(enet_ref[...], acw1n[...],
                      preferred_element_type=jnp.float32)
              + small_k_dot(rvs_ref[...], acw1rv[...])
              + acb1[...])
    ac_out[...] = (jnp.dot(h, acw2p[...], preferred_element_type=jnp.float32)
                   + acb2p[...])                                     # (M, 128)

    # --- action score head (sigmoid applied outside)
    h = leaky(jnp.dot(net, asw1[...], preferred_element_type=jnp.float32)
              + asb1[...])
    as_out[...] = row_out(h, asw2r[...], asb2[...])                  # (B, 1)


def heads_pallas(net, dirs1, dirs2, exp_net, rvs_flat, p):
    batch, feat_dim = net.shape
    m = exp_net.shape[0]
    vspec = pl.BlockSpec(memory_space=pltpu.MemorySpace.VMEM)
    cr_w1 = p["cr_w1"]                       # (F+7, F): rows [net | d1 | d2 | gd]
    ac_w2_pad = jnp.pad(p["ac_w2"], ((0, 0), (0, ACTOR_OUT_PAD - 6)))
    ac_b2_pad = jnp.pad(p["ac_b2"].reshape(1, -1), ((0, 0), (0, ACTOR_OUT_PAD - 6)))
    inputs = (
        net, dirs1, dirs2, exp_net, rvs_flat,
        p["gd_w1"], p["gd_b1"].reshape(1, -1),
        p["gd_w2"].reshape(1, -1), p["gd_b2"].reshape(1, 1),
        cr_w1[:feat_dim], cr_w1[feat_dim:feat_dim + 3],
        cr_w1[feat_dim + 3:feat_dim + 6], cr_w1[feat_dim + 6:feat_dim + 7],
        p["cr_b1"].reshape(1, -1),
        p["cr_w2"].reshape(1, -1), p["cr_b2"].reshape(1, 1),
        p["ac_w1"][:feat_dim], p["ac_w1"][feat_dim:],
        p["ac_b1"].reshape(1, -1), ac_w2_pad, ac_b2_pad,
        p["as_w1"], p["as_b1"].reshape(1, -1),
        p["as_w2"].reshape(1, -1), p["as_b2"].reshape(1, 1),
    )
    out_shape = (
        jax.ShapeDtypeStruct((batch, 1), jnp.float32),       # grasp_depth
        jax.ShapeDtypeStruct((batch, 1), jnp.float32),       # critic logits
        jax.ShapeDtypeStruct((m, ACTOR_OUT_PAD), jnp.float32),  # actor raw (padded)
        jax.ShapeDtypeStruct((batch, 1), jnp.float32),       # action score logits
    )
    gd, cr, ac_pad, ascore = pl.pallas_call(
        _heads_kernel,
        out_shape=out_shape,
        in_specs=[vspec] * len(inputs),
        out_specs=(vspec,) * 4,
    )(*inputs)
    return gd, cr, ac_pad[:, :6], ascore


# ----------------------------------------------------------------------------
# Small 3-D rotation glue (plain JAX; tiny (M,3) tensors)
# ----------------------------------------------------------------------------
def _normalize(v, eps=1e-12):
    return v / jnp.maximum(jnp.linalg.norm(v, axis=1, keepdims=True), eps)


def bgs(d6s):
    """d6s: (M, 3, 2) -> rotation matrices (M, 3, 3) with columns b1,b2,b3."""
    b1 = _normalize(d6s[:, :, 0])
    a2 = d6s[:, :, 1]
    dot = jnp.sum(b1 * a2, axis=1, keepdims=True)
    b2 = _normalize(a2 - dot * b1)
    b3 = jnp.cross(b1, b2, axis=1)
    rows = jnp.stack([b1, b2, b3], axis=1)          # (M, 3, 3) rows
    return jnp.transpose(rows, (0, 2, 1))           # columns = b1, b2, b3


def bgdR(Rgts, Rps):
    Rds = jnp.einsum("bij,bik->bjk", Rgts, Rps)     # Rgts^T @ Rps
    Rt = Rds[:, 0, 0] + Rds[:, 1, 1] + Rds[:, 2, 2]
    theta = jnp.clip(0.5 * (Rt - 1.0), -1.0 + 1e-6, 1.0 - 1e-6)
    return jnp.arccos(theta)


def get_6d_rot_loss(pred_6d, gt_6d):
    pred_Rs = bgs(jnp.transpose(pred_6d.reshape(-1, 2, 3), (0, 2, 1)))
    gt_Rs = bgs(jnp.transpose(gt_6d.reshape(-1, 2, 3), (0, 2, 1)))
    return bgdR(gt_Rs, pred_Rs)


def bce_with_logits(x, y):
    return jnp.maximum(x, 0.0) - x * y + jnp.log1p(jnp.exp(-jnp.abs(x)))


# ----------------------------------------------------------------------------
# Parameter construction (deterministic, PyTorch-Linear-like uniform init)
# ----------------------------------------------------------------------------
def _linear_params(key, fan_in, fan_out):
    kw, kb = jax.random.split(key)
    bound = 1.0 / jnp.sqrt(jnp.float32(fan_in))
    w = jax.random.uniform(kw, (fan_in, fan_out), jnp.float32, -bound, bound)
    b = jax.random.uniform(kb, (fan_out,), jnp.float32, -bound, bound)
    return w, b


def init_params(key, feat_dim, rv_dim):
    keys = jax.random.split(key, 12)
    p = {}
    # --- backbone (stand-in for PointNet2SemSegSSG) ---
    # TODO(synk): PointnetSAModule / PointnetFPModule (pointnet2_ops: FPS,
    # ball-query, grouping) have no clean Pallas equivalent; replaced by a
    # deterministic shared per-point MLP 6->128 followed by the module's real
    # fc_layer: Conv1d(128, feat_dim, 1, bias=False) + BatchNorm1d (eval-mode,
    # default running stats) + ReLU, with BN folded into the conv weights.
    # The duplicated input channels (pcs.repeat(1,1,2)) are folded into the
    # first-layer weights (rows 0..2 += rows 3..5), zero-padded 3->8.
    w1, b1 = _linear_params(keys[0], 6, HIDDEN)
    w1_eff = w1[:3] + w1[3:6]                               # fold x.repeat(1,1,2)
    p["bb_w1"] = jnp.concatenate(
        [w1_eff, jnp.zeros((5, HIDDEN), jnp.float32)], axis=0)   # (8, HIDDEN)
    p["bb_b1"] = b1
    wf, _ = _linear_params(keys[1], HIDDEN, feat_dim)
    gamma = jnp.ones((feat_dim,), jnp.float32)
    beta = jnp.zeros((feat_dim,), jnp.float32)
    run_mean = jnp.zeros((feat_dim,), jnp.float32)
    run_var = jnp.ones((feat_dim,), jnp.float32)
    scale = gamma / jnp.sqrt(run_var + 1e-5)
    p["bb_w2"] = wf * scale[None, :]
    p["bb_b2"] = beta - run_mean * scale
    # --- grasp_depth head ---
    p["gd_w1"], p["gd_b1"] = _linear_params(keys[2], feat_dim, feat_dim)
    p["gd_w2"], p["gd_b2"] = _linear_params(keys[3], feat_dim, 1)
    # --- critic (critic_copy shares the same weights: load_state_dict) ---
    p["cr_w1"], p["cr_b1"] = _linear_params(keys[4], feat_dim + 7, feat_dim)
    p["cr_w2"], p["cr_b2"] = _linear_params(keys[5], feat_dim, 1)
    # --- actor ---
    p["ac_w1"], p["ac_b1"] = _linear_params(keys[6], feat_dim + rv_dim, feat_dim)
    p["ac_w2"], p["ac_b2"] = _linear_params(keys[7], feat_dim, 6)
    # --- action_score ---
    p["as_w1"], p["as_b1"] = _linear_params(keys[8], feat_dim, feat_dim)
    p["as_w2"], p["as_b2"] = _linear_params(keys[9], feat_dim, 1)
    return p


# ----------------------------------------------------------------------------
# Network.forward
# ----------------------------------------------------------------------------
def network_forward(params, pcs, dirs1, dirs2, gt_width, gt_result, rvs,
                    *, feat_dim, rv_dim, rv_cnt, tile_n=None):
    p = params
    batch_size, num_pts, _ = pcs.shape

    # pcs.repeat(1, 1, 2) is folded into bb_w1; feed the points once,
    # channels-first, zero-padded 3->8 channels for (8,128) MXU tiling.
    pcs_t = jnp.transpose(pcs, (0, 2, 1))                       # (B, 3, N)
    pcs_cf = jnp.concatenate(
        [pcs_t, jnp.zeros((batch_size, 5, num_pts), pcs.dtype)], axis=1)

    # Large lane-dim tiles amortize the ~0.35us/step cost; VMEM stays ~1 MiB
    # even at 2048 with bf16 output (well under 16/32 MiB scoped defaults).
    if tile_n is None:
        tile_n = num_pts if num_pts <= 2048 else 2048

    whole_feats, net_col = backbone_pallas(
        pcs_cf.astype(jnp.bfloat16),
        p["bb_w1"], p["bb_b1"], p["bb_w2"], p["bb_b2"],
        feat_dim=feat_dim, tile_n=tile_n)
    # whole_feats: (B, F, N) bf16 ; net: (B, F) f32 (column 0, pre-bf16-cast)
    net = net_col[:, :, 0]

    # torch: net.unsqueeze(1).repeat(1, rv_cnt, 1).reshape(B*rv, -1)
    expanded_net = jnp.repeat(net, rv_cnt, axis=0)                   # (B*rv, F)
    expanded_rvs = rvs.reshape(batch_size * rv_cnt, rv_dim)          # (B*rv, rv)

    # --- single fused Pallas call for all small heads
    grasp_depth, critic_logits, actor_raw, as_logits = heads_pallas(
        net, dirs1, dirs2, expanded_net, expanded_rvs, p)

    width_loss_per_data = jnp.mean((grasp_depth - gt_width) ** 2, axis=1)  # (B,)

    input_s6d = jnp.concatenate([dirs1, dirs2, grasp_depth], axis=1)  # (B, 7)
    pred_result_logits = critic_logits[:, 0]                          # (B,)
    critic_loss_per_data = bce_with_logits(pred_result_logits,
                                           gt_result.astype(jnp.float32))

    # --- actor proposals -> rotation matrices -> coverage loss
    d6s = actor_raw.reshape(-1, 3, 2)
    expanded_pred_s6d = bgs(d6s)[:, :, :2].reshape(-1, 6)             # (M, 6)
    expanded_input_s6d = jnp.repeat(input_s6d[:, :6], rv_cnt, axis=0)
    expanded_cov_loss = get_6d_rot_loss(expanded_pred_s6d, expanded_input_s6d)
    actor_coverage_loss_per_data = jnp.min(
        expanded_cov_loss.reshape(batch_size, rv_cnt), axis=1)        # (B,)

    # --- critic_copy (shares critic weights) scores the proposals.
    # Kept in plain jnp: M = B*rv_cnt rows, so a Pallas launch would be pure
    # overhead; XLA fuses these few small matmuls.
    # NOTE: jnp.tile reproduces the block ordering of `grasp_depth.repeat(
    # self.rv_cnt, 1)` in the original PyTorch code, while expanded_net is
    # interleave-ordered (net.unsqueeze(1).repeat(...).reshape) -- this quirk
    # is intentional and faithful to the reference module.
    expanded_width = jnp.tile(grasp_depth, (rv_cnt, 1))               # (M, 1)
    expanded_queries = jnp.concatenate([expanded_pred_s6d, expanded_width], axis=-1)
    ccopy_in = jnp.concatenate([expanded_net, expanded_queries], axis=-1)
    hcc = ccopy_in @ p["cr_w1"] + p["cr_b1"]
    hcc = jnp.where(hcc >= 0, hcc, 0.01 * hcc)
    expanded_proposal_logits = (hcc @ p["cr_w2"] + p["cr_b2"])[:, 0]  # (M,)
    proposal_succ = jax.nn.sigmoid(expanded_proposal_logits).reshape(batch_size, rv_cnt)
    avg_proposal_succ_scores = jnp.mean(proposal_succ, axis=1)        # (B,)

    pred_action_scores = jax.nn.sigmoid(as_logits)[:, 0]              # (B,)
    action_score_loss_per_data = (pred_action_scores - avg_proposal_succ_scores) ** 2

    return (critic_loss_per_data, actor_coverage_loss_per_data,
            action_score_loss_per_data, width_loss_per_data,
            pred_result_logits, whole_feats)


# ----------------------------------------------------------------------------
if __name__ == "__main__":
    FEAT_DIM = 128
    RV_DIM = 10
    RV_CNT = 4
    B, N = 2, 1024

    key = jax.random.PRNGKey(0)
    kp, kpc, kd1, kd2, kw, kr, krv = jax.random.split(key, 7)

    params = init_params(kp, FEAT_DIM, RV_DIM)

    pcs = jax.random.normal(kpc, (B, N, 3), jnp.float32)
    dirs1 = jax.random.normal(kd1, (B, 3), jnp.float32)
    dirs2 = jax.random.normal(kd2, (B, 3), jnp.float32)
    gt_width = jax.random.uniform(kw, (B, 1), jnp.float32)
    gt_result = (jax.random.uniform(kr, (B,)) > 0.5).astype(jnp.float32)
    # TODO(synk): torch.randn inside Network.forward is replaced by an explicit
    # deterministic `rvs` input for reproducibility.
    rvs = jax.random.normal(krv, (B, RV_CNT, RV_DIM), jnp.float32)

    fwd = jax.jit(functools.partial(network_forward,
                                    feat_dim=FEAT_DIM, rv_dim=RV_DIM,
                                    rv_cnt=RV_CNT, tile_n=None))
    outs = fwd(params, pcs, dirs1, dirs2, gt_width, gt_result, rvs)
    jax.block_until_ready(outs)

    (critic_loss, cov_loss, as_loss, width_loss, logits, whole_feats) = outs
    assert critic_loss.shape == (B,)
    assert cov_loss.shape == (B,)
    assert as_loss.shape == (B,)
    assert width_loss.shape == (B,)
    assert logits.shape == (B,)
    assert whole_feats.shape == (B, FEAT_DIM, N)
    assert all(bool(jnp.all(jnp.isfinite(o.astype(jnp.float32)))) for o in
               (critic_loss, cov_loss, as_loss, width_loss, logits, whole_feats))
    print("KERNEL_OK")
</pallas_src>

<mosaic_0001>
module attributes {stable_mosaic.version = 11 : i64} {
  func.func @_backbone_kernel(%arg0: i32, %arg1: i32, %arg2: memref<1x8x1024xbf16, #tpu.memory_space<vmem>>, %arg3: memref<128x8xbf16, #tpu.memory_space<vmem>>, %arg4: memref<128x1xf32, #tpu.memory_space<vmem>>, %arg5: memref<128x128xbf16, #tpu.memory_space<vmem>>, %arg6: memref<128x1xf32, #tpu.memory_space<vmem>>, %arg7: memref<1x128x1024xbf16, #tpu.memory_space<vmem>>, %arg8: memref<1x128x1xf32, #tpu.memory_space<vmem>>) attributes {dimension_semantics = [#tpu.dimension_semantics<parallel>, #tpu.dimension_semantics<arbitrary>], iteration_bounds = array<i64: 2, 1>, scalar_prefetch = 0 : i64, scratch_operands = 0 : i64, tpu.core_type = #tpu.core_type<tc>, window_params = [{transform_indices = @transform_0, window_bounds = array<i64: 1, 8, 1024>}, {pipeline_mode = #tpu.pipeline_mode<synchronous>, transform_indices = @transform_1, window_bounds = array<i64: 128, 8>}, {pipeline_mode = #tpu.pipeline_mode<synchronous>, transform_indices = @transform_2, window_bounds = array<i64: 128, 1>}, {pipeline_mode = #tpu.pipeline_mode<synchronous>, transform_indices = @transform_3, window_bounds = array<i64: 128, 128>}, {pipeline_mode = #tpu.pipeline_mode<synchronous>, transform_indices = @transform_4, window_bounds = array<i64: 128, 1>}, {transform_indices = @transform_5, window_bounds = array<i64: 1, 128, 1024>}, {transform_indices = @transform_6, window_bounds = array<i64: 1, 128, 1>}]} {
    %c0 = arith.constant 0 : index
    %c0_0 = arith.constant 0 : index
    %c0_1 = arith.constant 0 : index
    %0 = vector.load %arg2[%c0, %c0_0, %c0_1] : memref<1x8x1024xbf16, #tpu.memory_space<vmem>>, vector<1x8x1024xbf16>
    %1 = vector.shape_cast %0 : vector<1x8x1024xbf16> to vector<8x1024xbf16>
    %c0_2 = arith.constant 0 : index
    %c0_3 = arith.constant 0 : index
    %2 = vector.load %arg3[%c0_2, %c0_3] : memref<128x8xbf16, #tpu.memory_space<vmem>>, vector<128x8xbf16>
    %cst = arith.constant dense<0.000000e+00> : vector<128x1024xf32>
    %3 = tpu.matmul %2, %1, %cst {dimension_numbers = #tpu.dot_dimension_numbers<[1], [0], [0], [1], [0, 0, 1, 1], [], []>} : vector<128x8xbf16>, vector<8x1024xbf16>, vector<128x1024xf32> -> vector<128x1024xf32>
    %c0_4 = arith.constant 0 : index
    %c0_5 = arith.constant 0 : index
    %4 = vector.load %arg4[%c0_4, %c0_5] : memref<128x1xf32, #tpu.memory_space<vmem>>, vector<128x1xf32>
    %5 = vector.broadcast %4 : vector<128x1xf32> to vector<128x1024xf32>
    %6 = arith.addf %3, %5 : vector<128x1024xf32>
    %cst_6 = arith.constant 0.000000e+00 : f32
    %7 = vector.broadcast %cst_6 : f32 to vector<128x1024xf32>
    %8 = arith.maximumf %6, %7 : vector<128x1024xf32>
    %9 = arith.truncf %8 : vector<128x1024xf32> to vector<128x1024xbf16>
    %c0_7 = arith.constant 0 : index
    %c0_8 = arith.constant 0 : index
    %10 = vector.load %arg5[%c0_7, %c0_8] : memref<128x128xbf16, #tpu.memory_space<vmem>>, vector<128x128xbf16>
    %cst_9 = arith.constant dense<0.000000e+00> : vector<128x1024xf32>
    %11 = tpu.matmul %10, %9, %cst_9 {dimension_numbers = #tpu.dot_dimension_numbers<[1], [0], [0], [1], [0, 0, 1, 1], [], []>} : vector<128x128xbf16>, vector<128x1024xbf16>, vector<128x1024xf32> -> vector<128x1024xf32>
    %c0_10 = arith.constant 0 : index
    %c0_11 = arith.constant 0 : index
    %12 = vector.load %arg6[%c0_10, %c0_11] : memref<128x1xf32, #tpu.memory_space<vmem>>, vector<128x1xf32>
    %13 = vector.broadcast %12 : vector<128x1xf32> to vector<128x1024xf32>
    %14 = arith.addf %11, %13 : vector<128x1024xf32>
    %cst_12 = arith.constant 0.000000e+00 : f32
    %15 = vector.broadcast %cst_12 : f32 to vector<128x1024xf32>
    %16 = arith.maximumf %14, %15 : vector<128x1024xf32>
    %17 = arith.truncf %16 : vector<128x1024xf32> to vector<128x1024xbf16>
    %c0_13 = arith.constant 0 : index
    %c0_14 = arith.constant 0 : index
    %c0_15 = arith.constant 0 : index
    %18 = vector.load %arg7[%c0_13, %c0_14, %c0_15] : memref<1x128x1024xbf16, #tpu.memory_space<vmem>>, vector<1x128x1024xbf16>
    %19 = vector.shape_cast %18 : vector<1x128x1024xbf16> to vector<128x1024xbf16>
    %20 = vector.shape_cast %17 : vector<128x1024xbf16> to vector<1x128x1024xbf16>
    tpu.vector_store %arg7[%c0_13, %c0_14, %c0_15], %20 {strides = array<i32>} : memref<1x128x1024xbf16, #tpu.memory_space<vmem>>, vector<1x128x1024xbf16>,
    %c0_i32 = arith.constant 0 : i32
    %21 = arith.cmpi eq, %arg1, %c0_i32 : i32
    %22 = arith.extui %21 : i1 to i32
    %c0_i32_16 = arith.constant 0 : i32
    %23 = arith.cmpi ne, %22, %c0_i32_16 : i32
    scf.if %23 {
      %24 = vector.extract_strided_slice %16 {offsets = [0, 0], sizes = [128, 1], strides = [1, 1]} : vector<128x1024xf32> to vector<128x1xf32>
      %c0_17 = arith.constant 0 : index
      %c0_18 = arith.constant 0 : index
      %c0_19 = arith.constant 0 : index
      %25 = vector.load %arg8[%c0_17, %c0_18, %c0_19] : memref<1x128x1xf32, #tpu.memory_space<vmem>>, vector<1x128x1xf32>
      %26 = vector.shape_cast %25 : vector<1x128x1xf32> to vector<128x1xf32>
      %27 = vector.shape_cast %24 : vector<128x1xf32> to vector<1x128x1xf32>
      tpu.vector_store %arg8[%c0_17, %c0_18, %c0_19], %27 {strides = array<i32>} : memref<1x128x1xf32, #tpu.memory_space<vmem>>, vector<1x128x1xf32>,
    } else {
    }
    return
  }
  func.func @transform_0(%arg0: i32, %arg1: i32) -> (i32, i32, i32) {
    %c0_i32 = arith.constant 0 : i32
    %c0_i32_0 = arith.constant 0 : i32
    return %arg0, %c0_i32, %arg1 : i32, i32, i32
  }
  func.func @transform_1(%arg0: i32, %arg1: i32) -> (i32, i32) {
    %c0_i32 = arith.constant 0 : i32
    %c0_i32_0 = arith.constant 0 : i32
    %c0_i32_1 = arith.constant 0 : i32
    return %c0_i32, %c0_i32_0 : i32, i32
  }
  func.func @transform_2(%arg0: i32, %arg1: i32) -> (i32, i32) {
    %c0_i32 = arith.constant 0 : i32
    %c0_i32_0 = arith.constant 0 : i32
    %c0_i32_1 = arith.constant 0 : i32
    return %c0_i32, %c0_i32_0 : i32, i32
  }
  func.func @transform_3(%arg0: i32, %arg1: i32) -> (i32, i32) {
    %c0_i32 = arith.constant 0 : i32
    %c0_i32_0 = arith.constant 0 : i32
    %c0_i32_1 = arith.constant 0 : i32
    return %c0_i32, %c0_i32_0 : i32, i32
  }
  func.func @transform_4(%arg0: i32, %arg1: i32) -> (i32, i32) {
    %c0_i32 = arith.constant 0 : i32
    %c0_i32_0 = arith.constant 0 : i32
    %c0_i32_1 = arith.constant 0 : i32
    return %c0_i32, %c0_i32_0 : i32, i32
  }
  func.func @transform_5(%arg0: i32, %arg1: i32) -> (i32, i32, i32) {
    %c0_i32 = arith.constant 0 : i32
    %c0_i32_0 = arith.constant 0 : i32
    return %arg0, %c0_i32, %arg1 : i32, i32, i32
  }
  func.func @transform_6(%arg0: i32, %arg1: i32) -> (i32, i32, i32) {
    %c0_i32 = arith.constant 0 : i32
    %c0_i32_0 = arith.constant 0 : i32
    %c0_i32_1 = arith.constant 0 : i32
    return %arg0, %c0_i32, %c0_i32_0 : i32, i32, i32
  }
}

module attributes {stable_mosaic.version = 11 : i64} {
  func.func @_heads_kernel(%arg0: memref<2x128xf32, #tpu.memory_space<vmem>>, %arg1: memref<2x3xf32, #tpu.memory_space<vmem>>, %arg2: memref<2x3xf32, #tpu.memory_space<vmem>>, %arg3: memref<8x128xf32, #tpu.memory_space<vmem>>, %arg4: memref<8x10xf32, #tpu.memory_space<vmem>>, %arg5: memref<128x128xf32, #tpu.memory_space<vmem>>, %arg6: memref<1x128xf32, #tpu.memory_space<vmem>>, %arg7: memref<1x128xf32, #tpu.memory_space<vmem>>, %arg8: memref<1x1xf32, #tpu.memory_space<vmem>>, %arg9: memref<128x128xf32, #tpu.memory_space<vmem>>, %arg10: memref<3x128xf32, #tpu.memory_space<vmem>>, %arg11: memref<3x128xf32, #tpu.memory_space<vmem>>, %arg12: memref<1x128xf32, #tpu.memory_space<vmem>>, %arg13: memref<1x128xf32, #tpu.memory_space<vmem>>, %arg14: memref<1x128xf32, #tpu.memory_space<vmem>>, %arg15: memref<1x1xf32, #tpu.memory_space<vmem>>, %arg16: memref<128x128xf32, #tpu.memory_space<vmem>>, %arg17: memref<10x128xf32, #tpu.memory_space<vmem>>, %arg18: memref<1x128xf32, #tpu.memory_space<vmem>>, %arg19: memref<128x128xf32, #tpu.memory_space<vmem>>, %arg20: memref<1x128xf32, #tpu.memory_space<vmem>>, %arg21: memref<128x128xf32, #tpu.memory_space<vmem>>, %arg22: memref<1x128xf32, #tpu.memory_space<vmem>>, %arg23: memref<1x128xf32, #tpu.memory_space<vmem>>, %arg24: memref<1x1xf32, #tpu.memory_space<vmem>>, %arg25: memref<2x1xf32, #tpu.memory_space<vmem>>, %arg26: memref<2x1xf32, #tpu.memory_space<vmem>>, %arg27: memref<8x128xf32, #tpu.memory_space<vmem>>, %arg28: memref<2x1xf32, #tpu.memory_space<vmem>>) attributes {dimension_semantics = [], scalar_prefetch = 0 : i64, scratch_operands = 0 : i64, tpu.core_type = #tpu.core_type<tc>} {
    %c0 = arith.constant 0 : index
    %c0_0 = arith.constant 0 : index
    %0 = vector.load %arg0[%c0, %c0_0] : memref<2x128xf32, #tpu.memory_space<vmem>>, vector<2x128xf32>
    %c0_1 = arith.constant 0 : index
    %c0_2 = arith.constant 0 : index
    %1 = vector.load %arg5[%c0_1, %c0_2] : memref<128x128xf32, #tpu.memory_space<vmem>>, vector<128x128xf32>
    %cst = arith.constant dense<0.000000e+00> : vector<2x128xf32>
    %2 = tpu.matmul %0, %1, %cst {dimension_numbers = #tpu.dot_dimension_numbers<[1], [0], [0], [1], [0, 0, 1, 1], [], []>} : vector<2x128xf32>, vector<128x128xf32>, vector<2x128xf32> -> vector<2x128xf32>
    %c0_3 = arith.constant 0 : index
    %c0_4 = arith.constant 0 : index
    %3 = vector.load %arg6[%c0_3, %c0_4] : memref<1x128xf32, #tpu.memory_space<vmem>>, vector<1x128xf32>
    %4 = vector.broadcast %3 : vector<1x128xf32> to vector<2x128xf32>
    %5 = arith.addf %2, %4 : vector<2x128xf32>
    %cst_5 = arith.constant 0.000000e+00 : f32
    %6 = vector.broadcast %cst_5 : f32 to vector<2x128xf32>
    %7 = arith.cmpf oge, %5, %6 : vector<2x128xf32>
    %cst_6 = arith.constant 0.00999999977 : f32
    %8 = vector.broadcast %cst_6 : f32 to vector<2x128xf32>
    %9 = arith.mulf %8, %5 : vector<2x128xf32>
    %10 = arith.select %7, %5, %9 : vector<2x128xi1>, vector<2x128xf32>
    %c0_7 = arith.constant 0 : index
    %c0_8 = arith.constant 0 : index
    %11 = vector.load %arg7[%c0_7, %c0_8] : memref<1x128xf32, #tpu.memory_space<vmem>>, vector<1x128xf32>
    %c0_9 = arith.constant 0 : index
    %c0_10 = arith.constant 0 : index
    %12 = vector.load %arg8[%c0_9, %c0_10] : memref<1x1xf32, #tpu.memory_space<vmem>>, vector<1x1xf32>
    %13 = vector.broadcast %11 : vector<1x128xf32> to vector<2x128xf32>
    %14 = arith.mulf %10, %13 : vector<2x128xf32>
    %cst_11 = arith.constant dense<0.000000e+00> : vector<2xf32>
    %15 = vector.multi_reduction <add>, %14, %cst_11 [1] : vector<2x128xf32> to vector<2xf32>
    %16 = vector.shape_cast %15 : vector<2xf32> to vector<2x1xf32>
    %17 = vector.broadcast %12 : vector<1x1xf32> to vector<2x1xf32>
    %18 = arith.addf %16, %17 : vector<2x1xf32>
    %c0_12 = arith.constant 0 : index
    %c0_13 = arith.constant 0 : index
    %19 = vector.load %arg25[%c0_12, %c0_13] : memref<2x1xf32, #tpu.memory_space<vmem>>, vector<2x1xf32>
    tpu.vector_store %arg25[%c0_12, %c0_13], %18 {strides = array<i32>} : memref<2x1xf32, #tpu.memory_space<vmem>>, vector<2x1xf32>,
    %c0_14 = arith.constant 0 : index
    %c0_15 = arith.constant 0 : index
    %20 = vector.load %arg9[%c0_14, %c0_15] : memref<128x128xf32, #tpu.memory_space<vmem>>, vector<128x128xf32>
    %cst_16 = arith.constant dense<0.000000e+00> : vector<2x128xf32>
    %21 = tpu.matmul %0, %20, %cst_16 {dimension_numbers = #tpu.dot_dimension_numbers<[1], [0], [0], [1], [0, 0, 1, 1], [], []>} : vector<2x128xf32>, vector<128x128xf32>, vector<2x128xf32> -> vector<2x128xf32>
    %c0_17 = arith.constant 0 : index
    %c0_18 = arith.constant 0 : index
    %22 = vector.load %arg1[%c0_17, %c0_18] : memref<2x3xf32, #tpu.memory_space<vmem>>, vector<2x3xf32>
    %c0_19 = arith.constant 0 : index
    %c0_20 = arith.constant 0 : index
    %23 = vector.load %arg10[%c0_19, %c0_20] : memref<3x128xf32, #tpu.memory_space<vmem>>, vector<3x128xf32>
    %24 = vector.extract_strided_slice %22 {offsets = [0, 0], sizes = [2, 1], strides = [1, 1]} : vector<2x3xf32> to vector<2x1xf32>
    %25 = vector.extract_strided_slice %23 {offsets = [0, 0], sizes = [1, 128], strides = [1, 1]} : vector<3x128xf32> to vector<1x128xf32>
    %26 = vector.broadcast %24 : vector<2x1xf32> to vector<2x128xf32>
    %27 = vector.broadcast %25 : vector<1x128xf32> to vector<2x128xf32>
    %28 = arith.mulf %26, %27 : vector<2x128xf32>
    %29 = vector.extract_strided_slice %22 {offsets = [0, 1], sizes = [2, 1], strides = [1, 1]} : vector<2x3xf32> to vector<2x1xf32>
    %30 = vector.extract_strided_slice %23 {offsets = [1, 0], sizes = [1, 128], strides = [1, 1]} : vector<3x128xf32> to vector<1x128xf32>
    %31 = vector.broadcast %29 : vector<2x1xf32> to vector<2x128xf32>
    %32 = vector.broadcast %30 : vector<1x128xf32> to vector<2x128xf32>
    %33 = arith.mulf %31, %32 : vector<2x128xf32>
    %34 = arith.addf %28, %33 : vector<2x128xf32>
    %35 = vector.extract_strided_slice %22 {offsets = [0, 2], sizes = [2, 1], strides = [1, 1]} : vector<2x3xf32> to vector<2x1xf32>
    %36 = vector.extract_strided_slice %23 {offsets = [2, 0], sizes = [1, 128], strides = [1, 1]} : vector<3x128xf32> to vector<1x128xf32>
    %37 = vector.broadcast %35 : vector<2x1xf32> to vector<2x128xf32>
    %38 = vector.broadcast %36 : vector<1x128xf32> to vector<2x128xf32>
    %39 = arith.mulf %37, %38 : vector<2x128xf32>
    %40 = arith.addf %34, %39 : vector<2x128xf32>
    %41 = arith.addf %21, %40 : vector<2x128xf32>
    %c0_21 = arith.constant 0 : index
    %c0_22 = arith.constant 0 : index
    %42 = vector.load %arg2[%c0_21, %c0_22] : memref<2x3xf32, #tpu.memory_space<vmem>>, vector<2x3xf32>
    %c0_23 = arith.constant 0 : index
    %c0_24 = arith.constant 0 : index
    %43 = vector.load %arg11[%c0_23, %c0_24] : memref<3x128xf32, #tpu.memory_space<vmem>>, vector<3x128xf32>
    %44 = vector.extract_strided_slice %42 {offsets = [0, 0], sizes = [2, 1], strides = [1, 1]} : vector<2x3xf32> to vector<2x1xf32>
    %45 = vector.extract_strided_slice %43 {offsets = [0, 0], sizes = [1, 128], strides = [1, 1]} : vector<3x128xf32> to vector<1x128xf32>
    %46 = vector.broadcast %44 : vector<2x1xf32> to vector<2x128xf32>
    %47 = vector.broadcast %45 : vector<1x128xf32> to vector<2x128xf32>
    %48 = arith.mulf %46, %47 : vector<2x128xf32>
    %49 = vector.extract_strided_slice %42 {offsets = [0, 1], sizes = [2, 1], strides = [1, 1]} : vector<2x3xf32> to vector<2x1xf32>
    %50 = vector.extract_strided_slice %43 {offsets = [1, 0], sizes = [1, 128], strides = [1, 1]} : vector<3x128xf32> to vector<1x128xf32>
    %51 = vector.broadcast %49 : vector<2x1xf32> to vector<2x128xf32>
    %52 = vector.broadcast %50 : vector<1x128xf32> to vector<2x128xf32>
    %53 = arith.mulf %51, %52 : vector<2x128xf32>
    %54 = arith.addf %48, %53 : vector<2x128xf32>
    %55 = vector.extract_strided_slice %42 {offsets = [0, 2], sizes = [2, 1], strides = [1, 1]} : vector<2x3xf32> to vector<2x1xf32>
    %56 = vector.extract_strided_slice %43 {offsets = [2, 0], sizes = [1, 128], strides = [1, 1]} : vector<3x128xf32> to vector<1x128xf32>
    %57 = vector.broadcast %55 : vector<2x1xf32> to vector<2x128xf32>
    %58 = vector.broadcast %56 : vector<1x128xf32> to vector<2x128xf32>
    %59 = arith.mulf %57, %58 : vector<2x128xf32>
    %60 = arith.addf %54, %59 : vector<2x128xf32>
    %61 = arith.addf %41, %60 : vector<2x128xf32>
    %c0_25 = arith.constant 0 : index
    %c0_26 = arith.constant 0 : index
    %62 = vector.load %arg12[%c0_25, %c0_26] : memref<1x128xf32, #tpu.memory_space<vmem>>, vector<1x128xf32>
    %63 = vector.broadcast %18 : vector<2x1xf32> to vector<2x128xf32>
    %64 = vector.broadcast %62 : vector<1x128xf32> to vector<2x128xf32>
    %65 = arith.mulf %63, %64 : vector<2x128xf32>
    %66 = arith.addf %61, %65 : vector<2x128xf32>
    %c0_27 = arith.constant 0 : index
    %c0_28 = arith.constant 0 : index
    %67 = vector.load %arg13[%c0_27, %c0_28] : memref<1x128xf32, #tpu.memory_space<vmem>>, vector<1x128xf32>
    %68 = vector.broadcast %67 : vector<1x128xf32> to vector<2x128xf32>
    %69 = arith.addf %66, %68 : vector<2x128xf32>
    %cst_29 = arith.constant 0.000000e+00 : f32
    %70 = vector.broadcast %cst_29 : f32 to vector<2x128xf32>
    %71 = arith.cmpf oge, %69, %70 : vector<2x128xf32>
    %cst_30 = arith.constant 0.00999999977 : f32
    %72 = vector.broadcast %cst_30 : f32 to vector<2x128xf32>
    %73 = arith.mulf %72, %69 : vector<2x128xf32>
    %74 = arith.select %71, %69, %73 : vector<2x128xi1>, vector<2x128xf32>
    %c0_31 = arith.constant 0 : index
    %c0_32 = arith.constant 0 : index
    %75 = vector.load %arg14[%c0_31, %c0_32] : memref<1x128xf32, #tpu.memory_space<vmem>>, vector<1x128xf32>
    %c0_33 = arith.constant 0 : index
    %c0_34 = arith.constant 0 : index
    %76 = vector.load %arg15[%c0_33, %c0_34] : memref<1x1xf32, #tpu.memory_space<vmem>>, vector<1x1xf32>
    %77 = vector.broadcast %75 : vector<1x128xf32> to vector<2x128xf32>
    %78 = arith.mulf %74, %77 : vector<2x128xf32>
    %cst_35 = arith.constant dense<0.000000e+00> : vector<2xf32>
    %79 = vector.multi_reduction <add>, %78, %cst_35 [1] : vector<2x128xf32> to vector<2xf32>
    %80 = vector.shape_cast %79 : vector<2xf32> to vector<2x1xf32>
    %81 = vector.broadcast %76 : vector<1x1xf32> to vector<2x1xf32>
    %82 = arith.addf %80, %81 : vector<2x1xf32>
    %c0_36 = arith.constant 0 : index
    %c0_37 = arith.constant 0 : index
    %83 = vector.load %arg26[%c0_36, %c0_37] : memref<2x1xf32, #tpu.memory_space<vmem>>, vector<2x1xf32>
    tpu.vector_store %arg26[%c0_36, %c0_37], %82 {strides = array<i32>} : memref<2x1xf32, #tpu.memory_space<vmem>>, vector<2x1xf32>,
    %c0_38 = arith.constant 0 : index
    %c0_39 = arith.constant 0 : index
    %84 = vector.load %arg3[%c0_38, %c0_39] : memref<8x128xf32, #tpu.memory_space<vmem>>, vector<8x128xf32>
    %c0_40 = arith.constant 0 : index
    %c0_41 = arith.constant 0 : index
    %85 = vector.load %arg16[%c0_40, %c0_41] : memref<128x128xf32, #tpu.memory_space<vmem>>, vector<128x128xf32>
    %cst_42 = arith.constant dense<0.000000e+00> : vector<8x128xf32>
    %86 = tpu.matmul %84, %85, %cst_42 {dimension_numbers = #tpu.dot_dimension_numbers<[1], [0], [0], [1], [0, 0, 1, 1], [], []>} : vector<8x128xf32>, vector<128x128xf32>, vector<8x128xf32> -> vector<8x128xf32>
    %c0_43 = arith.constant 0 : index
    %c0_44 = arith.constant 0 : index
    %87 = vector.load %arg4[%c0_43, %c0_44] : memref<8x10xf32, #tpu.memory_space<vmem>>, vector<8x10xf32>
    %c0_45 = arith.constant 0 : index
    %c0_46 = arith.constant 0 : index
    %88 = vector.load %arg17[%c0_45, %c0_46] : memref<10x128xf32, #tpu.memory_space<vmem>>, vector<10x128xf32>
    %89 = vector.extract_strided_slice %87 {offsets = [0, 0], sizes = [8, 1], strides = [1, 1]} : vector<8x10xf32> to vector<8x1xf32>
    %90 = vector.extract_strided_slice %88 {offsets = [0, 0], sizes = [1, 128], strides = [1, 1]} : vector<10x128xf32> to vector<1x128xf32>
    %91 = vector.broadcast %89 : vector<8x1xf32> to vector<8x128xf32>
    %92 = vector.broadcast %90 : vector<1x128xf32> to vector<8x128xf32>
    %93 = arith.mulf %91, %92 : vector<8x128xf32>
    %94 = vector.extract_strided_slice %87 {offsets = [0, 1], sizes = [8, 1], strides = [1, 1]} : vector<8x10xf32> to vector<8x1xf32>
    %95 = vector.extract_strided_slice %88 {offsets = [1, 0], sizes = [1, 128], strides = [1, 1]} : vector<10x128xf32> to vector<1x128xf32>
    %96 = vector.broadcast %94 : vector<8x1xf32> to vector<8x128xf32>
    %97 = vector.broadcast %95 : vector<1x128xf32> to vector<8x128xf32>
    %98 = arith.mulf %96, %97 : vector<8x128xf32>
    %99 = arith.addf %93, %98 : vector<8x128xf32>
    %100 = vector.extract_strided_slice %87 {offsets = [0, 2], sizes = [8, 1], strides = [1, 1]} : vector<8x10xf32> to vector<8x1xf32>
    %101 = vector.extract_strided_slice %88 {offsets = [2, 0], sizes = [1, 128], strides = [1, 1]} : vector<10x128xf32> to vector<1x128xf32>
    %102 = vector.broadcast %100 : vector<8x1xf32> to vector<8x128xf32>
    %103 = vector.broadcast %101 : vector<1x128xf32> to vector<8x128xf32>
    %104 = arith.mulf %102, %103 : vector<8x128xf32>
    %105 = arith.addf %99, %104 : vector<8x128xf32>
    %106 = vector.extract_strided_slice %87 {offsets = [0, 3], sizes = [8, 1], strides = [1, 1]} : vector<8x10xf32> to vector<8x1xf32>
    %107 = vector.extract_strided_slice %88 {offsets = [3, 0], sizes = [1, 128], strides = [1, 1]} : vector<10x128xf32> to vector<1x128xf32>
    %108 = vector.broadcast %106 : vector<8x1xf32> to vector<8x128xf32>
    %109 = vector.broadcast %107 : vector<1x128xf32> to vector<8x128xf32>
    %110 = arith.mulf %108, %109 : vector<8x128xf32>
    %111 = arith.addf %105, %110 : vector<8x128xf32>
    %112 = vector.extract_strided_slice %87 {offsets = [0, 4], sizes = [8, 1], strides = [1, 1]} : vector<8x10xf32> to vector<8x1xf32>
    %113 = vector.extract_strided_slice %88 {offsets = [4, 0], sizes = [1, 128], strides = [1, 1]} : vector<10x128xf32> to vector<1x128xf32>
    %114 = vector.broadcast %112 : vector<8x1xf32> to vector<8x128xf32>
    %115 = vector.broadcast %113 : vector<1x128xf32> to vector<8x128xf32>
    %116 = arith.mulf %114, %115 : vector<8x128xf32>
    %117 = arith.addf %111, %116 : vector<8x128xf32>
    %118 = vector.extract_strided_slice %87 {offsets = [0, 5], sizes = [8, 1], strides = [1, 1]} : vector<8x10xf32> to vector<8x1xf32>
    %119 = vector.extract_strided_slice %88 {offsets = [5, 0], sizes = [1, 128], strides = [1, 1]} : vector<10x128xf32> to vector<1x128xf32>
    %120 = vector.broadcast %118 : vector<8x1xf32> to vector<8x128xf32>
    %121 = vector.broadcast %119 : vector<1x128xf32> to vector<8x128xf32>
    %122 = arith.mulf %120, %121 : vector<8x128xf32>
    %123 = arith.addf %117, %122 : vector<8x128xf32>
    %124 = vector.extract_strided_slice %87 {offsets = [0, 6], sizes = [8, 1], strides = [1, 1]} : vector<8x10xf32> to vector<8x1xf32>
    %125 = vector.extract_strided_slice %88 {offsets = [6, 0], sizes = [1, 128], strides = [1, 1]} : vector<10x128xf32> to vector<1x128xf32>
    %126 = vector.broadcast %124 : vector<8x1xf32> to vector<8x128xf32>
    %127 = vector.broadcast %125 : vector<1x128xf32> to vector<8x128xf32>
    %128 = arith.mulf %126, %127 : vector<8x128xf32>
    %129 = arith.addf %123, %128 : vector<8x128xf32>
    %130 = vector.extract_strided_slice %87 {offsets = [0, 7], sizes = [8, 1], strides = [1, 1]} : vector<8x10xf32> to vector<8x1xf32>
    %131 = vector.extract_strided_slice %88 {offsets = [7, 0], sizes = [1, 128], strides = [1, 1]} : vector<10x128xf32> to vector<1x128xf32>
    %132 = vector.broadcast %130 : vector<8x1xf32> to vector<8x128xf32>
    %133 = vector.broadcast %131 : vector<1x128xf32> to vector<8x128xf32>
    %134 = arith.mulf %132, %133 : vector<8x128xf32>
    %135 = arith.addf %129, %134 : vector<8x128xf32>
    %136 = vector.extract_strided_slice %87 {offsets = [0, 8], sizes = [8, 1], strides = [1, 1]} : vector<8x10xf32> to vector<8x1xf32>
    %137 = vector.extract_strided_slice %88 {offsets = [8, 0], sizes = [1, 128], strides = [1, 1]} : vector<10x128xf32> to vector<1x128xf32>
    %138 = vector.broadcast %136 : vector<8x1xf32> to vector<8x128xf32>
    %139 = vector.broadcast %137 : vector<1x128xf32> to vector<8x128xf32>
    %140 = arith.mulf %138, %139 : vector<8x128xf32>
    %141 = arith.addf %135, %140 : vector<8x128xf32>
    %142 = vector.extract_strided_slice %87 {offsets = [0, 9], sizes = [8, 1], strides = [1, 1]} : vector<8x10xf32> to vector<8x1xf32>
    %143 = vector.extract_strided_slice %88 {offsets = [9, 0], sizes = [1, 128], strides = [1, 1]} : vector<10x128xf32> to vector<1x128xf32>
    %144 = vector.broadcast %142 : vector<8x1xf32> to vector<8x128xf32>
    %145 = vector.broadcast %143 : vector<1x128xf32> to vector<8x128xf32>
    %146 = arith.mulf %144, %145 : vector<8x128xf32>
    %147 = arith.addf %141, %146 : vector<8x128xf32>
    %148 = arith.addf %86, %147 : vector<8x128xf32>
    %c0_47 = arith.constant 0 : index
    %c0_48 = arith.constant 0 : index
    %149 = vector.load %arg18[%c0_47, %c0_48] : memref<1x128xf32, #tpu.memory_space<vmem>>, vector<1x128xf32>
    %150 = vector.broadcast %149 : vector<1x128xf32> to vector<8x128xf32>
    %151 = arith.addf %148, %150 : vector<8x128xf32>
    %cst_49 = arith.constant 0.000000e+00 : f32
    %152 = vector.broadcast %cst_49 : f32 to vector<8x128xf32>
    %153 = arith.cmpf oge, %151, %152 : vector<8x128xf32>
    %cst_50 = arith.constant 0.00999999977 : f32
    %154 = vector.broadcast %cst_50 : f32 to vector<8x128xf32>
    %155 = arith.mulf %154, %151 : vector<8x128xf32>
    %156 = arith.select %153, %151, %155 : vector<8x128xi1>, vector<8x128xf32>
    %c0_51 = arith.constant 0 : index
    %c0_52 = arith.constant 0 : index
    %157 = vector.load %arg19[%c0_51, %c0_52] : memref<128x128xf32, #tpu.memory_space<vmem>>, vector<128x128xf32>
    %cst_53 = arith.constant dense<0.000000e+00> : vector<8x128xf32>
    %158 = tpu.matmul %156, %157, %cst_53 {dimension_numbers = #tpu.dot_dimension_numbers<[1], [0], [0], [1], [0, 0, 1, 1], [], []>} : vector<8x128xf32>, vector<128x128xf32>, vector<8x128xf32> -> vector<8x128xf32>
    %c0_54 = arith.constant 0 : index
    %c0_55 = arith.constant 0 : index
    %159 = vector.load %arg20[%c0_54, %c0_55] : memref<1x128xf32, #tpu.memory_space<vmem>>, vector<1x128xf32>
    %160 = vector.broadcast %159 : vector<1x128xf32> to vector<8x128xf32>
    %161 = arith.addf %158, %160 : vector<8x128xf32>
    %c0_56 = arith.constant 0 : index
    %c0_57 = arith.constant 0 : index
    %162 = vector.load %arg27[%c0_56, %c0_57] : memref<8x128xf32, #tpu.memory_space<vmem>>, vector<8x128xf32>
    tpu.vector_store %arg27[%c0_56, %c0_57], %161 {strides = array<i32>} : memref<8x128xf32, #tpu.memory_space<vmem>>, vector<8x128xf32>,
    %c0_58 = arith.constant 0 : index
    %c0_59 = arith.constant 0 : index
    %163 = vector.load %arg21[%c0_58, %c0_59] : memref<128x128xf32, #tpu.memory_space<vmem>>, vector<128x128xf32>
    %cst_60 = arith.constant dense<0.000000e+00> : vector<2x128xf32>
    %164 = tpu.matmul %0, %163, %cst_60 {dimension_numbers = #tpu.dot_dimension_numbers<[1], [0], [0], [1], [0, 0, 1, 1], [], []>} : vector<2x128xf32>, vector<128x128xf32>, vector<2x128xf32> -> vector<2x128xf32>
    %c0_61 = arith.constant 0 : index
    %c0_62 = arith.constant 0 : index
    %165 = vector.load %arg22[%c0_61, %c0_62] : memref<1x128xf32, #tpu.memory_space<vmem>>, vector<1x128xf32>
    %166 = vector.broadcast %165 : vector<1x128xf32> to vector<2x128xf32>
    %167 = arith.addf %164, %166 : vector<2x128xf32>
    %cst_63 = arith.constant 0.000000e+00 : f32
    %168 = vector.broadcast %cst_63 : f32 to vector<2x128xf32>
    %169 = arith.cmpf oge, %167, %168 : vector<2x128xf32>
    %cst_64 = arith.constant 0.00999999977 : f32
    %170 = vector.broadcast %cst_64 : f32 to vector<2x128xf32>
    %171 = arith.mulf %170, %167 : vector<2x128xf32>
    %172 = arith.select %169, %167, %171 : vector<2x128xi1>, vector<2x128xf32>
    %c0_65 = arith.constant 0 : index
    %c0_66 = arith.constant 0 : index
    %173 = vector.load %arg23[%c0_65, %c0_66] : memref<1x128xf32, #tpu.memory_space<vmem>>, vector<1x128xf32>
    %c0_67 = arith.constant 0 : index
    %c0_68 = arith.constant 0 : index
    %174 = vector.load %arg24[%c0_67, %c0_68] : memref<1x1xf32, #tpu.memory_space<vmem>>, vector<1x1xf32>
    %175 = vector.broadcast %173 : vector<1x128xf32> to vector<2x128xf32>
    %176 = arith.mulf %172, %175 : vector<2x128xf32>
    %cst_69 = arith.constant dense<0.000000e+00> : vector<2xf32>
    %177 = vector.multi_reduction <add>, %176, %cst_69 [1] : vector<2x128xf32> to vector<2xf32>
    %178 = vector.shape_cast %177 : vector<2xf32> to vector<2x1xf32>
    %179 = vector.broadcast %174 : vector<1x1xf32> to vector<2x1xf32>
    %180 = arith.addf %178, %179 : vector<2x1xf32>
    %c0_70 = arith.constant 0 : index
    %c0_71 = arith.constant 0 : index
    %181 = vector.load %arg28[%c0_70, %c0_71] : memref<2x1xf32, #tpu.memory_space<vmem>>, vector<2x1xf32>
    tpu.vector_store %arg28[%c0_70, %c0_71], %180 {strides = array<i32>} : memref<2x1xf32, #tpu.memory_space<vmem>>, vector<2x1xf32>,
    return
  }
}

</mosaic_0001>

<bundles_post_ra>
// kernel: network_forward.3
= control target key start
LH: loop header
LB: loop body
LE: loop exit
PB: predicated region body
PF: predicated region fallthrough
CT: control target
= control target key end

     0   :  { %v1253_v0 = vmov 0.0|0.0   ;;  %vm1254_vm0 = vmmov 0   ;;  %v1255_v4 = vmov 0.0   ;;  %v1256_v7 = vmov 2   ;;  %s1834_s5 = inlined_call_operand.vmem [shape: f32[128,128], index: 5, kind: input, shape index: {}]   ;;  %s1835_s4 = inlined_call_operand.vmem [shape: f32[8,10], index: 4, kind: input, shape index: {}]   ;;  %s1836_s16 = inlined_call_operand.vmem [shape: f32[128,128], index: 16, kind: input, shape index: {}]   ;;  %s1837_s0 = inlined_call_operand.vmem [shape: f32[2,128], index: 0, kind: input, shape index: {}]   ;;  %s1838_s3 = inlined_call_operand.vmem [shape: f32[8,128], index: 3, kind: input, shape index: {}]   ;;  %s1839_s9 = inlined_call_operand.vmem [shape: f32[128,128], index: 9, kind: input, shape index: {}]   ;;  %s1840_s21 = inlined_call_operand.vmem [shape: f32[128,128], index: 21, kind: input, shape index: {}]   ;;  %s1841_s19 = inlined_call_operand.vmem [shape: f32[128,128], index: 19, kind: input, shape index: {}]   ;;  %s1842_s1 = inlined_call_operand.vmem [shape: f32[2,3], index: 1, kind: input, shape index: {}]   ;;  %s1843_s8 = inlined_call_operand.<no memory space> [shape: f32[1,1], index: 8, kind: input, shape index: {}]   ;;  %s1844_s2 = inlined_call_operand.vmem [shape: f32[2,3], index: 2, kind: input, shape index: {}]   ;;  %s1845_s17 = inlined_call_operand.vmem [shape: f32[10,128], index: 17, kind: input, shape index: {}]   ;;  %s1846_s6 = inlined_call_operand.vmem [shape: f32[1,128], index: 6, kind: input, shape index: {}]   ;;  %s1847_s7 = inlined_call_operand.vmem [shape: f32[1,128], index: 7, kind: input, shape index: {}]   ;;  %s1848_s18 = inlined_call_operand.vmem [shape: f32[1,128], index: 18, kind: input, shape index: {}]   ;;  %s1849_s25 = inlined_call_operand.vmem [shape: f32[2,1], index: 25, kind: output, shape index: {0}]   ;;  %s1850_s22 = inlined_call_operand.vmem [shape: f32[1,128], index: 22, kind: input, shape index: {}]   ;;  %s1851_s23 = inlined_call_operand.vmem [shape: f32[1,128], index: 23, kind: input, shape index: {}]   ;;  %s1852_s24 = inlined_call_operand.<no memory space> [shape: f32[1,1], index: 24, kind: input, shape index: {}]   ;;  %s1853_s15 = inlined_call_operand.<no memory space> [shape: f32[1,1], index: 15, kind: input, shape index: {}]   ;;  %s1854_s20 = inlined_call_operand.vmem [shape: f32[1,128], index: 20, kind: input, shape index: {}]   ;;  %s1855_s27 = inlined_call_operand.vmem [shape: f32[8,128], index: 27, kind: output, shape index: {2}]   ;;  %s1856_s10 = inlined_call_operand.vmem [shape: f32[3,128], index: 10, kind: input, shape index: {}]   ;;  %s1857_s11 = inlined_call_operand.vmem [shape: f32[3,128], index: 11, kind: input, shape index: {}]   ;;  %s1858_s12 = inlined_call_operand.vmem [shape: f32[1,128], index: 12, kind: input, shape index: {}]   ;;  %s1859_s13 = inlined_call_operand.vmem [shape: f32[1,128], index: 13, kind: input, shape index: {}]   ;;  %s1860_s14 = inlined_call_operand.vmem [shape: f32[1,128], index: 14, kind: input, shape index: {}]   ;;  %s1861_s28 = inlined_call_operand.vmem [shape: f32[2,1], index: 28, kind: output, shape index: {3}]   ;;  %s1862_s26 = inlined_call_operand.vmem [shape: f32[2,1], index: 26, kind: output, shape index: {1}]  }
   0x1   :  { %1869 = sst [smem:[#allocation5_spill]] %s1834_s5  ;;  %1104 = vmatprep.subr.bf16.mxu0 %v1253_v0  ;;  %961 = vmatprep.mubr.msk.f32.mxu0 %vm1254_vm0, %v1255_v4  ;;  %v1257_v8 = vmov 0   ;;  %v1258_v22 = vmov 3   ;;  %v1259_v23 = vmov 1   ;;  %v1260_v27 = vmov 4  }
   0x2   :  { %1870 = sst [smem:[#allocation6_spill]] %s1835_s4  ;;  %1239 = vset.pattern.permute.xlu1 %v1256_v7  ;;  %1237 = vset.pattern.permute.xlu0 %v1257_v8  ;;  %v1261_v28 = vmov 5   ;;  %v1262_v32 = vmov 6   ;;  %v1263_v36 = vmov 8   ;;  %v1264_v39 = vmov 7  }
   0x3   :  { %1871 = sst [smem:[#allocation7_spill]] %s1836_s16  ;;  %1128 = vmatprep.subr.bf16.mxu1 %v1253_v0  ;;  %996 = vmatprep.mubr.msk.f32.mxu1 %vm1254_vm0, %v1255_v4  ;;  %s1883_s5 = sld [smem:[#allocation6_spill]]  ;;  %v1265_v45 = vmov 9   ;;  %vm196_vm2 = vcmask 1041408   ;;  %vm207_vm4 = vcmask 1024  }
   0x4   :  { %1872 = sst [smem:[#allocation8_spill]] %s1837_s0  ;;  %s1884_s4 = sld [smem:[#allocation7_spill]] }
   0x5   :  { %1873 = sst [smem:[#allocation9_spill]] %s1838_s3  ;;  %s1885_s0 = sld [smem:[#allocation8_spill]] }
   0x6   :  { %1874 = sst [smem:[#allocation10_spill]] %s1839_s9  ;;  %s1882_s9 = sld [smem:[#allocation5_spill]] }
   0x7   :  { %1875 = sst [smem:[#allocation11_spill]] %s1840_s21  ;;  %s1886_s30 = sld [smem:[#allocation9_spill]] }
   0x8   :  { %1876 = sst [smem:[#allocation12_spill]] %s1841_s19  ;;  %s1887_s21 = sld [smem:[#allocation10_spill]] }
   0x9   :  { %1877 = sst [smem:[#allocation13_spill]] %s1842_s1  ;;  %v1448_v16 = vld [vmem:[%s1883_s5] sm:$0xff] }
   0xa   :  { %1878 = sst [smem:[#allocation14_spill]] %s1843_s8  ;;  %446 = vperm.xlu1 %1239, %v1448_v16   ;;  %427 = vperm.xlu0 %1237, %v1448_v16   ;;  %v406_v34 = vld [vmem:[%s1884_s4] sm:$0xff]  ;;  %v407_v35 = vld [vmem:[%s1884_s4 + $0x8] sm:$0xff]  ;;  %v408_v40 = vld [vmem:[%s1884_s4 + $0x10] sm:$0xff]  ;;  %s1890_s29 = sld [smem:[#allocation13_spill]] }
   0xb   :  { %1879 = sst [smem:[#allocation15_spill]] %s1844_s2  ;;  %v1497_v37 = vld [vmem:[%s1885_s0] sm:$0x3]  ;;  %v1153_v38 = vpack.c.bf16 %v407_v35, %v406_v34  ;;  %v409_v41 = vld [vmem:[%s1884_s4 + $0x18] sm:$0xff]  ;;  %v411_v44 = vld [vmem:[%s1884_s4 + $0x28] sm:$0xff]  ;;  %s1888_s2 = sld [smem:[#allocation11_spill]] }
   0xc   :  { %1880 = sst [smem:[#allocation16_spill]] %s1845_s17  ;;  %v91_v1 = vld [vmem:[%s1882_s9] sm:$0xff]  ;;  %v92_v2 = vld [vmem:[%s1882_s9 + $0x8] sm:$0xff]  ;;  %v93_v3 = vld [vmem:[%s1882_s9 + $0x10] sm:$0xff]  ;;  %v1156_v42 = vpack.c.bf16 %v409_v41, %v408_v40  ;;  %s1889_s0 = sld [smem:[#allocation12_spill]] }
   0xd   :  { %1881 = sst [smem:[#allocation17_spill]] %s1846_s6  ;;  %v1105_v5 = vpack.c.bf16 %v92_v2, %v91_v1  ;;  %v94_v6 = vld [vmem:[%s1882_s9 + $0x18] sm:$0xff]  ;;  %v95_v10 = vld [vmem:[%s1882_s9 + $0x20] sm:$0xff]  ;;  %v96_v11 = vld [vmem:[%s1882_s9 + $0x28] sm:$0xff] }
   0xe   :  { %v1108_v9 = vpack.c.bf16 %v94_v6, %v93_v3  ;;  %v1111_v12 = vpack.c.bf16 %v96_v11, %v95_v10  ;;  %v97_v13 = vld [vmem:[%s1882_s9 + $0x30] sm:$0xff]  ;;  %v98_v14 = vld [vmem:[%s1882_s9 + $0x38] sm:$0xff]  ;;  %v99_v17 = vld [vmem:[%s1882_s9 + $0x40] sm:$0xff]  ;;  %1240 = vset.pattern.permute.xlu1 %v1258_v22  ;;  %1238 = vset.pattern.permute.xlu0 %v1259_v23 }
   0xf   :  { %1106 = vmatpush3.bf16.msra.mxu0 %v1105_v5  ;;  %v1114_v15 = vpack.c.bf16 %v98_v14, %v97_v13  ;;  %v100_v18 = vld [vmem:[%s1882_s9 + $0x48] sm:$0xff]  ;;  %v101_v20 = vld [vmem:[%s1882_s9 + $0x50] sm:$0xff]  ;;  %v102_v21 = vld [vmem:[%s1882_s9 + $0x58] sm:$0xff]  ;;  %456 = vperm.xlu1 %1240, %v1448_v16  }
  0x10   :  { %1107 = vmatprep.subr.bf16.mxu0 %v1253_v0  ;;  %v1117_v19 = vpack.c.bf16 %v100_v18, %v99_v17  ;;  %436 = vperm.xlu0 %1238, %v1448_v16   ;;  %v1120_v24 = vpack.c.bf16 %v102_v21, %v101_v20  ;;  %v103_v25 = vld [vmem:[%s1882_s9 + $0x60] sm:$0xff]  ;;  %v104_v26 = vld [vmem:[%s1882_s9 + $0x68] sm:$0xff]  ;;  %v105_v30 = vld [vmem:[%s1882_s9 + $0x70] sm:$0xff] }
  0x11   :  { %v1123_v29 = vpack.c.bf16 %v104_v26, %v103_v25  ;;  %v106_v31 = vld [vmem:[%s1882_s9 + $0x78] sm:$0xff]  ;;  %v410_v43 = vld [vmem:[%s1884_s4 + $0x20] sm:$0xff]  ;;  %v412_v47 = vld [vmem:[%s1884_s4 + $0x30] sm:$0xff]  ;;  %s1891_s9 = sld [smem:[#allocation14_spill]] }
  0x12   :  { %v1126_v33 = vpack.c.bf16 %v106_v31, %v105_v30  ;;  %v1159_v46 = vpack.c.bf16 %v411_v44, %v410_v43  ;;  %v413_v48 = vld [vmem:[%s1884_s4 + $0x38] sm:$0xff]  ;;  %v414_v50 = vld [vmem:[%s1884_s4 + $0x40] sm:$0xff]  ;;  %v415_v51 = vld [vmem:[%s1884_s4 + $0x48] sm:$0xff] }
  0x13   :  { %1109 = vmatpush3.bf16.msra.mxu0 %v1108_v9  ;;  %1241 = vset.pattern.permute.xlu1 %v1260_v27  ;;  %v1162_v49 = vpack.c.bf16 %v413_v48, %v412_v47  ;;  %v1165_v52 = vpack.c.bf16 %v415_v51, %v414_v50  ;;  %v416_v53 = vld [vmem:[%s1884_s4 + $0x50] sm:$0xff]  ;;  %v417_v54 = vld [vmem:[%s1884_s4 + $0x58] sm:$0xff]  ;;  %v418_v56 = vld [vmem:[%s1884_s4 + $0x60] sm:$0xff] }
  0x14   :  { %1110 = vmatprep.subr.bf16.mxu0 %v1253_v0  ;;  %466 = vperm.xlu1 %1241, %v1448_v16   ;;  %v1168_v55 = vpack.c.bf16 %v417_v54, %v416_v53  ;;  %v419_v57 = vld [vmem:[%s1884_s4 + $0x68] sm:$0xff]  ;;  %v420_v59 = vld [vmem:[%s1884_s4 + $0x70] sm:$0xff]  ;;  %v421_v60 = vld [vmem:[%s1884_s4 + $0x78] sm:$0xff]  ;;  %s1894_s4 = sld [smem:[#allocation17_spill]] }
  0x15   :  { %1242 = vset.pattern.permute.xlu0 %v1261_v28  ;;  %v1171_v58 = vpack.c.bf16 %v419_v57, %v418_v56  ;;  %v1174_v61 = vpack.c.bf16 %v421_v60, %v420_v59  ;;  %v405_v62 = vld [vmem:[%s1886_s30] sm:$0xff]  ;;  %v210_v1 = vld [vmem:[%s1887_s21 + $0x8] sm:$0xff]  ;;  %v211_v2 = vld [vmem:[%s1887_s21 + $0x10] sm:$0xff]  ;;  %s1893_s30 = sld [smem:[#allocation16_spill]] }
  0x16   :  { %476 = vperm.xlu0 %1242, %v1448_v16   ;;  %v209_v63 = vld [vmem:[%s1887_s21] sm:$0xff]  ;;  %v212_v5 = vld [vmem:[%s1887_s21 + $0x18] sm:$0xff]  ;;  %v214_v9 = vld [vmem:[%s1887_s21 + $0x28] sm:$0xff] }
  0x17   :  { %1112 = vmatpush3.bf16.msra.mxu0 %v1111_v12  ;;  %v1129_v3 = vpack.c.bf16 %v210_v1, %v209_v63  ;;  %v1132_v6 = vpack.c.bf16 %v212_v5, %v211_v2  ;;  %v700_v10 = vld [vmem:[%s1888_s2] sm:$0xff]  ;;  %v701_v11 = vld [vmem:[%s1888_s2 + $0x8] sm:$0xff]  ;;  %v702_v13 = vld [vmem:[%s1888_s2 + $0x10] sm:$0xff]  ;;  %v34_v57 = vstv %s1891_s9 }
  0x18   :  { %1113 = vmatprep.subr.bf16.mxu0 %v1253_v0  ;;  %1243 = vset.pattern.permute.xlu1 %v1262_v32  ;;  %v1201_v12 = vpack.c.bf16 %v701_v11, %v700_v10  ;;  %v703_v14 = vld [vmem:[%s1888_s2 + $0x18] sm:$0xff]  ;;  %v705_v20 = vld [vmem:[%s1888_s2 + $0x28] sm:$0xff]  ;;  %v217_v22 = vld [vmem:[%s1887_s21 + $0x40] sm:$0xff]  ;;  %35 = vst [vmem:[#allocation2] sm:$0x1] %v34_v57 }
  0x19   :  { %486 = vperm.xlu1 %1243, %v1448_v16   ;;  %1130 = vmatpush3.bf16.msra.mxu1 %v1129_v3  ;;  %v1204_v17 = vpack.c.bf16 %v703_v14, %v702_v13  ;;  %v216_v18 = vld [vmem:[%s1887_s21 + $0x38] sm:$0xff]  ;;  %v218_v25 = vld [vmem:[%s1887_s21 + $0x48] sm:$0xff]  ;;  %v706_v26 = vld [vmem:[%s1888_s2 + $0x30] sm:$0xff] }
  0x1a   :  { %1245 = vset.pattern.permute.xlu0 %v1263_v36  ;;  %1131 = vmatprep.subr.bf16.mxu1 %v1253_v0  ;;  %v707_v27 = vld [vmem:[%s1888_s2 + $0x38] sm:$0xff]  ;;  %v1141_v28 = vpack.c.bf16 %v218_v25, %v217_v22  ;;  %v708_v32 = vld [vmem:[%s1888_s2 + $0x40] sm:$0xff]  ;;  %v713_v47 = vld [vmem:[%s1888_s2 + $0x68] sm:$0xff] }
  0x1b   :  { %1115 = vmatpush3.bf16.msra.mxu0 %v1114_v15  ;;  %506 = vperm.xlu0 %1245, %v1448_v16   ;;  %v1210_v30 = vpack.c.bf16 %v707_v27, %v706_v26  ;;  %v220_v31 = vld [vmem:[%s1887_s21 + $0x58] sm:$0xff]  ;;  %v221_v35 = vld [vmem:[%s1887_s21 + $0x60] sm:$0xff]  ;;  %v607_v51 = vld [vmem:[%s1889_s0 + $0x8] sm:$0xff] }
  0x1c   :  { %1116 = vmatprep.subr.bf16.mxu0 %v1253_v0  ;;  %v711_v40 = vld [vmem:[%s1888_s2 + $0x58] sm:$0xff]  ;;  %v606_v50 = vld [vmem:[%s1889_s0] sm:$0xff]  ;;  %v612_v2 = vld [vmem:[%s1889_s0 + $0x30] sm:$0xff] }
  0x1d   :  { %1244 = vset.pattern.permute.xlu1 %v1264_v39  ;;  %1133 = vmatpush3.bf16.msra.mxu1 %v1132_v6  ;;  %v710_v39 = vld [vmem:[%s1888_s2 + $0x50] sm:$0xff]  ;;  %v224_v44 = vld [vmem:[%s1887_s21 + $0x78] sm:$0xff]  ;;  %v1177_v54 = vpack.c.bf16 %v607_v51, %v606_v50  ;;  %v225_v56 = vld [vmem:[%s1890_s29] sm:$0x3]  ;;  %s1892_s29 = sld [smem:[#allocation15_spill]] }
  0x1e   :  { %496 = vperm.xlu1 %1244, %v1448_v16   ;;  %1134 = vmatprep.subr.bf16.mxu1 %v1253_v0  ;;  %v1216_v43 = vpack.c.bf16 %v711_v40, %v710_v39  ;;  %v715_v53 = vld [vmem:[%s1888_s2 + $0x78] sm:$0xff]  ;;  %v614_v3 = vld [vmem:[%s1889_s0 + $0x40] sm:$0xff]  ;;  %v615_v5 = vld [vmem:[%s1889_s0 + $0x48] sm:$0xff] }
  0x1f   :  { %1118 = vmatpush3.bf16.msra.mxu0 %v1117_v19  ;;  %1247 = vset.pattern.permute.xlu0 %v1256_v7  ;;  %v704_v19 = vld [vmem:[%s1888_s2 + $0x20] sm:$0xff]  ;;  %v609_v59 = vld [vmem:[%s1889_s0 + $0x18] sm:$0xff]  ;;  %v1189_v6 = vpack.c.bf16 %v615_v5, %v614_v3  ;;  %v619_v11 = vld [vmem:[%s1889_s0 + $0x68] sm:$0xff] }
  0x20   :  { %1119 = vmatprep.subr.bf16.mxu0 %v1253_v0  ;;  %248 = vperm.xlu0 %1247, %v225_v56   ;;  %v620_v13 = vld [vmem:[%s1889_s0 + $0x70] sm:$0xff]  ;;  %v621_v14 = vld [vmem:[%s1889_s0 + $0x78] sm:$0xff] }
  0x22   :  { %1246 = vset.pattern.permute.xlu1 %v1265_v45 }
  0x23   :  { %1121 = vmatpush3.bf16.msra.mxu0 %v1120_v24  ;;  %516 = vperm.xlu1 %1246, %v1448_v16   ;;  %v215_v16 = vld [vmem:[%s1887_s21 + $0x30] sm:$0xff]  ;;  %v1207_v24 = vpack.c.bf16 %v705_v20, %v704_v19  ;;  %v1707_v1 = vld [vmem:[%s1892_s29] sm:$0x3] }
  0x24   :  { %1122 = vmatprep.subr.bf16.mxu0 %v1253_v0  ;;  %v1138_v21 = vpack.c.bf16 %v216_v18, %v215_v16  ;;  %1248 = vset.pattern.permute.xlu0 %v1257_v8  ;;  %v232_v16 = vlaneseq  ;;  %v423_v20 = vld [vmem:[%s1893_s30] sm:$0xff] }
  0x25   :  { %229 = vperm.xlu0 %1248, %v225_v56  }
  0x27   :  { %1124 = vmatpush3.bf16.msra.mxu0 %v1123_v29  ;;  %1250 = vset.pattern.permute.xlu1 %v1256_v7  ;;  %v213_v7 = vld [vmem:[%s1887_s21 + $0x20] sm:$0xff]  ;;  %v219_v29 = vld [vmem:[%s1887_s21 + $0x50] sm:$0xff] }
  0x28   :  { %1125 = vmatprep.subr.bf16.mxu0 %v1253_v0  ;;  %v1135_v15 = vpack.c.bf16 %v214_v9, %v213_v7  ;;  %v1144_v34 = vpack.c.bf16 %v220_v31, %v219_v29  ;;  %v616_v7 = vld [vmem:[%s1889_s0 + $0x50] sm:$0xff]  ;;  %v617_v9 = vld [vmem:[%s1889_s0 + $0x58] sm:$0xff] }
  0x29   :  { %331 = vperm.xlu0 %1248, %v1707_v1   ;;  %v1192_v10 = vpack.c.bf16 %v617_v9, %v616_v7 }
  0x2a   :  { %1136 = vmatpush3.bf16.msra.mxu1 %v1135_v15  ;;  %v1198_v15 = vpack.c.bf16 %v621_v14, %v620_v13 }
  0x2b   :  { %1127 = vmatpush3.bf16.msra.mxu0 %v1126_v33  ;;  %1137 = vmatprep.subr.bf16.mxu1 %v1253_v0  ;;  %v709_v33 = vld [vmem:[%s1888_s2 + $0x48] sm:$0xff] }
  0x2c   :  { %1152 = vmatprep.subr.bf16.mxu0 %v1253_v0  ;;  %v1213_v36 = vpack.c.bf16 %v709_v33, %v708_v32 }
  0x2d   :  { %1249 = vset.pattern.permute.xlu0 %v1259_v23  ;;  %v618_v23 = vld [vmem:[%s1889_s0 + $0x60] sm:$0xff] }
  0x2e   :  { %962 = vmatmul.mubr.f32.vlgmr.msra.gmra.mrb[0].mxu0 %v1497_v37  ;;  %1139 = vmatpush3.bf16.msra.mxu1 %v1138_v21 }
  0x2f   :  { %1154 = vmatpush3.bf16.msra.mxu0 %v1153_v38  ;;  %1031 = vmatprep.mubr.msk.f32.mxu0 %vm1254_vm0, %v1255_v4  ;;  %v222_v38 = vld [vmem:[%s1887_s21 + $0x68] sm:$0xff] }
  0x30   :  { %1155 = vmatprep.subr.bf16.mxu0 %v1253_v0  ;;  %1140 = vmatprep.subr.bf16.mxu1 %v1253_v0  ;;  %v1147_v41 = vpack.c.bf16 %v222_v38, %v221_v35  ;;  %v832_v35 = vld [vmem:[%s1894_s4] ss:$0 sm:$0xff] }
  0x31   :  { %238 = vperm.xlu0 %1249, %v225_v56  }
  0x32   :  { %1142 = vmatpush3.bf16.msra.mxu1 %v1141_v28 }
  0x33   :  { %1157 = vmatpush3.bf16.msra.mxu0 %v1156_v42  ;;  %1143 = vmatprep.subr.bf16.mxu1 %v1253_v0  ;;  %v223_v42 = vld [vmem:[%s1887_s21 + $0x70] sm:$0xff] }
  0x34   :  { %1158 = vmatprep.subr.bf16.mxu0 %v1253_v0  ;;  %v1150_v48 = vpack.c.bf16 %v224_v44, %v223_v42 }
  0x35   :  { %340 = vperm.xlu0 %1249, %v1707_v1  }
  0x36   :  { %1145 = vmatpush3.bf16.msra.mxu1 %v1144_v34 }
  0x37   :  { %1160 = vmatpush3.bf16.msra.mxu0 %v1159_v46  ;;  %1146 = vmatprep.subr.bf16.mxu1 %v1253_v0  ;;  %v712_v46 = vld [vmem:[%s1888_s2 + $0x60] sm:$0xff] }
  0x38   :  { %1161 = vmatprep.subr.bf16.mxu0 %v1253_v0 }
  0x39   :  { %1251 = vset.pattern.permute.xlu0 %v1257_v8 }
  0x3a   :  { %1148 = vmatpush3.bf16.msra.mxu1 %v1147_v41 }
  0x3b   :  { %1163 = vmatpush3.bf16.msra.mxu0 %v1162_v49  ;;  %v1219_v49 = vpack.c.bf16 %v713_v47, %v712_v46  ;;  %1149 = vmatprep.subr.bf16.mxu1 %v1253_v0  ;;  %v833_v47 = vld [vmem:[%s1847_s7] ss:$0 sm:$0xff] }
  0x3c   :  { %1164 = vmatprep.subr.bf16.mxu0 %v1253_v0 }
  0x3e   :  { %1151 = vmatpush3.bf16.msra.mxu1 %v1150_v48 }
  0x3f   :  { %1166 = vmatpush3.bf16.msra.mxu0 %v1165_v52  ;;  %v714_v52 = vld [vmem:[%s1888_s2 + $0x70] sm:$0xff]  ;;  %1176 = vmatprep.subr.bf16.mxu1 %v1253_v0 }
  0x40   :  { %1167 = vmatprep.subr.bf16.mxu0 %v1253_v0 }
  0x41   :  { %997 = vmatmul.mubr.f32.vlgmr.msra.gmra.mrb[0].mxu1 %v1497_v37 }
  0x42   :  { %1178 = vmatpush3.bf16.msra.mxu1 %v1177_v54  ;;  %1066 = vmatprep.mubr.msk.f32.mxu1 %vm1254_vm0, %v1255_v4 }
  0x43   :  { %1169 = vmatpush3.bf16.msra.mxu0 %v1168_v55  ;;  %v1222_v55 = vpack.c.bf16 %v715_v53, %v714_v52  ;;  %1179 = vmatprep.subr.bf16.mxu1 %v1253_v0 }
  0x44   :  { %1170 = vmatprep.subr.bf16.mxu0 %v1253_v0 }
  0x47   :  { %1172 = vmatpush3.bf16.msra.mxu0 %v1171_v58  ;;  %v608_v58 = vld [vmem:[%s1889_s0 + $0x10] sm:$0xff] }
  0x48   :  { %1173 = vmatprep.subr.bf16.mxu0 %v1253_v0  ;;  %v1180_v60 = vpack.c.bf16 %v609_v59, %v608_v58 }
  0x4a   :  { %1181 = vmatpush3.bf16.msra.mxu1 %v1180_v60 }
  0x4b   :  { %1175 = vmatpush3.bf16.msra.mxu0 %v1174_v61  ;;  %v610_v61 = vld [vmem:[%s1889_s0 + $0x20] sm:$0xff]  ;;  %1182 = vmatprep.subr.bf16.mxu1 %v1253_v0 }
  0x4c   :  { %1200 = vmatprep.subr.bf16.mxu0 %v1253_v0 }
  0x4e   :  { %1032 = vmatmul.mubr.f32.vlgmr.msra.gmra.mrb[2].mxu0 %v405_v62  ;;  %v611_v62 = vld [vmem:[%s1889_s0 + $0x28] sm:$0xff] }
  0x4f   :  { %1101 = vmatprep.mubr.msk.f32.mxu0 %vm1254_vm0, %v1255_v4  ;;  %1202 = vmatpush3.bf16.msra.mxu0 %v1201_v12  ;;  %v1183_v63 = vpack.c.bf16 %v611_v62, %v610_v61  ;;  %v613_v4 = vld [vmem:[%s1889_s0 + $0x38] sm:$0xff]  ;;  %v1195_v12 = vpack.c.bf16 %v619_v11, %v618_v23 }
  0x50   :  { %1203 = vmatprep.subr.bf16.mxu0 %v1253_v0 }
  0x51   :  { %1184 = vmatpush3.bf16.msra.mxu1 %v1183_v63 }
  0x52   :  { %1185 = vmatprep.subr.bf16.mxu1 %v1253_v0 }
  0x53   :  { %1205 = vmatpush3.bf16.msra.mxu0 %v1204_v17  ;;  %v233_v17 = vshrl.u32 %v232_v16, 7 }
  0x54   :  { %1206 = vmatprep.subr.bf16.mxu0 %v1253_v0 }
  0x55   :  { %v1749_v19 = vsub.s32 0, %v233_v17  ;;  %v1751_v8 = vsub.s32 1, %v233_v17  ;;  %v1756_v21 = vsub.s32 2, %v233_v17  ;;  %v461_v28 = vsub.s32 3, %v233_v17 }
  0x56   :  { %v471_v34 = vsub.s32 4, %v233_v17  ;;  %v481_v38 = vsub.s32 5, %v233_v17  ;;  %v491_v48 = vsub.s32 6, %v233_v17  ;;  %v501_v60 = vsub.s32 7, %v233_v17 }
  0x57   :  { %1208 = vmatpush3.bf16.msra.mxu0 %v1207_v24  ;;  %v433_v22 = vrot.slane %v423_v20, %v1749_v19  ;;  %v442_v24 = vrot.slane %v423_v20, %v1751_v8  ;;  %v452_v26 = vrot.slane %v423_v20, %v1756_v21  ;;  %v462_v32 = vrot.slane %v423_v20, %v461_v28 }
  0x58   :  { %1209 = vmatprep.subr.bf16.mxu0 %v1253_v0  ;;  %v482_v52 = vrot.slane %v423_v20, %v481_v38  ;;  %v492_v58 = vrot.slane %v423_v20, %v491_v48  ;;  %v502_v63 = vrot.slane %v423_v20, %v501_v60  ;;  %v36_v38 = vstv %s1853_s15 }
  0x59   :  { %37 = vst [vmem:[#allocation3] sm:$0x1] %v36_v38 }
  0x5b   :  { %1211 = vmatpush3.bf16.msra.mxu0 %v1210_v30 }
  0x5c   :  { %1212 = vmatprep.subr.bf16.mxu0 %v1253_v0 }
  0x5f   :  { %1214 = vmatpush3.bf16.msra.mxu0 %v1213_v36 }
  0x60   :  { %1215 = vmatprep.subr.bf16.mxu0 %v1253_v0 }
  0x63   :  { %1217 = vmatpush3.bf16.msra.mxu0 %v1216_v43  ;;  %v472_v43 = vrot.slane %v423_v20, %v471_v34 }
  0x64   :  { %1218 = vmatprep.subr.bf16.mxu0 %v1253_v0 }
  0x67   :  { %1220 = vmatpush3.bf16.msra.mxu0 %v1219_v49 }
  0x68   :  { %1221 = vmatprep.subr.bf16.mxu0 %v1253_v0 }
  0x6b   :  { %1223 = vmatpush3.bf16.msra.mxu0 %v1222_v55 }
  0x6e   :  { %1102 = vmatmul.mubr.f32.vlgmr.msra.gmra.mrb[4].mxu0 %v1497_v37  ;;  %v1186_v37 = vpack.c.bf16 %v613_v4, %v612_v2  ;;  %v424_v4 = vld [vmem:[%s1893_s30 + $0x8] sm:$0x3] }
  0x6f   :  { %v512_v5 = vrot.slane %v424_v4, %v1749_v19 }
  0x70   :  { %1187 = vmatpush3.bf16.msra.mxu1 %v1186_v37 }
  0x71   :  { %1188 = vmatprep.subr.bf16.mxu1 %v1253_v0 }
  0x74   :  { %1190 = vmatpush3.bf16.msra.mxu1 %v1189_v6 }
  0x75   :  { %1191 = vmatprep.subr.bf16.mxu1 %v1253_v0 }
  0x78   :  { %1193 = vmatpush3.bf16.msra.mxu1 %v1192_v10  ;;  %v522_v10 = vrot.slane %v424_v4, %v1751_v8 }
  0x79   :  { %1194 = vmatprep.subr.bf16.mxu1 %v1253_v0 }
  0x7c   :  { %1196 = vmatpush3.bf16.msra.mxu1 %v1195_v12 }
  0x7d   :  { %1197 = vmatprep.subr.bf16.mxu1 %v1253_v0 }
  0x80   :  { %1199 = vmatpush3.bf16.msra.mxu1 %v1198_v15  ;;  %v839_v15 = vld [vmem:[%s1848_s18] ss:$0 sm:$0xff] }
  0x89   :  { %v428_v18 = vpop.permute.xlu0 %427  ;;  %v447_v25 = vpop.permute.xlu1 %446 }
  0x8a   :  { %v434_v27 = vmul.f32 %v433_v22, %v428_v18  ;;  %v453_v31 = vmul.f32 %v452_v26, %v447_v25 }
  0x8e   :  { %v457_v30 = vpop.permute.xlu1 %456 }
  0x8f   :  { %v437_v0 = vpop.permute.xlu0 %436  ;;  %v463_v41 = vmul.f32 %v462_v32, %v457_v30  ;;  %v842_v32 = vld [vmem:[%s1851_s23] ss:$0 sm:$0xff] }
  0x90   :  { %v443_v29 = vmul.f32 %v442_v24, %v437_v0  ;;  %v834_v0 = vld [vmem:[#allocation2] ss:$0 sm:$0xff] }
  0x92   :  { %v444_v33 = vadd.f32 %v443_v29, %v434_v27  ;;  %v841_v27 = vld [vmem:[%s1850_s22] ss:$0 sm:$0xff] }
  0x93   :  { %v467_v44 = vpop.permute.xlu1 %466 }
  0x94   :  { %v454_v42 = vadd.f32 %v453_v31, %v444_v33  ;;  %v473_v51 = vmul.f32 %v472_v43, %v467_v44 }
  0x95   :  { %v477_v54 = vpop.permute.xlu0 %476 }
  0x96   :  { %v464_v50 = vadd.f32 %v463_v41, %v454_v42  ;;  %v483_v59 = vmul.f32 %v482_v52, %v477_v54 }
  0x98   :  { %v487_v56 = vpop.permute.xlu1 %486  ;;  %v474_v57 = vadd.f32 %v473_v51, %v464_v50  ;;  %v328_v50 = vld [vmem:[%s1857_s11] sm:$0x7] }
  0x99   :  { %v493_v61 = vmul.f32 %v492_v58, %v487_v56 }
  0x9a   :  { %v484_v62 = vadd.f32 %v483_v59, %v474_v57  ;;  %v507_v6 = vpop.permute.xlu0 %506  ;;  %v356_v57 = vrot.slane %v328_v50, %v1756_v21 }
  0x9b   :  { %v513_v9 = vmul.f32 %v512_v5, %v507_v6 }
  0x9c   :  { %v494_v37 = vadd.f32 %v493_v61, %v484_v62 }
  0x9d   :  { %v497_v2 = vpop.permute.xlu1 %496 }
  0x9e   :  { %v503_v3 = vmul.f32 %v502_v63, %v497_v2 }
  0xa0   :  { %v504_v7 = vadd.f32 %v503_v3, %v494_v37 }
  0xa2   :  { %v517_v23 = vpop.permute.xlu1 %516  ;;  %v514_v11 = vadd.f32 %v513_v9, %v504_v7 }
  0xa3   :  { %v523_v12 = vmul.f32 %v522_v10, %v517_v23  ;;  %v837_v23 = vld [vmem:[%s1860_s14] ss:$0 sm:$0xff] }
  0xa5   :  { %v524_v13 = vadd.f32 %v523_v12, %v514_v11 }
 0x101   :  { %v180_v36 = vpop.f32.mrb[0].mxu0 }
 0x102   :  { %v181_v39 = vadd.f32 %v832_v35, %v180_v36  ;;  %v963_v40 = vpop.f32.mrb[1].mxu0  ;;  %v38_v36 = vstv %s1852_s24 }
 0x103   :  { %39 = vst [vmem:[#allocation4] sm:$0x1] %v38_v36  ;;  %v840_v40 = vld [vmem:[%s1854_s20] ss:$0 sm:$0xff] }
 0x104   :  { %vm184_vm1 = vcmp.ge.f32.partialorder %v181_v39, 0.0  ;;  %v185_v46 = vmul.f32 0.01, %v181_v39 }
 0x106   :  { %v186_v49 = vsel %vm184_vm1, %v181_v39, %v185_v46  ;;  %v226_v46 = vld [vmem:[%s1856_s10] sm:$0x7] }
 0x107   :  { %v195_v53 = vmul.f32 %v833_v47, %v186_v49  ;;  %v235_v48 = vrot.slane %v226_v46, %v1749_v19  ;;  %v244_v49 = vrot.slane %v226_v46, %v1751_v8  ;;  %v254_v51 = vrot.slane %v226_v46, %v1756_v21  ;;  %v836_v21 = vld [vmem:[%s1859_s13] ss:$0 sm:$0xff] }
 0x109   :  { %v197_v55 = vsel %vm196_vm2, %v195_v53, 0.0  ;;  %v337_v53 = vrot.slane %v328_v50, %v1749_v19  ;;  %v835_v19 = vld [vmem:[%s1858_s12] ss:$0 sm:$0xff] }
 0x10a   :  { %198 = vadd.xlane.f32.xlu1 %v197_v55  ;;  %v346_v55 = vrot.slane %v328_v50, %v1751_v8 }
 0x114   :  { %v1777_v24 = vpop.f32.mrb[0].mxu1 }
 0x115   :  { %v998_v25 = vpop.f32.mrb[1].mxu1 }
 0x11b   :  { %350 = vperm.xlu1 %1250, %v1707_v1  }
 0x121   :  { %v591_v14 = vpop.f32.mrb[2].mxu0 }
 0x122   :  { %v592_v16 = vadd.f32 %v591_v14, %v524_v13  ;;  %v1033_v17 = vpop.f32.mrb[3].mxu0  ;;  %v843_v14 = vld [vmem:[#allocation4] ss:$0 sm:$0xff] }
 0x123   :  { %v838_v17 = vld [vmem:[#allocation3] ss:$0 sm:$0xff] }
 0x124   :  { %v602_v18 = vadd.f32 %v839_v15, %v592_v16 }
 0x126   :  { %v604_v20 = vmul.f32 0.01, %v602_v18  ;;  %vm603_vm3 = vcmp.ge.f32.partialorder %v602_v18, 0.0 }
 0x128   :  { %v605_v22 = vsel %vm603_vm3, %v602_v18, %v604_v20 }
 0x129   :  { %1067 = vmatmul.mubr.f32.vlgmr.msra.gmra.mrb[2].mxu1 %v605_v22 }
 0x141   :  { %v789_v28 = vpop.f32.mrb[4].mxu0 }
 0x142   :  { %v790_v29 = vadd.f32 %v841_v27, %v789_v28  ;;  %v1103_v30 = vpop.f32.mrb[5].mxu0 }
 0x144   :  { %vm793_vm5 = vcmp.ge.f32.partialorder %v790_v29, 0.0  ;;  %v794_v31 = vmul.f32 0.01, %v790_v29 }
 0x146   :  { %v795_v33 = vsel %vm793_vm5, %v790_v29, %v794_v31 }
 0x147   :  { %v804_v34 = vmul.f32 %v842_v32, %v795_v33 }
 0x149   :  { %v805_v35 = vsel %vm196_vm2, %v804_v34, 0.0 }
 0x14a   :  { %806 = vadd.xlane.f32.xlu1 %v805_v35 }
 0x197   :  { %v199_v26 = vpop.xlane.xlu1 %198 }
 0x198   :  { %v206_v1 = vadd.f32 %v834_v0, %v199_v26 }
 0x19a   :  { %208 = vst.msk [vmem:[%s1849_s25] sm:$0x3] %vm207_vm4, %v206_v1  ;;  %363 = vperm.xlu0 %1251, %v206_v1  }
 0x19b   :  { %v351_v62 = vpop.permute.xlu1 %350 }
 0x19c   :  { %v357_v2 = vmul.f32 %v356_v57, %v351_v62 }
 0x19e   :  { %1252 = vset.pattern.permute.xlu0 %v1265_v45  ;;  %v249_v45 = vpop.permute.xlu0 %248 }
 0x19f   :  { %v255_v58 = vmul.f32 %v254_v51, %v249_v45 }
 0x1a2   :  { %v230_v39 = vpop.permute.xlu0 %229 }
 0x1a3   :  { %v236_v52 = vmul.f32 %v235_v48, %v230_v39 }
 0x1a6   :  { %v332_v44 = vpop.permute.xlu0 %331 }
 0x1a7   :  { %v338_v59 = vmul.f32 %v337_v53, %v332_v44 }
 0x1aa   :  { %v239_v47 = vpop.permute.xlu0 %238 }
 0x1ab   :  { %v245_v54 = vmul.f32 %v244_v49, %v239_v47 }
 0x1ad   :  { %v246_v60 = vadd.f32 %v245_v54, %v236_v52 }
 0x1ae   :  { %v341_v56 = vpop.permute.xlu0 %340 }
 0x1af   :  { %v347_v61 = vmul.f32 %v346_v55, %v341_v56  ;;  %v256_v4 = vadd.f32 %v255_v58, %v246_v60 }
 0x1b1   :  { %v348_v63 = vadd.f32 %v347_v61, %v338_v59  ;;  %v324_v3 = vadd.f32 %v1777_v24, %v256_v4 }
 0x1b3   :  { %v358_v37 = vadd.f32 %v357_v2, %v348_v63 }
 0x1b5   :  { %v359_v8 = vadd.f32 %v358_v37, %v324_v3 }
 0x1d7   :  { %v807_v15 = vpop.xlane.xlu1 %806 }
 0x1d8   :  { %v814_v16 = vadd.f32 %v843_v14, %v807_v15 }
 0x1da   :  { %815 = vst.msk [vmem:[%s1861_s28] sm:$0x3] %vm207_vm4, %v814_v16 }
 0x1fc   :  { %v695_v41 = vpop.f32.mrb[2].mxu1 }
 0x1fd   :  { %v696_v42 = vadd.f32 %v840_v40, %v695_v41  ;;  %v1068_v43 = vpop.f32.mrb[3].mxu1 }
 0x1ff   :  { %699 = vst [vmem:[%s1855_s27] sm:$0xff] %v696_v42 }
 0x219   :  { %v364_v5 = vpop.permute.xlu0 %363 }
 0x21a   :  { %v372_v6 = vmul.f32 %v835_v19, %v364_v5 }
 0x21c   :  { %v373_v7 = vadd.f32 %v372_v6, %v359_v8 }
 0x21e   :  { %v381_v9 = vadd.f32 %v836_v21, %v373_v7 }
 0x220   :  { %vm382_vm6 = vcmp.ge.f32.partialorder %v381_v9, 0.0  ;;  %v383_v10 = vmul.f32 0.01, %v381_v9 }
 0x222   :  { %v384_v11 = vsel %vm382_vm6, %v381_v9, %v383_v10 }
 0x223   :  { %v393_v12 = vmul.f32 %v837_v23, %v384_v11 }
 0x225   :  { %v394_v13 = vsel %vm196_vm2, %v393_v12, 0.0 }
 0x226   :  { %395 = vadd.xlane.f32.xlu0 %v394_v13 }
 0x2b3   :  { %v396_v18 = vpop.xlane.xlu0 %395 }
 0x2b4   :  { %v403_v20 = vadd.f32 %v838_v17, %v396_v18 }
 0x2b6   :  { %404 = vst.msk [vmem:[%s1862_s26] sm:$0x3] %vm207_vm4, %v403_v20 }

// kernel: network_forward.2
= control target key start
LH: loop header
LB: loop body
LE: loop exit
PB: predicated region body
PF: predicated region fallthrough
CT: control target
= control target key end

     0   :  { %12 = vsyncpa [#allocation3], 0  ;;  %s3780_s0 = inlined_call_operand.vmem [shape: bf16[2,8,1024], index: 0, kind: input, shape index: {}]   ;;  %s3781_s1 = inlined_call_operand.vmem [shape: bf16[128,8], index: 1, kind: input, shape index: {}]   ;;  %s3782_s2 = inlined_call_operand.vmem [shape: f32[128,1], index: 2, kind: input, shape index: {}]   ;;  %s3783_s3 = inlined_call_operand.vmem [shape: bf16[128,128], index: 3, kind: input, shape index: {}]   ;;  %s3784_s4 = inlined_call_operand.vmem [shape: f32[128,1], index: 4, kind: input, shape index: {}]   ;;  %s3785_s5 = inlined_call_operand.hbm [shape: bf16[2,128,1024], index: 5, kind: output, shape index: {0}]   ;;  %s3786_s6 = inlined_call_operand.vmem [shape: f32[2,128,1], index: 6, kind: output, shape index: {1}]  }
   0x1   :  { %14 = vsyncpa [#allocation3 + $0x1], 0  ;;  %s2911_s21 = smov 0   ;;  %s2913_s22 = smov 0  }
   0x2   :  { %s2915_s23 = smov 0   ;;  %s2917_s24 = smov 0  }
   0x3   :  { %s2919_s25 = smov 0   ;;  %s2921_s26 = smov 0  }
   0x4 LB: > { %s2502_s27 = sadd.s32 4294967295, %s2870_s26   ;;  %s2503_s28 = sadd.s32 4294967294, %s2870_s26   ;;  %s2870_s26 = sphi %s2921_s26, %s20_s26   ;;  %s2866_s25 = sphi %s2919_s25, %s3793_s25   ;;  %s2862_s24 = sphi %s2917_s24, %s3792_s24   ;;  %s2858_s23 = sphi %s2915_s23, %s3791_s23   ;;  %s2854_s22 = sphi %s2913_s22, %s3790_s22   ;;  %s2850_s21 = sphi %s2911_s21, %s3789_s21  }
   0x5   : > { %s32_s29 = sadd.s32 1, %s2866_s25  ;;  %s153_s30 = sadd.s32 1, %s2858_s23 }
   0x6   : > { %p34_p0 = scmp.ge.s32.totalorder %s32_s29, 2  ;;  %p163_p1 = scmp.ne.s32.totalorder %s2858_s23, %s2854_s22 }
   0x7   : > { %p164_p2 = scmp.eq.s32.totalorder %s2502_s27, 1  ;;  %p169_p3 = scmp.ne.s32.totalorder %s2854_s22, %s2850_s21 }
   0x8   : > { %s3795_s29 = smov (%p34_p0, %s32_s29), 0  ;;  %p170_p5 = scmp.eq.s32.totalorder %s2503_s28, 1 }
   0x9   : > { %p2951_p4 = por %p164_p2, %p163_p1  ;;  %s148_s8 = ssub.s32 %s2866_s25, %s3795_s29 }
   0xa   : > { %p2506_p6 = scmp.ge.s32.totalorder %s2870_s26, 1  ;;  %p151_p7 = scmp.eq.s32.totalorder %s148_s8, 0 }
   0xb   : > { %p2958_p8 = por %p170_p5, %p169_p3  ;;  %p239_p9 = scmp.lt.s32.totalorder %s2870_s26, 3 }
   0xc   : > { %s2964_s10 = scalar_select %p151_p7, %s2858_s23, %s153_s30  }
   0xd   : > { %p240_p10 = pnand %p2506_p6, %p239_p9 }
   0xe   : > { %p279_p11 = scmp.lt.s32.totalorder (!%p240_p10), %s2862_s24, 1  ;;  %v2872_v0 = vmov (!%p240_p10), 0   ;;  %v315_v1 = vld [vmem:[%s3782_s2] sm:$0xff] (!%p240_p10)  ;;  %v316_v2 = vld [vmem:[%s3782_s2 + $0x8] sm:$0xff] (!%p240_p10)  ;;  %v317_v3 = vld [vmem:[%s3782_s2 + $0x10] sm:$0xff] (!%p240_p10)  ;;  %vm496_vm0 = vcmask (!%p240_p10), 1043456  }
   0xf   : > { %243 = sbr.rel (%p240_p10) target bundleno = 670 (0x29e), region = 40  ;;  %553 = vmatprep.mubr.bf16.mxu0 (!%p240_p10), %v2872_v0  ;;  %666 = vmatprep.mubr.bf16.mxu1 (!%p240_p10), %v2872_v0  ;;  %v2990_v12 = vld [vmem:[%s3781_s1] sm:$0xff] (!%p240_p10)   ;;  %v318_v20 = vld [vmem:[%s3782_s2 + $0x18] sm:$0xff] (!%p240_p10)  ;;  %vm471_vm1 = vcmask (!%p240_p10), 64512   ;;  %v321_v23 = vld [vmem:[%s3782_s2 + $0x30] sm:$0xff] (!%p240_p10)  ;;  %s268_s28 = sand.u32 (!%p240_p10), 1, %s2854_s22  }
  0x10   : > { %2766 = vset.pattern.permute.xlu0 (!%p240_p10), %v2872_v0  ;;  %2767 = vset.pattern.permute.xlu1 (!%p240_p10), %v2872_v0  ;;  %v319_v19 = vld [vmem:[%s3782_s2 + $0x20] sm:$0xff] (!%p240_p10)  ;;  %v320_v24 = vld [vmem:[%s3782_s2 + $0x28] sm:$0xff] (!%p240_p10)  ;;  %v322_v27 = vld [vmem:[%s3782_s2 + $0x38] sm:$0xff] (!%p240_p10)  ;;  %vm2357_vm2 = vcmask (!%p240_p10), 7168   ;;  %s2873_s20 = smov (!%p240_p10), [#allocation2]  }
  0x11   : > { %333 = vperm.xlu0 (!%p240_p10), %2766, %v315_v1   ;;  %343 = vperm.xlu1 (!%p240_p10), %2767, %v317_v3   ;;  %v3021_v25 = vld [vmem:[%s3781_s1 + $0x8] sm:$0xff] (!%p240_p10)   ;;  %v323_v26 = vld [vmem:[%s3782_s2 + $0x40] sm:$0xff] (!%p240_p10)  ;;  %v325_v28 = vld [vmem:[%s3782_s2 + $0x50] sm:$0xff] (!%p240_p10) }
  0x12   : > { %v324_v29 = vld [vmem:[%s3782_s2 + $0x48] sm:$0xff] (!%p240_p10)  ;;  %v3044_v30 = vld [vmem:[%s3781_s1 + $0x10] sm:$0xff] (!%p240_p10)   ;;  %v327_v31 = vld [vmem:[%s3782_s2 + $0x60] sm:$0xff] (!%p240_p10) }
  0x13   : > { %v326_v32 = vld [vmem:[%s3782_s2 + $0x58] sm:$0xff] (!%p240_p10)  ;;  %v329_v33 = vld [vmem:[%s3782_s2 + $0x70] sm:$0xff] (!%p240_p10)  ;;  %v328_v34 = vld [vmem:[%s3782_s2 + $0x68] sm:$0xff] (!%p240_p10) }
  0x14   : > { %v3067_v35 = vld [vmem:[%s3781_s1 + $0x18] sm:$0xff] (!%p240_p10)   ;;  %v1181_v36 = vld [vmem:[%s3784_s4] sm:$0xff] (!%p240_p10)  ;;  %v1183_v38 = vld [vmem:[%s3784_s4 + $0x10] sm:$0xff] (!%p240_p10) }
  0x15   : > { %338 = vperm.xlu0 (!%p240_p10), %2766, %v316_v2   ;;  %348 = vperm.xlu1 (!%p240_p10), %2767, %v318_v20   ;;  %v330_v37 = vld [vmem:[%s3782_s2 + $0x78] sm:$0xff] (!%p240_p10)  ;;  %v1182_v39 = vld [vmem:[%s3784_s4 + $0x8] sm:$0xff] (!%p240_p10)  ;;  %v3090_v40 = vld [vmem:[%s3781_s1 + $0x20] sm:$0xff] (!%p240_p10)  }
  0x16   : > { %s2970_s11 = scalar_select %p279_p11, %s2862_s24, 1  ;;  %v1185_v41 = vld [vmem:[%s3784_s4 + $0x20] sm:$0xff]  ;;  %v1184_v42 = vld [vmem:[%s3784_s4 + $0x18] sm:$0xff]  ;;  %v1187_v43 = vld [vmem:[%s3784_s4 + $0x30] sm:$0xff] }
  0x17   : > { %v1186_v44 = vld [vmem:[%s3784_s4 + $0x28] sm:$0xff]  ;;  %v1189_v46 = vld [vmem:[%s3784_s4 + $0x40] sm:$0xff]  ;;  %v1188_v47 = vld [vmem:[%s3784_s4 + $0x38] sm:$0xff] }
  0x18   : > { %s2641_s14 = sshll.u32 %s2970_s11, 5  ;;  %v2781_v45 = vld [vmem:[%s3781_s1 + $0x28] sm:$0xff]   ;;  %v1191_v48 = vld [vmem:[%s3784_s4 + $0x50] sm:$0xff]  ;;  %v1193_v51 = vld [vmem:[%s3784_s4 + $0x60] sm:$0xff]  ;;  %s2642_s27 = sshll.u32 %s2970_s11, 7 }
  0x19   : > { %s286_s17 = scalar_lea.vmem %s3780_s0, %s2641_s14  ;;  %353 = vperm.xlu0 %2766, %v319_v19   ;;  %358 = vperm.xlu1 %2767, %v320_v24   ;;  %v1190_v49 = vld [vmem:[%s3784_s4 + $0x48] sm:$0xff]  ;;  %v2782_v50 = vld [vmem:[%s3781_s1 + $0x30] sm:$0xff]   ;;  %v1192_v52 = vld [vmem:[%s3784_s4 + $0x58] sm:$0xff]  ;;  %s3467_s12 = scalar_lea.vmem %s3786_s6, %s2642_s27 }
  0x1a   : > { %v295_v4 = vld [vmem:[%s286_s17] sm:$0xff]  ;;  %v296_v5 = vld [vmem:[%s286_s17 + $0x8] sm:$0xff]  ;;  %v297_v6 = vld [vmem:[%s286_s17 + $0x10] sm:$0xff]  ;;  %s2507_s11 = sshll.u32 %s268_s28, 9  ;;  %s2707_s14 = sshll.u32 %s2862_s24, 13 }
  0x1b   : > { %v2521_v7 = vcombine.high %v295_v4, %v295_v4  ;;  %v2523_v8 = vcombine.high %v296_v5, %v296_v5  ;;  %v2520_v9 = vcombine.low %v295_v4, %v295_v4  ;;  %v2522_v10 = vcombine.low %v296_v5, %v296_v5  ;;  %v298_v11 = vld [vmem:[%s286_s17 + $0x18] sm:$0xff]  ;;  %v1195_v53 = vld [vmem:[%s3784_s4 + $0x70] sm:$0xff]  ;;  %v1194_v54 = vld [vmem:[%s3784_s4 + $0x68] sm:$0xff]  ;;  %s3485_s13 = scalar_lea.vmem [#allocation2], %s2507_s11  ;;  %s3724_s18 = scalar_lea.hbm %s3785_s5, %s2707_s14 }
  0x1c   : > { %v2525_v13 = vcombine.high %v297_v6, %v297_v6  ;;  %v2527_v14 = vcombine.high %v298_v11, %v298_v11  ;;  %v2524_v15 = vcombine.low %v297_v6, %v297_v6  ;;  %v2526_v16 = vcombine.low %v298_v11, %v298_v11  ;;  %v2783_v55 = vld [vmem:[%s3781_s1 + $0x38] sm:$0xff]   ;;  %s2395_s15 = sshll.u32 %s3485_s13, 4  ;;  %s3734_s24 = scalar_lea.sflag [#allocation3], %s268_s28  ;;  %s3726_s15 = int_to_ptr.vmem [resolvable:$true] %s2395_s15 }
  0x1d   : > { %2528 = vmatprep.subr.msk.bf16.mxu0 %vm496_vm0, %v2521_v7  ;;  %2537 = vmatprep.subr.msk.bf16.mxu1 %vm496_vm0, %v2523_v8  ;;  %v498_v17 = vsel %vm496_vm0, %v2520_v9, 0  ;;  %v504_v18 = vsel %vm496_vm0, %v2522_v10, 0  ;;  %v1196_v56 = vld [vmem:[%s3784_s4 + $0x78] sm:$0xff]  ;;  %s2792_s19 = scalar_lea.vmem %s3726_s15, 8192  ;;  %s2796_s27 = sshll.u32 %s2873_s20, 4  ;;  %s2797_s27 = int_to_ptr.vmem [resolvable:$false] %s2796_s27 }
  0x1e   : > { %522 = vmatpush1.bf16.msra.mxu0 %v498_v17  ;;  %635 = vmatpush1.bf16.msra.mxu1 %v504_v18  ;;  %v510_v21 = vsel %vm496_vm0, %v2524_v15, 0  ;;  %v516_v22 = vsel %vm496_vm0, %v2526_v16, 0  ;;  %p2793_p12 = scmp.ne.s32.totalorder %s3726_s15, %s2792_s19  ;;  %s2798_s30 = scalar_lea.vmem %s2797_s27, 16384 }
  0x1f   : > { %2546 = vmatprep.subr.msk.bf16.mxu0 %vm496_vm0, %v2525_v13  ;;  %2555 = vmatprep.subr.msk.bf16.mxu1 %vm496_vm0, %v2527_v14  ;;  %p2799_p1 = scmp.lt.s32.totalorder %s3726_s15, %s2797_s27  ;;  %p2800_p2 = scmp.lt.s32.totalorder %s2798_s30, %s2792_s19 }
  0x20   : > { %363 = vperm.xlu0 %2766, %v321_v23   ;;  %368 = vperm.xlu1 %2767, %v322_v27   ;;  %p2794_p13 = pnand %p2793_p12, %p2951_p4 }
  0x21   : > { %2529 = vmatmul.mubr.msk.bf16.vlgmr.msra.gmra.mrb[0].mxu0 %vm471_vm1, %v2990_v12  ;;  %2538 = vmatmul.mubr.msk.bf16.vlgmr.msra.gmra.mrb[0].mxu1 %vm471_vm1, %v2990_v12  ;;  %p2801_p3 = por %p2800_p2, %p2799_p1 }
  0x22   : > { %748 = vmatpush1.bf16.msra.mxu0 %v510_v21  ;;  %861 = vmatpush1.bf16.msra.mxu1 %v516_v22  ;;  %p2795_p0 = pneg %p2794_p13 }
  0x23   : > { %563 = vmatprep.mubr.bf16.mxu0 %v2872_v0  ;;  %676 = vmatprep.mubr.bf16.mxu1 %v2872_v0 }
  0x24   : > { %373 = vperm.xlu0 %2766, %v323_v26   ;;  %378 = vperm.xlu1 %2767, %v324_v29   ;;  %p2802_p5 = pnand %p2801_p3, %p2795_p0 }
  0x28   : > { %383 = vperm.xlu0 %2766, %v325_v28   ;;  %388 = vperm.xlu1 %2767, %v326_v32  }
  0x29   : > { %2530 = vmatmul.mubr.msk.bf16.gmra.mrb[4].mxu0 %vm471_vm1, %v3021_v25  ;;  %2539 = vmatmul.mubr.msk.bf16.gmra.mrb[4].mxu1 %vm471_vm1, %v3021_v25 }
  0x2a   : > { %573 = vmatprep.mubr.bf16.mxu0 %v2872_v0  ;;  %686 = vmatprep.mubr.bf16.mxu1 %v2872_v0 }
  0x2c   : > { %393 = vperm.xlu0 %2766, %v327_v31   ;;  %398 = vperm.xlu1 %2767, %v328_v34  }
  0x30   : > { %403 = vperm.xlu0 %2766, %v329_v33   ;;  %408 = vperm.xlu1 %2767, %v330_v37  }
  0x31   : > { %2531 = vmatmul.mubr.msk.bf16.gmra.mrb[8].mxu0 %vm471_vm1, %v3044_v30  ;;  %2540 = vmatmul.mubr.msk.bf16.gmra.mrb[8].mxu1 %vm471_vm1, %v3044_v30 }
  0x32   : > { %583 = vmatprep.mubr.bf16.mxu0 %v2872_v0  ;;  %696 = vmatprep.mubr.bf16.mxu1 %v2872_v0 }
  0x34   : > { %1199 = vperm.xlu0 %2766, %v1181_v36   ;;  %1204 = vperm.xlu1 %2767, %v1182_v39  }
  0x38   : > { %1209 = vperm.xlu0 %2766, %v1183_v38   ;;  %1214 = vperm.xlu1 %2767, %v1184_v42  }
  0x39   : > { %2532 = vmatmul.mubr.msk.bf16.gmra.mrb[12].mxu0 %vm471_vm1, %v3067_v35  ;;  %2541 = vmatmul.mubr.msk.bf16.gmra.mrb[12].mxu1 %vm471_vm1, %v3067_v35 }
  0x3a   : > { %593 = vmatprep.mubr.bf16.mxu0 %v2872_v0  ;;  %706 = vmatprep.mubr.bf16.mxu1 %v2872_v0 }
  0x3c   : > { %1219 = vperm.xlu0 %2766, %v1185_v41   ;;  %1224 = vperm.xlu1 %2767, %v1186_v44  }
  0x40   : > { %1229 = vperm.xlu0 %2766, %v1187_v43   ;;  %1234 = vperm.xlu1 %2767, %v1188_v47  }
  0x41   : > { %2533 = vmatmul.mubr.msk.bf16.gmra.mrb[16].mxu0 %vm471_vm1, %v3090_v40  ;;  %2542 = vmatmul.mubr.msk.bf16.gmra.mrb[16].mxu1 %vm471_vm1, %v3090_v40 }
  0x42   : > { %603 = vmatprep.mubr.bf16.mxu0 %v2872_v0  ;;  %716 = vmatprep.mubr.bf16.mxu1 %v2872_v0 }
  0x44   : > { %1239 = vperm.xlu0 %2766, %v1189_v46   ;;  %1244 = vperm.xlu1 %2767, %v1190_v49  }
  0x48   : > { %1249 = vperm.xlu0 %2766, %v1191_v48   ;;  %1254 = vperm.xlu1 %2767, %v1192_v52  }
  0x49   : > { %2534 = vmatmul.mubr.msk.bf16.gmra.mrb[20].mxu0 %vm471_vm1, %v2781_v45  ;;  %2543 = vmatmul.mubr.msk.bf16.gmra.mrb[20].mxu1 %vm471_vm1, %v2781_v45 }
  0x4a   : > { %613 = vmatprep.mubr.bf16.mxu0 %v2872_v0  ;;  %726 = vmatprep.mubr.bf16.mxu1 %v2872_v0 }
  0x4c   : > { %1259 = vperm.xlu0 %2766, %v1193_v51   ;;  %1264 = vperm.xlu1 %2767, %v1194_v54  }
  0x50   : > { %1269 = vperm.xlu0 %2766, %v1195_v53   ;;  %1274 = vperm.xlu1 %2767, %v1196_v56  }
  0x51   : > { %2535 = vmatmul.mubr.msk.bf16.gmra.mrb[24].mxu0 %vm471_vm1, %v2782_v50  ;;  %2544 = vmatmul.mubr.msk.bf16.gmra.mrb[24].mxu1 %vm471_vm1, %v2782_v50 }
  0x52   : > { %623 = vmatprep.mubr.bf16.mxu0 %v2872_v0  ;;  %736 = vmatprep.mubr.bf16.mxu1 %v2872_v0 }
  0x59   : > { %2536 = vmatmul.mubr.msk.bf16.gmra.mrb[28].mxu0 %vm471_vm1, %v2783_v55  ;;  %2545 = vmatmul.mubr.msk.bf16.gmra.mrb[28].mxu1 %vm471_vm1, %v2783_v55 }
  0x5a   : > { %779 = vmatprep.mubr.bf16.mxu0 %v2872_v0  ;;  %892 = vmatprep.mubr.bf16.mxu1 %v2872_v0 }
  0x61   : > { %2547 = vmatmul.mubr.msk.bf16.vlgmr.msra.gmra.mrb[32].mxu0 %vm471_vm1, %v2990_v12  ;;  %2556 = vmatmul.mubr.msk.bf16.vlgmr.msra.gmra.mrb[32].mxu1 %vm471_vm1, %v2990_v12 }
  0x62   : > { %789 = vmatprep.mubr.bf16.mxu0 %v2872_v0  ;;  %902 = vmatprep.mubr.bf16.mxu1 %v2872_v0 }
  0x69   : > { %2548 = vmatmul.mubr.msk.bf16.gmra.mrb[36].mxu0 %vm471_vm1, %v3021_v25  ;;  %2557 = vmatmul.mubr.msk.bf16.gmra.mrb[36].mxu1 %vm471_vm1, %v3021_v25 }
  0x6a   : > { %799 = vmatprep.mubr.bf16.mxu0 %v2872_v0  ;;  %912 = vmatprep.mubr.bf16.mxu1 %v2872_v0 }
  0x71   : > { %2549 = vmatmul.mubr.msk.bf16.gmra.mrb[40].mxu0 %vm471_vm1, %v3044_v30  ;;  %2558 = vmatmul.mubr.msk.bf16.gmra.mrb[40].mxu1 %vm471_vm1, %v3044_v30 }
  0x72   : > { %809 = vmatprep.mubr.bf16.mxu0 %v2872_v0  ;;  %922 = vmatprep.mubr.bf16.mxu1 %v2872_v0 }
  0x79   : > { %2550 = vmatmul.mubr.msk.bf16.gmra.mrb[44].mxu0 %vm471_vm1, %v3067_v35  ;;  %2559 = vmatmul.mubr.msk.bf16.gmra.mrb[44].mxu1 %vm471_vm1, %v3067_v35 }
  0x7a   : > { %819 = vmatprep.mubr.bf16.mxu0 %v2872_v0  ;;  %932 = vmatprep.mubr.bf16.mxu1 %v2872_v0 }
  0x81   : > { %2551 = vmatmul.mubr.msk.bf16.gmra.mrb[48].mxu0 %vm471_vm1, %v3090_v40  ;;  %2560 = vmatmul.mubr.msk.bf16.gmra.mrb[48].mxu1 %vm471_vm1, %v3090_v40 }
  0x82   : > { %829 = vmatprep.mubr.bf16.mxu0 %v2872_v0  ;;  %942 = vmatprep.mubr.bf16.mxu1 %v2872_v0 }
  0x89   : > { %2552 = vmatmul.mubr.msk.bf16.gmra.mrb[52].mxu0 %vm471_vm1, %v2781_v45  ;;  %2561 = vmatmul.mubr.msk.bf16.gmra.mrb[52].mxu1 %vm471_vm1, %v2781_v45 }
  0x8a   : > { %839 = vmatprep.mubr.bf16.mxu0 %v2872_v0  ;;  %952 = vmatprep.mubr.bf16.mxu1 %v2872_v0 }
  0x90   : > { %v3200_v57 = vpop.permute.xlu0 %333  ;;  %v3204_v59 = vpop.permute.xlu1 %343 }
  0x91   : > { %2553 = vmatmul.mubr.msk.bf16.gmra.mrb[56].mxu0 %vm471_vm1, %v2782_v50  ;;  %2562 = vmatmul.mubr.msk.bf16.gmra.mrb[56].mxu1 %vm471_vm1, %v2782_v50 }
  0x92   : > { %849 = vmatprep.mubr.bf16.mxu0 %v2872_v0  ;;  %962 = vmatprep.mubr.bf16.mxu1 %v2872_v0 }
  0x94   : > { %v3202_v58 = vpop.permute.xlu0 %338  ;;  %v3214_v21 = vpop.permute.xlu1 %348 }
  0x98   : > { %v3224_v50 = vpop.permute.xlu0 %353  ;;  %v3226_v51 = vpop.permute.xlu1 %358 }
  0x99   : > { %2554 = vmatmul.mubr.msk.bf16.gmra.mrb[60].mxu0 %vm471_vm1, %v2783_v55  ;;  %2563 = vmatmul.mubr.msk.bf16.gmra.mrb[60].mxu1 %vm471_vm1, %v2783_v55 }
  0x9a   : > { %1357 = vmatprep.mubr.bf16.mxu0 %v2872_v0  ;;  %1470 = vmatprep.mubr.bf16.mxu1 %v2872_v0 }
  0xf4   : > { %v555_v60 = vpop.f32.mrb[0].mxu0  ;;  %v668_v61 = vpop.f32.mrb[0].mxu1 }
  0xf5   : > { %v556_v62 = vadd.f32 %v555_v60, %v3200_v57  ;;  %v669_v63 = vadd.f32 %v668_v61, %v3200_v57  ;;  %v557_v1 = vpop.f32.mrb[1].mxu0  ;;  %v670_v2 = vpop.f32.mrb[1].mxu1 }
  0xf6   : > { %v558_v3 = vadd.f32 %v557_v1, %v3200_v57  ;;  %v671_v4 = vadd.f32 %v670_v2, %v3200_v57  ;;  %v559_v5 = vpop.f32.mrb[2].mxu0  ;;  %v672_v6 = vpop.f32.mrb[2].mxu1 }
  0xf7   : > { %v560_v7 = vadd.f32 %v559_v5, %v3202_v58  ;;  %v673_v8 = vadd.f32 %v672_v6, %v3202_v58  ;;  %v561_v9 = vpop.f32.mrb[3].mxu0  ;;  %v674_v10 = vpop.f32.mrb[3].mxu1  ;;  %v973_v13 = vmax.f32 %v556_v62, 0.0  ;;  %v975_v14 = vmax.f32 %v669_v63, 0.0 }
  0xf8   : > { %v562_v11 = vadd.f32 %v561_v9, %v3202_v58  ;;  %v675_v12 = vadd.f32 %v674_v10, %v3202_v58  ;;  %v974_v17 = vmax.f32 %v558_v3, 0.0  ;;  %v976_v18 = vmax.f32 %v671_v4, 0.0 }
  0xf9   : > { %v981_v15 = vmax.f32 %v560_v7, 0.0  ;;  %v983_v16 = vmax.f32 %v673_v8, 0.0 }
  0xfa   : > { %v982_v19 = vmax.f32 %v562_v11, 0.0  ;;  %v984_v20 = vmax.f32 %v675_v12, 0.0 }
  0xfb   : > { %v1101_v22 = vpack.c.bf16 %v981_v15, %v973_v13  ;;  %v1103_v23 = vpack.c.bf16 %v983_v16, %v975_v14 }
  0xfc   : > { %v1102_v24 = vpack.c.bf16 %v982_v19, %v974_v17  ;;  %v1104_v25 = vpack.c.bf16 %v984_v20, %v976_v18  ;;  %v565_v26 = vpop.f32.mrb[4].mxu0  ;;  %v678_v27 = vpop.f32.mrb[4].mxu1 }
  0xfd   : > { %v566_v28 = vadd.f32 %v565_v26, %v3204_v59  ;;  %v679_v29 = vadd.f32 %v678_v27, %v3204_v59  ;;  %v567_v30 = vpop.f32.mrb[5].mxu0  ;;  %v680_v31 = vpop.f32.mrb[5].mxu1 }
  0xfe   : > { %v568_v32 = vadd.f32 %v567_v30, %v3204_v59  ;;  %v681_v33 = vadd.f32 %v680_v31, %v3204_v59  ;;  %v569_v34 = vpop.f32.mrb[6].mxu0  ;;  %v682_v35 = vpop.f32.mrb[6].mxu1  ;;  %1325 = vmatprep.subr.bf16.mxu0 %v1102_v24  ;;  %1438 = vmatprep.subr.bf16.mxu1 %v1104_v25 }
  0xff   : > { %v570_v36 = vadd.f32 %v569_v34, %v3214_v21  ;;  %v683_v37 = vadd.f32 %v682_v35, %v3214_v21  ;;  %v571_v38 = vpop.f32.mrb[7].mxu0  ;;  %v684_v39 = vpop.f32.mrb[7].mxu1  ;;  %1326 = vmatpush1.bf16.msra.mxu0 %v1101_v22  ;;  %1439 = vmatpush1.bf16.msra.mxu1 %v1103_v23  ;;  %v989_v42 = vmax.f32 %v566_v28, 0.0  ;;  %v991_v43 = vmax.f32 %v679_v29, 0.0 }
 0x100   : > { %v572_v40 = vadd.f32 %v571_v38, %v3214_v21  ;;  %v685_v41 = vadd.f32 %v684_v39, %v3214_v21  ;;  %v990_v46 = vmax.f32 %v568_v32, 0.0  ;;  %v992_v47 = vmax.f32 %v681_v33, 0.0  ;;  %v3236_v20 = vpop.permute.xlu0 %363  ;;  %v3238_v22 = vpop.permute.xlu1 %368 }
 0x101   : > { %v997_v44 = vmax.f32 %v570_v36, 0.0  ;;  %v999_v45 = vmax.f32 %v683_v37, 0.0 }
 0x102   : > { %v998_v48 = vmax.f32 %v572_v40, 0.0  ;;  %v1000_v49 = vmax.f32 %v685_v41, 0.0 }
 0x103   : > { %v1109_v52 = vpack.c.bf16 %v997_v44, %v989_v42  ;;  %v1111_v53 = vpack.c.bf16 %v999_v45, %v991_v43 }
 0x104   : > { %v1110_v54 = vpack.c.bf16 %v998_v48, %v990_v46  ;;  %v1112_v55 = vpack.c.bf16 %v1000_v49, %v992_v47  ;;  %v575_v56 = vpop.f32.mrb[8].mxu0  ;;  %v688_v60 = vpop.f32.mrb[8].mxu1 }
 0x105   : > { %v576_v61 = vadd.f32 %v575_v56, %v3224_v50  ;;  %v689_v62 = vadd.f32 %v688_v60, %v3224_v50  ;;  %v577_v63 = vpop.f32.mrb[9].mxu0  ;;  %v690_v1 = vpop.f32.mrb[9].mxu1 }
 0x106   : > { %v578_v2 = vadd.f32 %v577_v63, %v3224_v50  ;;  %v691_v3 = vadd.f32 %v690_v1, %v3224_v50  ;;  %v579_v4 = vpop.f32.mrb[10].mxu0  ;;  %v692_v5 = vpop.f32.mrb[10].mxu1  ;;  %1327 = vmatprep.subr.bf16.mxu0 %v1110_v54  ;;  %1440 = vmatprep.subr.bf16.mxu1 %v1112_v55 }
 0x107   : > { %v580_v6 = vadd.f32 %v579_v4, %v3226_v51  ;;  %v693_v7 = vadd.f32 %v692_v5, %v3226_v51  ;;  %v581_v8 = vpop.f32.mrb[11].mxu0  ;;  %v694_v9 = vpop.f32.mrb[11].mxu1  ;;  %1328 = vmatpush1.bf16.msra.mxu0 %v1109_v52  ;;  %1441 = vmatpush1.bf16.msra.mxu1 %v1111_v53  ;;  %v1005_v12 = vmax.f32 %v576_v61, 0.0  ;;  %v1007_v13 = vmax.f32 %v689_v62, 0.0 }
 0x108   : > { %v582_v10 = vadd.f32 %v581_v8, %v3226_v51  ;;  %v695_v11 = vadd.f32 %v694_v9, %v3226_v51  ;;  %v1006_v16 = vmax.f32 %v578_v2, 0.0  ;;  %v1008_v17 = vmax.f32 %v691_v3, 0.0  ;;  %v3248_v53 = vpop.permute.xlu0 %373  ;;  %v3250_v54 = vpop.permute.xlu1 %378 }
 0x109   : > { %v1013_v14 = vmax.f32 %v580_v6, 0.0  ;;  %v1015_v15 = vmax.f32 %v693_v7, 0.0 }
 0x10a   : > { %v1014_v18 = vmax.f32 %v582_v10, 0.0  ;;  %v1016_v19 = vmax.f32 %v695_v11, 0.0 }
 0x10b   : > { %v1117_v23 = vpack.c.bf16 %v1013_v14, %v1005_v12  ;;  %v1119_v24 = vpack.c.bf16 %v1015_v15, %v1007_v13 }
 0x10c   : > { %v1118_v25 = vpack.c.bf16 %v1014_v18, %v1006_v16  ;;  %v1120_v26 = vpack.c.bf16 %v1016_v19, %v1008_v17  ;;  %v585_v27 = vpop.f32.mrb[12].mxu0  ;;  %v698_v28 = vpop.f32.mrb[12].mxu1 }
 0x10d   : > { %v586_v29 = vadd.f32 %v585_v27, %v3236_v20  ;;  %v699_v30 = vadd.f32 %v698_v28, %v3236_v20  ;;  %v587_v31 = vpop.f32.mrb[13].mxu0  ;;  %v700_v32 = vpop.f32.mrb[13].mxu1 }
 0x10e   : > { %v588_v33 = vadd.f32 %v587_v31, %v3236_v20  ;;  %v701_v34 = vadd.f32 %v700_v32, %v3236_v20  ;;  %v589_v35 = vpop.f32.mrb[14].mxu0  ;;  %v702_v36 = vpop.f32.mrb[14].mxu1  ;;  %1329 = vmatprep.subr.bf16.mxu0 %v1118_v25  ;;  %1442 = vmatprep.subr.bf16.mxu1 %v1120_v26 }
 0x10f   : > { %v590_v37 = vadd.f32 %v589_v35, %v3238_v22  ;;  %v703_v38 = vadd.f32 %v702_v36, %v3238_v22  ;;  %v591_v39 = vpop.f32.mrb[15].mxu0  ;;  %v704_v40 = vpop.f32.mrb[15].mxu1  ;;  %1330 = vmatpush1.bf16.msra.mxu0 %v1117_v23  ;;  %1443 = vmatpush1.bf16.msra.mxu1 %v1119_v24  ;;  %v1021_v43 = vmax.f32 %v586_v29, 0.0  ;;  %v1023_v44 = vmax.f32 %v699_v30, 0.0 }
 0x110   : > { %v592_v41 = vadd.f32 %v591_v39, %v3238_v22  ;;  %v705_v42 = vadd.f32 %v704_v40, %v3238_v22  ;;  %v1022_v47 = vmax.f32 %v588_v33, 0.0  ;;  %v1024_v48 = vmax.f32 %v701_v34, 0.0  ;;  %v3260_v26 = vpop.permute.xlu0 %383  ;;  %v3262_v27 = vpop.permute.xlu1 %388 }
 0x111   : > { %v1029_v45 = vmax.f32 %v590_v37, 0.0  ;;  %v1031_v46 = vmax.f32 %v703_v38, 0.0 }
 0x112   : > { %v1030_v49 = vmax.f32 %v592_v41, 0.0  ;;  %v1032_v52 = vmax.f32 %v705_v42, 0.0 }
 0x113   : > { %v1125_v55 = vpack.c.bf16 %v1029_v45, %v1021_v43  ;;  %v1127_v56 = vpack.c.bf16 %v1031_v46, %v1023_v44 }
 0x114   : > { %v1126_v60 = vpack.c.bf16 %v1030_v49, %v1022_v47  ;;  %v1128_v61 = vpack.c.bf16 %v1032_v52, %v1024_v48  ;;  %v595_v62 = vpop.f32.mrb[16].mxu0  ;;  %v708_v63 = vpop.f32.mrb[16].mxu1 }
 0x115   : > { %v596_v1 = vadd.f32 %v595_v62, %v3248_v53  ;;  %v709_v2 = vadd.f32 %v708_v63, %v3248_v53  ;;  %v597_v3 = vpop.f32.mrb[17].mxu0  ;;  %v710_v4 = vpop.f32.mrb[17].mxu1 }
 0x116   : > { %v598_v5 = vadd.f32 %v597_v3, %v3248_v53  ;;  %v711_v6 = vadd.f32 %v710_v4, %v3248_v53  ;;  %v599_v7 = vpop.f32.mrb[18].mxu0  ;;  %v712_v8 = vpop.f32.mrb[18].mxu1  ;;  %1331 = vmatprep.subr.bf16.mxu0 %v1126_v60  ;;  %1444 = vmatprep.subr.bf16.mxu1 %v1128_v61 }
 0x117   : > { %v600_v9 = vadd.f32 %v599_v7, %v3250_v54  ;;  %v713_v10 = vadd.f32 %v712_v8, %v3250_v54  ;;  %v601_v11 = vpop.f32.mrb[19].mxu0  ;;  %v714_v12 = vpop.f32.mrb[19].mxu1  ;;  %1332 = vmatpush1.bf16.msra.mxu0 %v1125_v55  ;;  %1445 = vmatpush1.bf16.msra.mxu1 %v1127_v56  ;;  %v1037_v15 = vmax.f32 %v596_v1, 0.0  ;;  %v1039_v16 = vmax.f32 %v709_v2, 0.0 }
 0x118   : > { %v602_v13 = vadd.f32 %v601_v11, %v3250_v54  ;;  %v715_v14 = vadd.f32 %v714_v12, %v3250_v54  ;;  %v1038_v19 = vmax.f32 %v598_v5, 0.0  ;;  %v1040_v23 = vmax.f32 %v711_v6, 0.0  ;;  %v3272_v63 = vpop.permute.xlu0 %393  ;;  %v3274_v1 = vpop.permute.xlu1 %398 }
 0x119   : > { %v1045_v17 = vmax.f32 %v600_v9, 0.0  ;;  %v1047_v18 = vmax.f32 %v713_v10, 0.0 }
 0x11a   : > { %v1046_v24 = vmax.f32 %v602_v13, 0.0  ;;  %v1048_v25 = vmax.f32 %v715_v14, 0.0 }
 0x11b   : > { %v1133_v28 = vpack.c.bf16 %v1045_v17, %v1037_v15  ;;  %v1135_v29 = vpack.c.bf16 %v1047_v18, %v1039_v16 }
 0x11c   : > { %v1134_v30 = vpack.c.bf16 %v1046_v24, %v1038_v19  ;;  %v1136_v31 = vpack.c.bf16 %v1048_v25, %v1040_v23  ;;  %v605_v32 = vpop.f32.mrb[20].mxu0  ;;  %v718_v33 = vpop.f32.mrb[20].mxu1 }
 0x11d   : > { %v606_v34 = vadd.f32 %v605_v32, %v3260_v26  ;;  %v719_v35 = vadd.f32 %v718_v33, %v3260_v26  ;;  %v607_v36 = vpop.f32.mrb[21].mxu0  ;;  %v720_v37 = vpop.f32.mrb[21].mxu1 }
 0x11e   : > { %v608_v38 = vadd.f32 %v607_v36, %v3260_v26  ;;  %v721_v39 = vadd.f32 %v720_v37, %v3260_v26  ;;  %v609_v40 = vpop.f32.mrb[22].mxu0  ;;  %v722_v41 = vpop.f32.mrb[22].mxu1  ;;  %1333 = vmatprep.subr.bf16.mxu0 %v1134_v30  ;;  %1446 = vmatprep.subr.bf16.mxu1 %v1136_v31 }
 0x11f   : > { %v610_v42 = vadd.f32 %v609_v40, %v3262_v27  ;;  %v723_v43 = vadd.f32 %v722_v41, %v3262_v27  ;;  %v611_v44 = vpop.f32.mrb[23].mxu0  ;;  %v724_v45 = vpop.f32.mrb[23].mxu1  ;;  %1334 = vmatpush1.bf16.msra.mxu0 %v1133_v28  ;;  %1447 = vmatpush1.bf16.msra.mxu1 %v1135_v29  ;;  %v1053_v48 = vmax.f32 %v606_v34, 0.0  ;;  %v1055_v49 = vmax.f32 %v719_v35, 0.0 }
 0x120   : > { %v612_v46 = vadd.f32 %v611_v44, %v3262_v27  ;;  %v725_v47 = vadd.f32 %v724_v45, %v3262_v27  ;;  %v1054_v56 = vmax.f32 %v608_v38, 0.0  ;;  %v1056_v60 = vmax.f32 %v721_v39, 0.0  ;;  %v3284_v35 = vpop.permute.xlu0 %403  ;;  %v3286_v36 = vpop.permute.xlu1 %408 }
 0x121   : > { %v1061_v52 = vmax.f32 %v610_v42, 0.0  ;;  %v1063_v55 = vmax.f32 %v723_v43, 0.0 }
 0x122   : > { %v1062_v61 = vmax.f32 %v612_v46, 0.0  ;;  %v1064_v62 = vmax.f32 %v725_v47, 0.0 }
 0x123   : > { %v1141_v2 = vpack.c.bf16 %v1061_v52, %v1053_v48  ;;  %v1143_v3 = vpack.c.bf16 %v1063_v55, %v1055_v49 }
 0x124   : > { %v1142_v4 = vpack.c.bf16 %v1062_v61, %v1054_v56  ;;  %v1144_v5 = vpack.c.bf16 %v1064_v62, %v1056_v60  ;;  %v615_v6 = vpop.f32.mrb[24].mxu0  ;;  %v728_v7 = vpop.f32.mrb[24].mxu1 }
 0x125   : > { %v616_v8 = vadd.f32 %v615_v6, %v3272_v63  ;;  %v729_v9 = vadd.f32 %v728_v7, %v3272_v63  ;;  %v617_v10 = vpop.f32.mrb[25].mxu0  ;;  %v730_v11 = vpop.f32.mrb[25].mxu1 }
 0x126   : > { %v618_v12 = vadd.f32 %v617_v10, %v3272_v63  ;;  %v731_v13 = vadd.f32 %v730_v11, %v3272_v63  ;;  %v619_v14 = vpop.f32.mrb[26].mxu0  ;;  %v732_v15 = vpop.f32.mrb[26].mxu1  ;;  %1335 = vmatprep.subr.bf16.mxu0 %v1142_v4  ;;  %1448 = vmatprep.subr.bf16.mxu1 %v1144_v5 }
 0x127   : > { %v620_v16 = vadd.f32 %v619_v14, %v3274_v1  ;;  %v733_v17 = vadd.f32 %v732_v15, %v3274_v1  ;;  %v621_v18 = vpop.f32.mrb[27].mxu0  ;;  %v734_v19 = vpop.f32.mrb[27].mxu1  ;;  %1336 = vmatpush1.bf16.msra.mxu0 %v1141_v2  ;;  %1449 = vmatpush1.bf16.msra.mxu1 %v1143_v3  ;;  %v1069_v25 = vmax.f32 %v616_v8, 0.0  ;;  %v1071_v28 = vmax.f32 %v729_v9, 0.0 }
 0x128   : > { %v622_v23 = vadd.f32 %v621_v18, %v3274_v1  ;;  %v735_v24 = vadd.f32 %v734_v19, %v3274_v1  ;;  %v1070_v31 = vmax.f32 %v618_v12, 0.0  ;;  %v1072_v32 = vmax.f32 %v731_v13, 0.0 }
 0x129   : > { %v1077_v29 = vmax.f32 %v620_v16, 0.0  ;;  %v1079_v30 = vmax.f32 %v733_v17, 0.0 }
 0x12a   : > { %v1078_v33 = vmax.f32 %v622_v23, 0.0  ;;  %v1080_v34 = vmax.f32 %v735_v24, 0.0 }
 0x12b   : > { %v1149_v37 = vpack.c.bf16 %v1077_v29, %v1069_v25  ;;  %v1151_v38 = vpack.c.bf16 %v1079_v30, %v1071_v28  ;;  %v3303_v30 = vld [vmem:[%s3783_s3] sm:$0xff]  }
 0x12c   : > { %v1150_v39 = vpack.c.bf16 %v1078_v33, %v1070_v31  ;;  %v1152_v40 = vpack.c.bf16 %v1080_v34, %v1072_v32  ;;  %v625_v41 = vpop.f32.mrb[28].mxu0  ;;  %v738_v42 = vpop.f32.mrb[28].mxu1 }
 0x12d   : > { %v626_v43 = vadd.f32 %v625_v41, %v3284_v35  ;;  %v739_v44 = vadd.f32 %v738_v42, %v3284_v35  ;;  %v627_v45 = vpop.f32.mrb[29].mxu0  ;;  %v740_v46 = vpop.f32.mrb[29].mxu1 }
 0x12e   : > { %v628_v47 = vadd.f32 %v627_v45, %v3284_v35  ;;  %v741_v48 = vadd.f32 %v740_v46, %v3284_v35  ;;  %v629_v49 = vpop.f32.mrb[30].mxu0  ;;  %v742_v52 = vpop.f32.mrb[30].mxu1  ;;  %1337 = vmatprep.subr.bf16.mxu0 %v1150_v39  ;;  %1450 = vmatprep.subr.bf16.mxu1 %v1152_v40 }
 0x12f   : > { %v630_v55 = vadd.f32 %v629_v49, %v3286_v36  ;;  %v743_v56 = vadd.f32 %v742_v52, %v3286_v36  ;;  %v631_v60 = vpop.f32.mrb[31].mxu0  ;;  %v744_v61 = vpop.f32.mrb[31].mxu1  ;;  %1338 = vmatpush1.bf16.msra.mxu0 %v1149_v37  ;;  %1451 = vmatpush1.bf16.msra.mxu1 %v1151_v38  ;;  %v1085_v3 = vmax.f32 %v626_v43, 0.0  ;;  %v1087_v4 = vmax.f32 %v739_v44, 0.0 }
 0x130   : > { %v632_v62 = vadd.f32 %v631_v60, %v3286_v36  ;;  %v745_v2 = vadd.f32 %v744_v61, %v3286_v36  ;;  %v1086_v7 = vmax.f32 %v628_v47, 0.0  ;;  %v1088_v8 = vmax.f32 %v741_v48, 0.0 }
 0x131   : > { %v1093_v5 = vmax.f32 %v630_v55, 0.0  ;;  %v1095_v6 = vmax.f32 %v743_v56, 0.0 }
 0x132   : > { %v1094_v9 = vmax.f32 %v632_v62, 0.0  ;;  %v1096_v10 = vmax.f32 %v745_v2, 0.0 }
 0x133   : > { %v1157_v11 = vpack.c.bf16 %v1093_v5, %v1085_v3  ;;  %v1159_v12 = vpack.c.bf16 %v1095_v6, %v1087_v4  ;;  %v3320_v5 = vld [vmem:[%s3783_s3 + $0x8] sm:$0xff]  }
 0x134   : > { %v1158_v13 = vpack.c.bf16 %v1094_v9, %v1086_v7  ;;  %v1160_v14 = vpack.c.bf16 %v1096_v10, %v1088_v8  ;;  %v781_v15 = vpop.f32.mrb[32].mxu0  ;;  %v894_v16 = vpop.f32.mrb[32].mxu1 }
 0x135   : > { %v782_v17 = vadd.f32 %v781_v15, %v3200_v57  ;;  %v895_v18 = vadd.f32 %v894_v16, %v3200_v57  ;;  %v783_v19 = vpop.f32.mrb[33].mxu0  ;;  %v896_v23 = vpop.f32.mrb[33].mxu1 }
 0x136   : > { %v784_v24 = vadd.f32 %v783_v19, %v3200_v57  ;;  %v897_v25 = vadd.f32 %v896_v23, %v3200_v57  ;;  %v785_v28 = vpop.f32.mrb[34].mxu0  ;;  %v898_v29 = vpop.f32.mrb[34].mxu1  ;;  %1339 = vmatprep.subr.bf16.mxu0 %v1158_v13  ;;  %1452 = vmatprep.subr.bf16.mxu1 %v1160_v14 }
 0x137   : > { %v786_v31 = vadd.f32 %v785_v28, %v3202_v58  ;;  %v899_v32 = vadd.f32 %v898_v29, %v3202_v58  ;;  %v787_v33 = vpop.f32.mrb[35].mxu0  ;;  %v900_v34 = vpop.f32.mrb[35].mxu1  ;;  %1340 = vmatpush1.bf16.msra.mxu0 %v1157_v11  ;;  %1453 = vmatpush1.bf16.msra.mxu1 %v1159_v12  ;;  %v977_v38 = vmax.f32 %v782_v17, 0.0  ;;  %v979_v39 = vmax.f32 %v895_v18, 0.0 }
 0x138   : > { %v788_v37 = vadd.f32 %v787_v33, %v3202_v58  ;;  %v901_v57 = vadd.f32 %v900_v34, %v3202_v58  ;;  %v978_v42 = vmax.f32 %v784_v24, 0.0  ;;  %v980_v43 = vmax.f32 %v897_v25, 0.0 }
 0x139   : > { %v985_v40 = vmax.f32 %v786_v31, 0.0  ;;  %v987_v41 = vmax.f32 %v899_v32, 0.0 }
 0x13a   : > { %v986_v44 = vmax.f32 %v788_v37, 0.0  ;;  %v988_v45 = vmax.f32 %v901_v57, 0.0  ;;  %1358 = vmatmul.mubr.bf16.vlgmr.msra.gmra.mrb[64].mxu0 %v3303_v30  ;;  %1471 = vmatmul.mubr.bf16.vlgmr.msra.gmra.mrb[64].mxu1 %v3303_v30 }
 0x13b   : > { %v1105_v46 = vpack.c.bf16 %v985_v40, %v977_v38  ;;  %v1107_v47 = vpack.c.bf16 %v987_v41, %v979_v39  ;;  %1367 = vmatprep.mubr.bf16.mxu0 %v2872_v0  ;;  %1480 = vmatprep.mubr.bf16.mxu1 %v2872_v0  ;;  %v3337_v39 = vld [vmem:[%s3783_s3 + $0x10] sm:$0xff]  }
 0x13c   : > { %v1106_v48 = vpack.c.bf16 %v986_v44, %v978_v42  ;;  %v1108_v58 = vpack.c.bf16 %v988_v45, %v980_v43  ;;  %v791_v49 = vpop.f32.mrb[36].mxu0  ;;  %v904_v52 = vpop.f32.mrb[36].mxu1 }
 0x13d   : > { %v792_v55 = vadd.f32 %v791_v49, %v3204_v59  ;;  %v905_v56 = vadd.f32 %v904_v52, %v3204_v59  ;;  %v793_v60 = vpop.f32.mrb[37].mxu0  ;;  %v906_v61 = vpop.f32.mrb[37].mxu1 }
 0x13e   : > { %v794_v62 = vadd.f32 %v793_v60, %v3204_v59  ;;  %v907_v2 = vadd.f32 %v906_v61, %v3204_v59  ;;  %v795_v3 = vpop.f32.mrb[38].mxu0  ;;  %v908_v4 = vpop.f32.mrb[38].mxu1  ;;  %1551 = vmatprep.subr.bf16.mxu0 %v1106_v48  ;;  %1664 = vmatprep.subr.bf16.mxu1 %v1108_v58 }
 0x13f   : > { %v796_v6 = vadd.f32 %v795_v3, %v3214_v21  ;;  %v909_v7 = vadd.f32 %v908_v4, %v3214_v21  ;;  %v797_v8 = vpop.f32.mrb[39].mxu0  ;;  %v910_v9 = vpop.f32.mrb[39].mxu1  ;;  %1552 = vmatpush1.bf16.msra.mxu0 %v1105_v46  ;;  %1665 = vmatpush1.bf16.msra.mxu1 %v1107_v47  ;;  %v993_v11 = vmax.f32 %v792_v55, 0.0  ;;  %v995_v12 = vmax.f32 %v905_v56, 0.0 }
 0x140   : > { %v798_v10 = vadd.f32 %v797_v8, %v3214_v21  ;;  %v911_v59 = vadd.f32 %v910_v9, %v3214_v21  ;;  %v994_v15 = vmax.f32 %v794_v62, 0.0  ;;  %v996_v16 = vmax.f32 %v907_v2, 0.0 }
 0x141   : > { %v1001_v13 = vmax.f32 %v796_v6, 0.0  ;;  %v1003_v14 = vmax.f32 %v909_v7, 0.0 }
 0x142   : > { %v1002_v17 = vmax.f32 %v798_v10, 0.0  ;;  %v1004_v18 = vmax.f32 %v911_v59, 0.0  ;;  %1368 = vmatmul.mubr.bf16.gmra.mrb[68].mxu0 %v3320_v5  ;;  %1481 = vmatmul.mubr.bf16.gmra.mrb[68].mxu1 %v3320_v5 }
 0x143   : > { %v1113_v19 = vpack.c.bf16 %v1001_v13, %v993_v11  ;;  %v1115_v23 = vpack.c.bf16 %v1003_v14, %v995_v12  ;;  %1377 = vmatprep.mubr.bf16.mxu0 %v2872_v0  ;;  %1490 = vmatprep.mubr.bf16.mxu1 %v2872_v0  ;;  %v3354_v11 = vld [vmem:[%s3783_s3 + $0x18] sm:$0xff]  }
 0x144   : > { %v1114_v24 = vpack.c.bf16 %v1002_v17, %v994_v15  ;;  %v1116_v21 = vpack.c.bf16 %v1004_v18, %v996_v16  ;;  %v801_v25 = vpop.f32.mrb[40].mxu0  ;;  %v914_v28 = vpop.f32.mrb[40].mxu1 }
 0x145   : > { %v802_v29 = vadd.f32 %v801_v25, %v3224_v50  ;;  %v915_v31 = vadd.f32 %v914_v28, %v3224_v50  ;;  %v803_v32 = vpop.f32.mrb[41].mxu0  ;;  %v916_v33 = vpop.f32.mrb[41].mxu1 }
 0x146   : > { %v804_v34 = vadd.f32 %v803_v32, %v3224_v50  ;;  %v917_v37 = vadd.f32 %v916_v33, %v3224_v50  ;;  %v805_v57 = vpop.f32.mrb[42].mxu0  ;;  %v918_v38 = vpop.f32.mrb[42].mxu1  ;;  %1553 = vmatprep.subr.bf16.mxu0 %v1114_v24  ;;  %1666 = vmatprep.subr.bf16.mxu1 %v1116_v21 }
 0x147   : > { %v806_v40 = vadd.f32 %v805_v57, %v3226_v51  ;;  %v919_v41 = vadd.f32 %v918_v38, %v3226_v51  ;;  %v807_v42 = vpop.f32.mrb[43].mxu0  ;;  %v920_v43 = vpop.f32.mrb[43].mxu1  ;;  %1554 = vmatpush1.bf16.msra.mxu0 %v1113_v19  ;;  %1667 = vmatpush1.bf16.msra.mxu1 %v1115_v23  ;;  %v1009_v45 = vmax.f32 %v802_v29, 0.0  ;;  %v1011_v46 = vmax.f32 %v915_v31, 0.0 }
 0x148   : > { %v808_v44 = vadd.f32 %v807_v42, %v3226_v51  ;;  %v921_v50 = vadd.f32 %v920_v43, %v3226_v51  ;;  %v1010_v58 = vmax.f32 %v804_v34, 0.0  ;;  %v1012_v49 = vmax.f32 %v917_v37, 0.0 }
 0x149   : > { %v1017_v47 = vmax.f32 %v806_v40, 0.0  ;;  %v1019_v48 = vmax.f32 %v919_v41, 0.0 }
 0x14a   : > { %v1018_v52 = vmax.f32 %v808_v44, 0.0  ;;  %v1020_v55 = vmax.f32 %v921_v50, 0.0  ;;  %1378 = vmatmul.mubr.bf16.gmra.mrb[72].mxu0 %v3337_v39  ;;  %1491 = vmatmul.mubr.bf16.gmra.mrb[72].mxu1 %v3337_v39  ;;  %v3371_v50 = vld [vmem:[%s3783_s3 + $0x20] sm:$0xff]  }
 0x14b   : > { %v1121_v56 = vpack.c.bf16 %v1017_v47, %v1009_v45  ;;  %v1123_v60 = vpack.c.bf16 %v1019_v48, %v1011_v46  ;;  %1387 = vmatprep.mubr.bf16.mxu0 %v2872_v0  ;;  %1500 = vmatprep.mubr.bf16.mxu1 %v2872_v0 }
 0x14c   : > { %v1122_v61 = vpack.c.bf16 %v1018_v52, %v1010_v58  ;;  %v1124_v51 = vpack.c.bf16 %v1020_v55, %v1012_v49  ;;  %v811_v62 = vpop.f32.mrb[44].mxu0  ;;  %v924_v2 = vpop.f32.mrb[44].mxu1 }
 0x14d   : > { %v812_v3 = vadd.f32 %v811_v62, %v3236_v20  ;;  %v925_v4 = vadd.f32 %v924_v2, %v3236_v20  ;;  %v813_v6 = vpop.f32.mrb[45].mxu0  ;;  %v926_v7 = vpop.f32.mrb[45].mxu1 }
 0x14e   : > { %v814_v8 = vadd.f32 %v813_v6, %v3236_v20  ;;  %v927_v9 = vadd.f32 %v926_v7, %v3236_v20  ;;  %v815_v10 = vpop.f32.mrb[46].mxu0  ;;  %v928_v59 = vpop.f32.mrb[46].mxu1  ;;  %1555 = vmatprep.subr.bf16.mxu0 %v1122_v61  ;;  %1668 = vmatprep.subr.bf16.mxu1 %v1124_v51 }
 0x14f   : > { %v816_v12 = vadd.f32 %v815_v10, %v3238_v22  ;;  %v929_v13 = vadd.f32 %v928_v59, %v3238_v22  ;;  %v817_v14 = vpop.f32.mrb[47].mxu0  ;;  %v930_v15 = vpop.f32.mrb[47].mxu1  ;;  %1556 = vmatpush1.bf16.msra.mxu0 %v1121_v56  ;;  %1669 = vmatpush1.bf16.msra.mxu1 %v1123_v60  ;;  %v1025_v17 = vmax.f32 %v812_v3, 0.0  ;;  %v1027_v18 = vmax.f32 %v925_v4, 0.0 }
 0x150   : > { %v818_v16 = vadd.f32 %v817_v14, %v3238_v22  ;;  %v931_v20 = vadd.f32 %v930_v15, %v3238_v22  ;;  %v1026_v24 = vmax.f32 %v814_v8, 0.0  ;;  %v1028_v21 = vmax.f32 %v927_v9, 0.0 }
 0x151   : > { %v1033_v19 = vmax.f32 %v816_v12, 0.0  ;;  %v1035_v23 = vmax.f32 %v929_v13, 0.0 }
 0x152   : > { %v1034_v25 = vmax.f32 %v818_v16, 0.0  ;;  %v1036_v28 = vmax.f32 %v931_v20, 0.0  ;;  %1388 = vmatmul.mubr.bf16.gmra.mrb[76].mxu0 %v3354_v11  ;;  %1501 = vmatmul.mubr.bf16.gmra.mrb[76].mxu1 %v3354_v11  ;;  %v3388_v16 = vld [vmem:[%s3783_s3 + $0x28] sm:$0xff]  }
 0x153   : > { %v1129_v29 = vpack.c.bf16 %v1033_v19, %v1025_v17  ;;  %v1131_v31 = vpack.c.bf16 %v1035_v23, %v1027_v18  ;;  %1397 = vmatprep.mubr.bf16.mxu0 %v2872_v0  ;;  %1510 = vmatprep.mubr.bf16.mxu1 %v2872_v0 }
 0x154   : > { %v1130_v32 = vpack.c.bf16 %v1034_v25, %v1026_v24  ;;  %v1132_v22 = vpack.c.bf16 %v1036_v28, %v1028_v21  ;;  %v821_v33 = vpop.f32.mrb[48].mxu0  ;;  %v934_v34 = vpop.f32.mrb[48].mxu1 }
 0x155   : > { %v822_v37 = vadd.f32 %v821_v33, %v3248_v53  ;;  %v935_v57 = vadd.f32 %v934_v34, %v3248_v53  ;;  %v823_v38 = vpop.f32.mrb[49].mxu0  ;;  %v936_v40 = vpop.f32.mrb[49].mxu1 }
 0x156   : > { %v824_v41 = vadd.f32 %v823_v38, %v3248_v53  ;;  %v937_v42 = vadd.f32 %v936_v40, %v3248_v53  ;;  %v825_v43 = vpop.f32.mrb[50].mxu0  ;;  %v938_v44 = vpop.f32.mrb[50].mxu1  ;;  %1557 = vmatprep.subr.bf16.mxu0 %v1130_v32  ;;  %1670 = vmatprep.subr.bf16.mxu1 %v1132_v22 }
 0x157   : > { %v826_v45 = vadd.f32 %v825_v43, %v3250_v54  ;;  %v939_v46 = vadd.f32 %v938_v44, %v3250_v54  ;;  %v827_v47 = vpop.f32.mrb[51].mxu0  ;;  %v940_v48 = vpop.f32.mrb[51].mxu1  ;;  %1558 = vmatpush1.bf16.msra.mxu0 %v1129_v29  ;;  %1671 = vmatpush1.bf16.msra.mxu1 %v1131_v31  ;;  %v1041_v49 = vmax.f32 %v822_v37, 0.0  ;;  %v1043_v52 = vmax.f32 %v935_v57, 0.0 }
 0x158   : > { %v828_v58 = vadd.f32 %v827_v47, %v3250_v54  ;;  %v941_v53 = vadd.f32 %v940_v48, %v3250_v54  ;;  %v1042_v60 = vmax.f32 %v824_v41, 0.0  ;;  %v1044_v61 = vmax.f32 %v937_v42, 0.0  ;;  %v3405_v48 = vld [vmem:[%s3783_s3 + $0x30] sm:$0xff]  }
 0x159   : > { %v1049_v55 = vmax.f32 %v826_v45, 0.0  ;;  %v1051_v56 = vmax.f32 %v939_v46, 0.0 }
 0x15a   : > { %v1050_v51 = vmax.f32 %v828_v58, 0.0  ;;  %v1052_v62 = vmax.f32 %v941_v53, 0.0  ;;  %1398 = vmatmul.mubr.bf16.gmra.mrb[80].mxu0 %v3371_v50  ;;  %1511 = vmatmul.mubr.bf16.gmra.mrb[80].mxu1 %v3371_v50 }
 0x15b   : > { %v1137_v2 = vpack.c.bf16 %v1049_v55, %v1041_v49  ;;  %v1139_v3 = vpack.c.bf16 %v1051_v56, %v1043_v52  ;;  %1407 = vmatprep.mubr.bf16.mxu0 %v2872_v0  ;;  %1520 = vmatprep.mubr.bf16.mxu1 %v2872_v0 }
 0x15c   : > { %v1138_v4 = vpack.c.bf16 %v1050_v51, %v1042_v60  ;;  %v1140_v54 = vpack.c.bf16 %v1052_v62, %v1044_v61  ;;  %v831_v6 = vpop.f32.mrb[52].mxu0  ;;  %v944_v7 = vpop.f32.mrb[52].mxu1 }
 0x15d   : > { %v832_v8 = vadd.f32 %v831_v6, %v3260_v26  ;;  %v945_v9 = vadd.f32 %v944_v7, %v3260_v26  ;;  %v833_v10 = vpop.f32.mrb[53].mxu0  ;;  %v946_v59 = vpop.f32.mrb[53].mxu1 }
 0x15e   : > { %v834_v12 = vadd.f32 %v833_v10, %v3260_v26  ;;  %v947_v13 = vadd.f32 %v946_v59, %v3260_v26  ;;  %v835_v14 = vpop.f32.mrb[54].mxu0  ;;  %v948_v15 = vpop.f32.mrb[54].mxu1  ;;  %1559 = vmatprep.subr.bf16.mxu0 %v1138_v4  ;;  %1672 = vmatprep.subr.bf16.mxu1 %v1140_v54 }
 0x15f   : > { %v836_v20 = vadd.f32 %v835_v14, %v3262_v27  ;;  %v949_v17 = vadd.f32 %v948_v15, %v3262_v27  ;;  %v837_v18 = vpop.f32.mrb[55].mxu0  ;;  %v950_v19 = vpop.f32.mrb[55].mxu1  ;;  %1560 = vmatpush1.bf16.msra.mxu0 %v1137_v2  ;;  %1673 = vmatpush1.bf16.msra.mxu1 %v1139_v3  ;;  %v1057_v24 = vmax.f32 %v832_v8, 0.0  ;;  %v1059_v21 = vmax.f32 %v945_v9, 0.0 }
 0x160   : > { %v838_v23 = vadd.f32 %v837_v18, %v3262_v27  ;;  %v951_v26 = vadd.f32 %v950_v19, %v3262_v27  ;;  %v1058_v29 = vmax.f32 %v834_v12, 0.0  ;;  %v1060_v31 = vmax.f32 %v947_v13, 0.0  ;;  %v2791_v18 = vld [vmem:[%s3783_s3 + $0x38] sm:$0xff]  }
 0x161   : > { %v1065_v25 = vmax.f32 %v836_v20, 0.0  ;;  %v1067_v28 = vmax.f32 %v949_v17, 0.0 }
 0x162   : > { %v1066_v32 = vmax.f32 %v838_v23, 0.0  ;;  %v1068_v22 = vmax.f32 %v951_v26, 0.0  ;;  %1408 = vmatmul.mubr.bf16.gmra.mrb[84].mxu0 %v3388_v16  ;;  %1521 = vmatmul.mubr.bf16.gmra.mrb[84].mxu1 %v3388_v16 }
 0x163   : > { %v1145_v33 = vpack.c.bf16 %v1065_v25, %v1057_v24  ;;  %v1147_v34 = vpack.c.bf16 %v1067_v28, %v1059_v21  ;;  %1417 = vmatprep.mubr.bf16.mxu0 %v2872_v0  ;;  %1530 = vmatprep.mubr.bf16.mxu1 %v2872_v0 }
 0x164   : > { %v1146_v37 = vpack.c.bf16 %v1066_v32, %v1058_v29  ;;  %v1148_v27 = vpack.c.bf16 %v1068_v22, %v1060_v31  ;;  %v841_v57 = vpop.f32.mrb[56].mxu0  ;;  %v954_v38 = vpop.f32.mrb[56].mxu1 }
 0x165   : > { %v842_v40 = vadd.f32 %v841_v57, %v3272_v63  ;;  %v955_v41 = vadd.f32 %v954_v38, %v3272_v63  ;;  %v843_v42 = vpop.f32.mrb[57].mxu0  ;;  %v956_v43 = vpop.f32.mrb[57].mxu1 }
 0x166   : > { %v844_v44 = vadd.f32 %v843_v42, %v3272_v63  ;;  %v957_v45 = vadd.f32 %v956_v43, %v3272_v63  ;;  %v845_v46 = vpop.f32.mrb[58].mxu0  ;;  %v958_v47 = vpop.f32.mrb[58].mxu1  ;;  %1561 = vmatprep.subr.bf16.mxu0 %v1146_v37  ;;  %1674 = vmatprep.subr.bf16.mxu1 %v1148_v27 }
 0x167   : > { %v846_v58 = vadd.f32 %v845_v46, %v3274_v1  ;;  %v959_v53 = vadd.f32 %v958_v47, %v3274_v1  ;;  %v847_v49 = vpop.f32.mrb[59].mxu0  ;;  %v960_v52 = vpop.f32.mrb[59].mxu1  ;;  %1562 = vmatpush1.bf16.msra.mxu0 %v1145_v33  ;;  %1675 = vmatpush1.bf16.msra.mxu1 %v1147_v34  ;;  %v1073_v56 = vmax.f32 %v842_v40, 0.0  ;;  %v1075_v60 = vmax.f32 %v955_v41, 0.0 }
 0x168   : > { %v848_v55 = vadd.f32 %v847_v49, %v3274_v1  ;;  %v961_v63 = vadd.f32 %v960_v52, %v3274_v1  ;;  %v1074_v62 = vmax.f32 %v844_v44, 0.0  ;;  %v1076_v2 = vmax.f32 %v957_v45, 0.0 }
 0x169   : > { %v1081_v61 = vmax.f32 %v846_v58, 0.0  ;;  %v1083_v51 = vmax.f32 %v959_v53, 0.0 }
 0x16a   : > { %v1082_v3 = vmax.f32 %v848_v55, 0.0  ;;  %v1084_v4 = vmax.f32 %v961_v63, 0.0  ;;  %1418 = vmatmul.mubr.bf16.gmra.mrb[88].mxu0 %v3405_v48  ;;  %1531 = vmatmul.mubr.bf16.gmra.mrb[88].mxu1 %v3405_v48 }
 0x16b   : > { %v1153_v54 = vpack.c.bf16 %v1081_v61, %v1073_v56  ;;  %v1155_v6 = vpack.c.bf16 %v1083_v51, %v1075_v60  ;;  %1427 = vmatprep.mubr.bf16.mxu0 %v2872_v0  ;;  %1540 = vmatprep.mubr.bf16.mxu1 %v2872_v0 }
 0x16c   : > { %v1154_v7 = vpack.c.bf16 %v1082_v3, %v1074_v62  ;;  %v1156_v1 = vpack.c.bf16 %v1084_v4, %v1076_v2  ;;  %v851_v8 = vpop.f32.mrb[60].mxu0  ;;  %v964_v9 = vpop.f32.mrb[60].mxu1 }
 0x16d   : > { %v852_v10 = vadd.f32 %v851_v8, %v3284_v35  ;;  %v965_v59 = vadd.f32 %v964_v9, %v3284_v35  ;;  %v853_v12 = vpop.f32.mrb[61].mxu0  ;;  %v966_v13 = vpop.f32.mrb[61].mxu1 }
 0x16e   : > { %v854_v14 = vadd.f32 %v853_v12, %v3284_v35  ;;  %v967_v15 = vadd.f32 %v966_v13, %v3284_v35  ;;  %v855_v20 = vpop.f32.mrb[62].mxu0  ;;  %v968_v17 = vpop.f32.mrb[62].mxu1  ;;  %1563 = vmatprep.subr.bf16.mxu0 %v1154_v7  ;;  %1676 = vmatprep.subr.bf16.mxu1 %v1156_v1 }
 0x16f   : > { %v856_v19 = vadd.f32 %v855_v20, %v3286_v36  ;;  %v969_v23 = vadd.f32 %v968_v17, %v3286_v36  ;;  %v857_v26 = vpop.f32.mrb[63].mxu0  ;;  %v970_v24 = vpop.f32.mrb[63].mxu1  ;;  %1564 = vmatpush1.bf16.msra.mxu0 %v1153_v54  ;;  %1677 = vmatpush1.bf16.msra.mxu1 %v1155_v6  ;;  %v1089_v25 = vmax.f32 %v852_v10, 0.0  ;;  %v1091_v28 = vmax.f32 %v965_v59, 0.0 }
 0x170   : > { %v858_v21 = vadd.f32 %v857_v26, %v3286_v36  ;;  %v971_v35 = vadd.f32 %v970_v24, %v3286_v36  ;;  %v1090_v32 = vmax.f32 %v854_v14, 0.0  ;;  %v1092_v22 = vmax.f32 %v967_v15, 0.0  ;;  %v3457_v36 = vpop.permute.xlu0 %1199 }
 0x171   : > { %v1097_v29 = vmax.f32 %v856_v19, 0.0  ;;  %v1099_v31 = vmax.f32 %v969_v23, 0.0 }
 0x172   : > { %v1098_v33 = vmax.f32 %v858_v21, 0.0  ;;  %v1100_v34 = vmax.f32 %v971_v35, 0.0  ;;  %1428 = vmatmul.mubr.bf16.gmra.mrb[92].mxu0 %v2791_v18  ;;  %1541 = vmatmul.mubr.bf16.gmra.mrb[92].mxu1 %v2791_v18 }
 0x173   : > { %v1161_v37 = vpack.c.bf16 %v1097_v29, %v1089_v25  ;;  %v1163_v27 = vpack.c.bf16 %v1099_v31, %v1091_v28  ;;  %1583 = vmatprep.mubr.bf16.mxu0 %v2872_v0  ;;  %1696 = vmatprep.mubr.bf16.mxu1 %v2872_v0 }
 0x174   : > { %v1162_v57 = vpack.c.bf16 %v1098_v33, %v1090_v32  ;;  %v1164_v38 = vpack.c.bf16 %v1100_v34, %v1092_v22  ;;  %v3479_v2 = vpop.permute.xlu0 %1209 }
 0x176   : > { %1565 = vmatprep.subr.bf16.mxu0 %v1162_v57  ;;  %1678 = vmatprep.subr.bf16.mxu1 %v1164_v38 }
 0x177   : > { %1566 = vmatpush1.bf16.msra.mxu0 %v1161_v37  ;;  %1679 = vmatpush1.bf16.msra.mxu1 %v1163_v27 }
 0x178   : > { %v3501_v33 = vpop.permute.xlu0 %1219 }
 0x17a   : > { %1584 = vmatmul.mubr.bf16.vlgmr.msra.gmra.mrb[96].mxu0 %v3303_v30  ;;  %1697 = vmatmul.mubr.bf16.vlgmr.msra.gmra.mrb[96].mxu1 %v3303_v30  ;;  %v3459_v30 = vpop.permute.xlu1 %1204 }
 0x17b   : > { %1593 = vmatprep.mubr.bf16.mxu0 %v2872_v0  ;;  %1706 = vmatprep.mubr.bf16.mxu1 %v2872_v0 }
 0x17e   : > { %v3481_v3 = vpop.permute.xlu1 %1214 }
 0x182   : > { %1594 = vmatmul.mubr.bf16.gmra.mrb[100].mxu0 %v3320_v5  ;;  %1707 = vmatmul.mubr.bf16.gmra.mrb[100].mxu1 %v3320_v5  ;;  %v3503_v34 = vpop.permute.xlu1 %1224 }
 0x183   : > { %1603 = vmatprep.mubr.bf16.mxu0 %v2872_v0  ;;  %1716 = vmatprep.mubr.bf16.mxu1 %v2872_v0 }
 0x18a   : > { %1604 = vmatmul.mubr.bf16.gmra.mrb[104].mxu0 %v3337_v39  ;;  %1717 = vmatmul.mubr.bf16.gmra.mrb[104].mxu1 %v3337_v39 }
 0x18b   : > { %1613 = vmatprep.mubr.bf16.mxu0 %v2872_v0  ;;  %1726 = vmatprep.mubr.bf16.mxu1 %v2872_v0 }
 0x192   : > { %1614 = vmatmul.mubr.bf16.gmra.mrb[108].mxu0 %v3354_v11  ;;  %1727 = vmatmul.mubr.bf16.gmra.mrb[108].mxu1 %v3354_v11 }
 0x193   : > { %1623 = vmatprep.mubr.bf16.mxu0 %v2872_v0  ;;  %1736 = vmatprep.mubr.bf16.mxu1 %v2872_v0 }
 0x19a   : > { %1624 = vmatmul.mubr.bf16.gmra.mrb[112].mxu0 %v3371_v50  ;;  %1737 = vmatmul.mubr.bf16.gmra.mrb[112].mxu1 %v3371_v50 }
 0x19b   : > { %1633 = vmatprep.mubr.bf16.mxu0 %v2872_v0  ;;  %1746 = vmatprep.mubr.bf16.mxu1 %v2872_v0 }
 0x1a2   : > { %1634 = vmatmul.mubr.bf16.gmra.mrb[116].mxu0 %v3388_v16  ;;  %1747 = vmatmul.mubr.bf16.gmra.mrb[116].mxu1 %v3388_v16 }
 0x1a3   : > { %1643 = vmatprep.mubr.bf16.mxu0 %v2872_v0  ;;  %1756 = vmatprep.mubr.bf16.mxu1 %v2872_v0 }
 0x1aa   : > { %1644 = vmatmul.mubr.bf16.gmra.mrb[120].mxu0 %v3405_v48  ;;  %1757 = vmatmul.mubr.bf16.gmra.mrb[120].mxu1 %v3405_v48 }
 0x1ab   : > { %1653 = vmatprep.mubr.bf16.mxu0 %v2872_v0  ;;  %1766 = vmatprep.mubr.bf16.mxu1 %v2872_v0 }
 0x1b2   : > { %1654 = vmatmul.mubr.bf16.gmra.mrb[124].mxu0 %v2791_v18  ;;  %1767 = vmatmul.mubr.bf16.gmra.mrb[124].mxu1 %v2791_v18 }
 0x20d   : > { %v1359_v5 = vpop.f32.mrb[64].mxu0  ;;  %v1472_v39 = vpop.f32.mrb[64].mxu1 }
 0x20e   : > { %v1360_v11 = vadd.f32 %v1359_v5, %v3457_v36  ;;  %v1473_v50 = vadd.f32 %v1472_v39, %v3457_v36  ;;  %v1361_v16 = vpop.f32.mrb[65].mxu0  ;;  %v1474_v40 = vpop.f32.mrb[65].mxu1 }
 0x20f   : > { %v1362_v0 = vadd.f32 %v1361_v16, %v3457_v36  ;;  %v1475_v41 = vadd.f32 %v1474_v40, %v3457_v36  ;;  %v1363_v42 = vpop.f32.mrb[66].mxu0  ;;  %v1476_v43 = vpop.f32.mrb[66].mxu1 }
 0x210   : > { %v1777_v44 = vmax.f32 %v1360_v11, 0.0  ;;  %v1779_v45 = vmax.f32 %v1473_v50, 0.0  ;;  %v1364_v46 = vadd.f32 %v1363_v42, %v3459_v30  ;;  %v1477_v47 = vadd.f32 %v1476_v43, %v3459_v30  ;;  %v1365_v48 = vpop.f32.mrb[67].mxu0  ;;  %v1478_v58 = vpop.f32.mrb[67].mxu1 }
 0x211   : > { %v1778_v53 = vmax.f32 %v1362_v0, 0.0  ;;  %v1780_v49 = vmax.f32 %v1475_v41, 0.0  ;;  %v1366_v52 = vadd.f32 %v1365_v48, %v3459_v30  ;;  %v1479_v55 = vadd.f32 %v1478_v58, %v3459_v30 }
 0x212   : > { %2358 = vst.msk [vmem:[%s3467_s12] sm:$0xff] %vm2357_vm2, %v1777_v44  ;;  %v1785_v63 = vmax.f32 %v1364_v46, 0.0  ;;  %v1787_v56 = vmax.f32 %v1477_v47, 0.0 }
 0x213   : > { %v2643_v60 = vpack.c.bf16 %v1778_v53, %v1777_v44  ;;  %v2644_v61 = vpack.c.bf16 %v1780_v49, %v1779_v45  ;;  %v1786_v51 = vmax.f32 %v1366_v52, 0.0  ;;  %v1788_v62 = vmax.f32 %v1479_v55, 0.0 }
 0x214   : > { %2359 = vst.msk [vmem:[%s3467_s12 + $0x8] sm:$0xff] %vm2357_vm2, %v1785_v63 }
 0x215   : > { %2289 = vst [vmem:[%s3485_s13] sm:$0xff] %v2643_v60  ;;  %2290 = vst [vmem:[%s3485_s13 + $0x8] sm:$0xff] %v2644_v61  ;;  %v2647_v4 = vpack.c.bf16 %v1786_v51, %v1785_v63  ;;  %v2648_v54 = vpack.c.bf16 %v1788_v62, %v1787_v56  ;;  %v1369_v6 = vpop.f32.mrb[68].mxu0  ;;  %v1482_v7 = vpop.f32.mrb[68].mxu1 }
 0x216   : > { %v1370_v1 = vadd.f32 %v1369_v6, %v3479_v2  ;;  %v1483_v8 = vadd.f32 %v1482_v7, %v3479_v2  ;;  %v1371_v9 = vpop.f32.mrb[69].mxu0  ;;  %v1484_v10 = vpop.f32.mrb[69].mxu1 }
 0x217   : > { %2293 = vst [vmem:[%s3485_s13 + $0x20] sm:$0xff] %v2647_v4  ;;  %2294 = vst [vmem:[%s3485_s13 + $0x28] sm:$0xff] %v2648_v54  ;;  %v1372_v59 = vadd.f32 %v1371_v9, %v3479_v2  ;;  %v1485_v12 = vadd.f32 %v1484_v10, %v3479_v2  ;;  %v1373_v13 = vpop.f32.mrb[70].mxu0  ;;  %v1486_v14 = vpop.f32.mrb[70].mxu1 }
 0x218   : > { %v1793_v15 = vmax.f32 %v1370_v1, 0.0  ;;  %v1795_v20 = vmax.f32 %v1483_v8, 0.0  ;;  %v1374_v17 = vadd.f32 %v1373_v13, %v3481_v3  ;;  %v1487_v18 = vadd.f32 %v1486_v14, %v3481_v3  ;;  %v1375_v19 = vpop.f32.mrb[71].mxu0  ;;  %v1488_v23 = vpop.f32.mrb[71].mxu1 }
 0x219   : > { %v1794_v26 = vmax.f32 %v1372_v59, 0.0  ;;  %v1796_v24 = vmax.f32 %v1485_v12, 0.0  ;;  %v1376_v21 = vadd.f32 %v1375_v19, %v3481_v3  ;;  %v1489_v35 = vadd.f32 %v1488_v23, %v3481_v3  ;;  %v3521_v51 = vpop.permute.xlu0 %1229  ;;  %v3523_v62 = vpop.permute.xlu1 %1234 }
 0x21a   : > { %2360 = vst.msk [vmem:[%s3467_s12 + $0x10] sm:$0xff] %vm2357_vm2, %v1793_v15  ;;  %v1801_v25 = vmax.f32 %v1374_v17, 0.0  ;;  %v1803_v28 = vmax.f32 %v1487_v18, 0.0 }
 0x21b   : > { %v2651_v29 = vpack.c.bf16 %v1794_v26, %v1793_v15  ;;  %v2652_v31 = vpack.c.bf16 %v1796_v24, %v1795_v20  ;;  %v1802_v32 = vmax.f32 %v1376_v21, 0.0  ;;  %v1804_v22 = vmax.f32 %v1489_v35, 0.0 }
 0x21c   : > { %2361 = vst.msk [vmem:[%s3467_s12 + $0x18] sm:$0xff] %vm2357_vm2, %v1801_v25 }
 0x21d   : > { %2297 = vst [vmem:[%s3485_s13 + $0x40] sm:$0xff] %v2651_v29  ;;  %2298 = vst [vmem:[%s3485_s13 + $0x48] sm:$0xff] %v2652_v31  ;;  %v2655_v37 = vpack.c.bf16 %v1802_v32, %v1801_v25  ;;  %v2656_v27 = vpack.c.bf16 %v1804_v22, %v1803_v28  ;;  %v1379_v57 = vpop.f32.mrb[72].mxu0  ;;  %v1492_v38 = vpop.f32.mrb[72].mxu1 }
 0x21e   : > { %v1380_v5 = vadd.f32 %v1379_v57, %v3501_v33  ;;  %v1493_v39 = vadd.f32 %v1492_v38, %v3501_v33  ;;  %v1381_v11 = vpop.f32.mrb[73].mxu0  ;;  %v1494_v50 = vpop.f32.mrb[73].mxu1 }
 0x21f   : > { %2301 = vst [vmem:[%s3485_s13 + $0x60] sm:$0xff] %v2655_v37  ;;  %2302 = vst [vmem:[%s3485_s13 + $0x68] sm:$0xff] %v2656_v27  ;;  %v1382_v16 = vadd.f32 %v1381_v11, %v3501_v33  ;;  %v1495_v40 = vadd.f32 %v1494_v50, %v3501_v33  ;;  %v1383_v0 = vpop.f32.mrb[74].mxu0  ;;  %v1496_v41 = vpop.f32.mrb[74].mxu1 }
 0x220   : > { %v1809_v42 = vmax.f32 %v1380_v5, 0.0  ;;  %v1811_v43 = vmax.f32 %v1493_v39, 0.0  ;;  %v1384_v44 = vadd.f32 %v1383_v0, %v3503_v34  ;;  %v1497_v45 = vadd.f32 %v1496_v41, %v3503_v34  ;;  %v1385_v46 = vpop.f32.mrb[75].mxu0  ;;  %v1498_v47 = vpop.f32.mrb[75].mxu1 }
 0x221   : > { %v1810_v48 = vmax.f32 %v1382_v16, 0.0  ;;  %v1812_v58 = vmax.f32 %v1495_v40, 0.0  ;;  %v1386_v53 = vadd.f32 %v1385_v46, %v3503_v34  ;;  %v1499_v49 = vadd.f32 %v1498_v47, %v3503_v34  ;;  %v3541_v37 = vpop.permute.xlu0 %1239  ;;  %v3543_v27 = vpop.permute.xlu1 %1244 }
 0x222   : > { %2362 = vst.msk [vmem:[%s3467_s12 + $0x20] sm:$0xff] %vm2357_vm2, %v1809_v42  ;;  %v1817_v52 = vmax.f32 %v1384_v44, 0.0  ;;  %v1819_v55 = vmax.f32 %v1497_v45, 0.0 }
 0x223   : > { %v2659_v63 = vpack.c.bf16 %v1810_v48, %v1809_v42  ;;  %v2660_v56 = vpack.c.bf16 %v1812_v58, %v1811_v43  ;;  %v1818_v60 = vmax.f32 %v1386_v53, 0.0  ;;  %v1820_v61 = vmax.f32 %v1499_v49, 0.0 }
 0x224   : > { %2363 = vst.msk [vmem:[%s3467_s12 + $0x28] sm:$0xff] %vm2357_vm2, %v1817_v52 }
 0x225   : > { %2305 = vst [vmem:[%s3485_s13 + $0x80] sm:$0xff] %v2659_v63  ;;  %2306 = vst [vmem:[%s3485_s13 + $0x88] sm:$0xff] %v2660_v56  ;;  %v2663_v4 = vpack.c.bf16 %v1818_v60, %v1817_v52  ;;  %v2664_v54 = vpack.c.bf16 %v1820_v61, %v1819_v55  ;;  %v1389_v6 = vpop.f32.mrb[76].mxu0  ;;  %v1502_v7 = vpop.f32.mrb[76].mxu1 }
 0x226   : > { %v1390_v1 = vadd.f32 %v1389_v6, %v3521_v51  ;;  %v1503_v8 = vadd.f32 %v1502_v7, %v3521_v51  ;;  %v1391_v9 = vpop.f32.mrb[77].mxu0  ;;  %v1504_v10 = vpop.f32.mrb[77].mxu1 }
 0x227   : > { %2309 = vst [vmem:[%s3485_s13 + $0xa0] sm:$0xff] %v2663_v4  ;;  %2310 = vst [vmem:[%s3485_s13 + $0xa8] sm:$0xff] %v2664_v54  ;;  %v1392_v59 = vadd.f32 %v1391_v9, %v3521_v51  ;;  %v1505_v12 = vadd.f32 %v1504_v10, %v3521_v51  ;;  %v1393_v13 = vpop.f32.mrb[78].mxu0  ;;  %v1506_v14 = vpop.f32.mrb[78].mxu1 }
 0x228   : > { %v1825_v15 = vmax.f32 %v1390_v1, 0.0  ;;  %v1827_v20 = vmax.f32 %v1503_v8, 0.0  ;;  %v1394_v17 = vadd.f32 %v1393_v13, %v3523_v62  ;;  %v1507_v18 = vadd.f32 %v1506_v14, %v3523_v62  ;;  %v1395_v19 = vpop.f32.mrb[79].mxu0  ;;  %v1508_v23 = vpop.f32.mrb[79].mxu1 }
 0x229   : > { %v1826_v26 = vmax.f32 %v1392_v59, 0.0  ;;  %v1828_v24 = vmax.f32 %v1505_v12, 0.0  ;;  %v1396_v21 = vadd.f32 %v1395_v19, %v3523_v62  ;;  %v1509_v35 = vadd.f32 %v1508_v23, %v3523_v62  ;;  %v3561_v6 = vpop.permute.xlu0 %1249  ;;  %v3563_v7 = vpop.permute.xlu1 %1254 }
 0x22a   : > { %2364 = vst.msk [vmem:[%s3467_s12 + $0x30] sm:$0xff] %vm2357_vm2, %v1825_v15  ;;  %v1833_v25 = vmax.f32 %v1394_v17, 0.0  ;;  %v1835_v28 = vmax.f32 %v1507_v18, 0.0 }
 0x22b   : > { %v2667_v29 = vpack.c.bf16 %v1826_v26, %v1825_v15  ;;  %v2668_v31 = vpack.c.bf16 %v1828_v24, %v1827_v20  ;;  %v1834_v32 = vmax.f32 %v1396_v21, 0.0  ;;  %v1836_v22 = vmax.f32 %v1509_v35, 0.0 }
 0x22c   : > { %2365 = vst.msk [vmem:[%s3467_s12 + $0x38] sm:$0xff] %vm2357_vm2, %v1833_v25 }
 0x22d   : > { %2313 = vst [vmem:[%s3485_s13 + $0xc0] sm:$0xff] %v2667_v29  ;;  %2314 = vst [vmem:[%s3485_s13 + $0xc8] sm:$0xff] %v2668_v31  ;;  %v2671_v57 = vpack.c.bf16 %v1834_v32, %v1833_v25  ;;  %v2672_v38 = vpack.c.bf16 %v1836_v22, %v1835_v28  ;;  %v1399_v5 = vpop.f32.mrb[80].mxu0  ;;  %v1512_v39 = vpop.f32.mrb[80].mxu1 }
 0x22e   : > { %v1400_v11 = vadd.f32 %v1399_v5, %v3541_v37  ;;  %v1513_v50 = vadd.f32 %v1512_v39, %v3541_v37  ;;  %v1401_v16 = vpop.f32.mrb[81].mxu0  ;;  %v1514_v40 = vpop.f32.mrb[81].mxu1 }
 0x22f   : > { %2317 = vst [vmem:[%s3485_s13 + $0xe0] sm:$0xff] %v2671_v57  ;;  %2318 = vst [vmem:[%s3485_s13 + $0xe8] sm:$0xff] %v2672_v38  ;;  %v1402_v0 = vadd.f32 %v1401_v16, %v3541_v37  ;;  %v1515_v41 = vadd.f32 %v1514_v40, %v3541_v37  ;;  %v1403_v42 = vpop.f32.mrb[82].mxu0  ;;  %v1516_v43 = vpop.f32.mrb[82].mxu1 }
 0x230   : > { %v1841_v44 = vmax.f32 %v1400_v11, 0.0  ;;  %v1843_v45 = vmax.f32 %v1513_v50, 0.0  ;;  %v1404_v46 = vadd.f32 %v1403_v42, %v3543_v27  ;;  %v1517_v47 = vadd.f32 %v1516_v43, %v3543_v27  ;;  %v1405_v48 = vpop.f32.mrb[83].mxu0  ;;  %v1518_v58 = vpop.f32.mrb[83].mxu1 }
 0x231   : > { %v1842_v53 = vmax.f32 %v1402_v0, 0.0  ;;  %v1844_v49 = vmax.f32 %v1515_v41, 0.0  ;;  %v1406_v52 = vadd.f32 %v1405_v48, %v3543_v27  ;;  %v1519_v55 = vadd.f32 %v1518_v58, %v3543_v27  ;;  %v3581_v11 = vpop.permute.xlu0 %1259  ;;  %v3583_v50 = vpop.permute.xlu1 %1264 }
 0x232   : > { %2366 = vst.msk [vmem:[%s3467_s12 + $0x40] sm:$0xff] %vm2357_vm2, %v1841_v44  ;;  %v1849_v63 = vmax.f32 %v1404_v46, 0.0  ;;  %v1851_v56 = vmax.f32 %v1517_v47, 0.0 }
 0x233   : > { %v2675_v60 = vpack.c.bf16 %v1842_v53, %v1841_v44  ;;  %v2676_v61 = vpack.c.bf16 %v1844_v49, %v1843_v45  ;;  %v1850_v4 = vmax.f32 %v1406_v52, 0.0  ;;  %v1852_v54 = vmax.f32 %v1519_v55, 0.0 }
 0x234   : > { %2367 = vst.msk [vmem:[%s3467_s12 + $0x48] sm:$0xff] %vm2357_vm2, %v1849_v63 }
 0x235   : > { %2321 = vst [vmem:[%s3485_s13 + $0x100] sm:$0xff] %v2675_v60  ;;  %2322 = vst [vmem:[%s3485_s13 + $0x108] sm:$0xff] %v2676_v61  ;;  %v2679_v1 = vpack.c.bf16 %v1850_v4, %v1849_v63  ;;  %v2680_v8 = vpack.c.bf16 %v1852_v54, %v1851_v56  ;;  %v1409_v9 = vpop.f32.mrb[84].mxu0  ;;  %v1522_v10 = vpop.f32.mrb[84].mxu1 }
 0x236   : > { %v1410_v59 = vadd.f32 %v1409_v9, %v3561_v6  ;;  %v1523_v12 = vadd.f32 %v1522_v10, %v3561_v6  ;;  %v1411_v13 = vpop.f32.mrb[85].mxu0  ;;  %v1524_v14 = vpop.f32.mrb[85].mxu1 }
 0x237   : > { %2325 = vst [vmem:[%s3485_s13 + $0x120] sm:$0xff] %v2679_v1  ;;  %2326 = vst [vmem:[%s3485_s13 + $0x128] sm:$0xff] %v2680_v8  ;;  %v1412_v15 = vadd.f32 %v1411_v13, %v3561_v6  ;;  %v1525_v20 = vadd.f32 %v1524_v14, %v3561_v6  ;;  %v1413_v17 = vpop.f32.mrb[86].mxu0  ;;  %v1526_v18 = vpop.f32.mrb[86].mxu1 }
 0x238   : > { %v1857_v19 = vmax.f32 %v1410_v59, 0.0  ;;  %v1859_v23 = vmax.f32 %v1523_v12, 0.0  ;;  %v1414_v26 = vadd.f32 %v1413_v17, %v3563_v7  ;;  %v1527_v24 = vadd.f32 %v1526_v18, %v3563_v7  ;;  %v1415_v21 = vpop.f32.mrb[87].mxu0  ;;  %v1528_v35 = vpop.f32.mrb[87].mxu1 }
 0x239   : > { %v1858_v25 = vmax.f32 %v1412_v15, 0.0  ;;  %v1860_v28 = vmax.f32 %v1525_v20, 0.0  ;;  %v1416_v29 = vadd.f32 %v1415_v21, %v3563_v7  ;;  %v1529_v31 = vadd.f32 %v1528_v35, %v3563_v7  ;;  %v3601_v13 = vpop.permute.xlu0 %1269  ;;  %v3603_v14 = vpop.permute.xlu1 %1274 }
 0x23a   : > { %2368 = vst.msk [vmem:[%s3467_s12 + $0x50] sm:$0xff] %vm2357_vm2, %v1857_v19  ;;  %v1865_v32 = vmax.f32 %v1414_v26, 0.0  ;;  %v1867_v22 = vmax.f32 %v1527_v24, 0.0 }
 0x23b   : > { %v2683_v57 = vpack.c.bf16 %v1858_v25, %v1857_v19  ;;  %v2684_v38 = vpack.c.bf16 %v1860_v28, %v1859_v23  ;;  %v1866_v5 = vmax.f32 %v1416_v29, 0.0  ;;  %v1868_v39 = vmax.f32 %v1529_v31, 0.0 }
 0x23c   : > { %2369 = vst.msk [vmem:[%s3467_s12 + $0x58] sm:$0xff] %vm2357_vm2, %v1865_v32 }
 0x23d   : > { %2329 = vst [vmem:[%s3485_s13 + $0x140] sm:$0xff] %v2683_v57  ;;  %2330 = vst [vmem:[%s3485_s13 + $0x148] sm:$0xff] %v2684_v38  ;;  %v2687_v16 = vpack.c.bf16 %v1866_v5, %v1865_v32  ;;  %v2688_v40 = vpack.c.bf16 %v1868_v39, %v1867_v22  ;;  %v1419_v0 = vpop.f32.mrb[88].mxu0  ;;  %v1532_v41 = vpop.f32.mrb[88].mxu1 }
 0x23e   : > { %v1420_v42 = vadd.f32 %v1419_v0, %v3581_v11  ;;  %v1533_v43 = vadd.f32 %v1532_v41, %v3581_v11  ;;  %v1421_v44 = vpop.f32.mrb[89].mxu0  ;;  %v1534_v45 = vpop.f32.mrb[89].mxu1 }
 0x23f   : > { %2333 = vst [vmem:[%s3485_s13 + $0x160] sm:$0xff] %v2687_v16  ;;  %2334 = vst [vmem:[%s3485_s13 + $0x168] sm:$0xff] %v2688_v40  ;;  %v1422_v46 = vadd.f32 %v1421_v44, %v3581_v11  ;;  %v1535_v47 = vadd.f32 %v1534_v45, %v3581_v11  ;;  %v1423_v48 = vpop.f32.mrb[90].mxu0  ;;  %v1536_v58 = vpop.f32.mrb[90].mxu1 }
 0x240   : > { %v1873_v53 = vmax.f32 %v1420_v42, 0.0  ;;  %v1875_v49 = vmax.f32 %v1533_v43, 0.0  ;;  %v1424_v52 = vadd.f32 %v1423_v48, %v3583_v50  ;;  %v1537_v55 = vadd.f32 %v1536_v58, %v3583_v50  ;;  %v1425_v63 = vpop.f32.mrb[91].mxu0  ;;  %v1538_v56 = vpop.f32.mrb[91].mxu1 }
 0x241   : > { %v1874_v60 = vmax.f32 %v1422_v46, 0.0  ;;  %v1876_v61 = vmax.f32 %v1535_v47, 0.0  ;;  %v1426_v4 = vadd.f32 %v1425_v63, %v3583_v50  ;;  %v1539_v54 = vadd.f32 %v1538_v56, %v3583_v50 }
 0x242   : > { %2370 = vst.msk [vmem:[%s3467_s12 + $0x60] sm:$0xff] %vm2357_vm2, %v1873_v53  ;;  %v1881_v1 = vmax.f32 %v1424_v52, 0.0  ;;  %v1883_v8 = vmax.f32 %v1537_v55, 0.0 }
 0x243   : > { %v2691_v9 = vpack.c.bf16 %v1874_v60, %v1873_v53  ;;  %v2692_v10 = vpack.c.bf16 %v1876_v61, %v1875_v49  ;;  %v1882_v59 = vmax.f32 %v1426_v4, 0.0  ;;  %v1884_v12 = vmax.f32 %v1539_v54, 0.0 }
 0x244   : > { %2371 = vst.msk [vmem:[%s3467_s12 + $0x68] sm:$0xff] %vm2357_vm2, %v1881_v1 }
 0x245   : > { %2337 = vst [vmem:[%s3485_s13 + $0x180] sm:$0xff] %v2691_v9  ;;  %2338 = vst [vmem:[%s3485_s13 + $0x188] sm:$0xff] %v2692_v10  ;;  %v2695_v15 = vpack.c.bf16 %v1882_v59, %v1881_v1  ;;  %v2696_v20 = vpack.c.bf16 %v1884_v12, %v1883_v8  ;;  %v1429_v17 = vpop.f32.mrb[92].mxu0  ;;  %v1542_v18 = vpop.f32.mrb[92].mxu1 }
 0x246   : > { %v1430_v19 = vadd.f32 %v1429_v17, %v3601_v13  ;;  %v1543_v23 = vadd.f32 %v1542_v18, %v3601_v13  ;;  %v1431_v26 = vpop.f32.mrb[93].mxu0  ;;  %v1544_v24 = vpop.f32.mrb[93].mxu1 }
 0x247   : > { %2341 = vst [vmem:[%s3485_s13 + $0x1a0] sm:$0xff] %v2695_v15  ;;  %2342 = vst [vmem:[%s3485_s13 + $0x1a8] sm:$0xff] %v2696_v20  ;;  %v1432_v21 = vadd.f32 %v1431_v26, %v3601_v13  ;;  %v1545_v35 = vadd.f32 %v1544_v24, %v3601_v13  ;;  %v1433_v25 = vpop.f32.mrb[94].mxu0  ;;  %v1546_v28 = vpop.f32.mrb[94].mxu1 }
 0x248   : > { %v1889_v29 = vmax.f32 %v1430_v19, 0.0  ;;  %v1891_v31 = vmax.f32 %v1543_v23, 0.0  ;;  %v1434_v32 = vadd.f32 %v1433_v25, %v3603_v14  ;;  %v1547_v22 = vadd.f32 %v1546_v28, %v3603_v14  ;;  %v1435_v57 = vpop.f32.mrb[95].mxu0  ;;  %v1548_v38 = vpop.f32.mrb[95].mxu1 }
 0x249   : > { %v1890_v5 = vmax.f32 %v1432_v21, 0.0  ;;  %v1892_v39 = vmax.f32 %v1545_v35, 0.0  ;;  %v1436_v16 = vadd.f32 %v1435_v57, %v3603_v14  ;;  %v1549_v40 = vadd.f32 %v1548_v38, %v3603_v14 }
 0x24a   : > { %2372 = vst.msk [vmem:[%s3467_s12 + $0x70] sm:$0xff] %vm2357_vm2, %v1889_v29  ;;  %v1897_v0 = vmax.f32 %v1434_v32, 0.0  ;;  %v1899_v41 = vmax.f32 %v1547_v22, 0.0 }
 0x24b   : > { %v2699_v42 = vpack.c.bf16 %v1890_v5, %v1889_v29  ;;  %v2700_v43 = vpack.c.bf16 %v1892_v39, %v1891_v31  ;;  %v1898_v44 = vmax.f32 %v1436_v16, 0.0  ;;  %v1900_v45 = vmax.f32 %v1549_v40, 0.0 }
 0x24c   : > { %2373 = vst.msk [vmem:[%s3467_s12 + $0x78] sm:$0xff] %vm2357_vm2, %v1897_v0 }
 0x24d   : > { %2345 = vst [vmem:[%s3485_s13 + $0x1c0] sm:$0xff] %v2699_v42  ;;  %2346 = vst [vmem:[%s3485_s13 + $0x1c8] sm:$0xff] %v2700_v43  ;;  %v2703_v46 = vpack.c.bf16 %v1898_v44, %v1897_v0  ;;  %v2704_v47 = vpack.c.bf16 %v1900_v45, %v1899_v41  ;;  %v1585_v48 = vpop.f32.mrb[96].mxu0  ;;  %v1698_v58 = vpop.f32.mrb[96].mxu1 }
 0x24e   : > { %v1586_v53 = vadd.f32 %v1585_v48, %v3457_v36  ;;  %v1699_v49 = vadd.f32 %v1698_v58, %v3457_v36  ;;  %v1587_v52 = vpop.f32.mrb[97].mxu0  ;;  %v1700_v55 = vpop.f32.mrb[97].mxu1 }
 0x24f   : > { %2349 = vst [vmem:[%s3485_s13 + $0x1e0] sm:$0xff] %v2703_v46  ;;  %2350 = vst [vmem:[%s3485_s13 + $0x1e8] sm:$0xff] %v2704_v47  ;;  %v1588_v63 = vadd.f32 %v1587_v52, %v3457_v36  ;;  %v1701_v56 = vadd.f32 %v1700_v55, %v3457_v36  ;;  %v1589_v60 = vpop.f32.mrb[98].mxu0  ;;  %v1702_v61 = vpop.f32.mrb[98].mxu1 }
 0x250   : > { %v1781_v4 = vmax.f32 %v1586_v53, 0.0  ;;  %v1783_v54 = vmax.f32 %v1699_v49, 0.0  ;;  %v1590_v1 = vadd.f32 %v1589_v60, %v3459_v30  ;;  %v1703_v8 = vadd.f32 %v1702_v61, %v3459_v30  ;;  %v1591_v9 = vpop.f32.mrb[99].mxu0  ;;  %v1704_v10 = vpop.f32.mrb[99].mxu1 }
 0x251   : > { %v1782_v59 = vmax.f32 %v1588_v63, 0.0  ;;  %v1784_v12 = vmax.f32 %v1701_v56, 0.0  ;;  %v1592_v15 = vadd.f32 %v1591_v9, %v3459_v30  ;;  %v1705_v20 = vadd.f32 %v1704_v10, %v3459_v30 }
 0x252   : > { %v1789_v17 = vmax.f32 %v1590_v1, 0.0  ;;  %v1791_v36 = vmax.f32 %v1703_v8, 0.0 }
 0x253   : > { %v2645_v18 = vpack.c.bf16 %v1782_v59, %v1781_v4  ;;  %v2646_v19 = vpack.c.bf16 %v1784_v12, %v1783_v54  ;;  %v1790_v23 = vmax.f32 %v1592_v15, 0.0  ;;  %v1792_v26 = vmax.f32 %v1705_v20, 0.0 }
 0x255   : > { %2291 = vst [vmem:[%s3485_s13 + $0x10] sm:$0xff] %v2645_v18  ;;  %2292 = vst [vmem:[%s3485_s13 + $0x18] sm:$0xff] %v2646_v19  ;;  %v2649_v24 = vpack.c.bf16 %v1790_v23, %v1789_v17  ;;  %v2650_v21 = vpack.c.bf16 %v1792_v26, %v1791_v36  ;;  %v1595_v35 = vpop.f32.mrb[100].mxu0  ;;  %v1708_v25 = vpop.f32.mrb[100].mxu1 }
 0x256   : > { %v1596_v28 = vadd.f32 %v1595_v35, %v3479_v2  ;;  %v1709_v29 = vadd.f32 %v1708_v25, %v3479_v2  ;;  %v1597_v31 = vpop.f32.mrb[101].mxu0  ;;  %v1710_v30 = vpop.f32.mrb[101].mxu1 }
 0x257   : > { %2295 = vst [vmem:[%s3485_s13 + $0x30] sm:$0xff] %v2649_v24  ;;  %2296 = vst [vmem:[%s3485_s13 + $0x38] sm:$0xff] %v2650_v21  ;;  %v1598_v32 = vadd.f32 %v1597_v31, %v3479_v2  ;;  %v1711_v22 = vadd.f32 %v1710_v30, %v3479_v2  ;;  %v1599_v57 = vpop.f32.mrb[102].mxu0  ;;  %v1712_v38 = vpop.f32.mrb[102].mxu1 }
 0x258   : > { %v1797_v5 = vmax.f32 %v1596_v28, 0.0  ;;  %v1799_v39 = vmax.f32 %v1709_v29, 0.0  ;;  %v1600_v16 = vadd.f32 %v1599_v57, %v3481_v3  ;;  %v1713_v40 = vadd.f32 %v1712_v38, %v3481_v3  ;;  %v1601_v0 = vpop.f32.mrb[103].mxu0  ;;  %v1714_v41 = vpop.f32.mrb[103].mxu1 }
 0x259   : > { %v1798_v42 = vmax.f32 %v1598_v32, 0.0  ;;  %v1800_v43 = vmax.f32 %v1711_v22, 0.0  ;;  %v1602_v44 = vadd.f32 %v1601_v0, %v3481_v3  ;;  %v1715_v45 = vadd.f32 %v1714_v41, %v3481_v3 }
 0x25a   : > { %v1805_v46 = vmax.f32 %v1600_v16, 0.0  ;;  %v1807_v2 = vmax.f32 %v1713_v40, 0.0 }
 0x25b   : > { %v2653_v47 = vpack.c.bf16 %v1798_v42, %v1797_v5  ;;  %v2654_v48 = vpack.c.bf16 %v1800_v43, %v1799_v39  ;;  %v1806_v58 = vmax.f32 %v1602_v44, 0.0  ;;  %v1808_v53 = vmax.f32 %v1715_v45, 0.0 }
 0x25d   : > { %2299 = vst [vmem:[%s3485_s13 + $0x50] sm:$0xff] %v2653_v47  ;;  %2300 = vst [vmem:[%s3485_s13 + $0x58] sm:$0xff] %v2654_v48  ;;  %v2657_v49 = vpack.c.bf16 %v1806_v58, %v1805_v46  ;;  %v2658_v52 = vpack.c.bf16 %v1808_v53, %v1807_v2  ;;  %v1605_v55 = vpop.f32.mrb[104].mxu0  ;;  %v1718_v63 = vpop.f32.mrb[104].mxu1 }
 0x25e   : > { %v1606_v56 = vadd.f32 %v1605_v55, %v3501_v33  ;;  %v1719_v60 = vadd.f32 %v1718_v63, %v3501_v33  ;;  %v1607_v61 = vpop.f32.mrb[105].mxu0  ;;  %v1720_v3 = vpop.f32.mrb[105].mxu1 }
 0x25f   : > { %2303 = vst [vmem:[%s3485_s13 + $0x70] sm:$0xff] %v2657_v49  ;;  %2304 = vst [vmem:[%s3485_s13 + $0x78] sm:$0xff] %v2658_v52  ;;  %v1608_v4 = vadd.f32 %v1607_v61, %v3501_v33  ;;  %v1721_v54 = vadd.f32 %v1720_v3, %v3501_v33  ;;  %v1609_v1 = vpop.f32.mrb[106].mxu0  ;;  %v1722_v8 = vpop.f32.mrb[106].mxu1 }
 0x260   : > { %v1813_v9 = vmax.f32 %v1606_v56, 0.0  ;;  %v1815_v10 = vmax.f32 %v1719_v60, 0.0  ;;  %v1610_v59 = vadd.f32 %v1609_v1, %v3503_v34  ;;  %v1723_v12 = vadd.f32 %v1722_v8, %v3503_v34  ;;  %v1611_v15 = vpop.f32.mrb[107].mxu0  ;;  %v1724_v20 = vpop.f32.mrb[107].mxu1 }
 0x261   : > { %v1814_v17 = vmax.f32 %v1608_v4, 0.0  ;;  %v1816_v36 = vmax.f32 %v1721_v54, 0.0  ;;  %v1612_v18 = vadd.f32 %v1611_v15, %v3503_v34  ;;  %v1725_v19 = vadd.f32 %v1724_v20, %v3503_v34 }
 0x262   : > { %v1821_v23 = vmax.f32 %v1610_v59, 0.0  ;;  %v1823_v33 = vmax.f32 %v1723_v12, 0.0 }
 0x263   : > { %v2661_v26 = vpack.c.bf16 %v1814_v17, %v1813_v9  ;;  %v2662_v24 = vpack.c.bf16 %v1816_v36, %v1815_v10  ;;  %v1822_v21 = vmax.f32 %v1612_v18, 0.0  ;;  %v1824_v35 = vmax.f32 %v1725_v19, 0.0 }
 0x265   : > { %2307 = vst [vmem:[%s3485_s13 + $0x90] sm:$0xff] %v2661_v26  ;;  %2308 = vst [vmem:[%s3485_s13 + $0x98] sm:$0xff] %v2662_v24  ;;  %v2665_v25 = vpack.c.bf16 %v1822_v21, %v1821_v23  ;;  %v2666_v28 = vpack.c.bf16 %v1824_v35, %v1823_v33  ;;  %v1615_v29 = vpop.f32.mrb[108].mxu0  ;;  %v1728_v31 = vpop.f32.mrb[108].mxu1 }
 0x266   : > { %v1616_v30 = vadd.f32 %v1615_v29, %v3521_v51  ;;  %v1729_v32 = vadd.f32 %v1728_v31, %v3521_v51  ;;  %v1617_v22 = vpop.f32.mrb[109].mxu0  ;;  %v1730_v34 = vpop.f32.mrb[109].mxu1 }
 0x267   : > { %2311 = vst [vmem:[%s3485_s13 + $0xb0] sm:$0xff] %v2665_v25  ;;  %2312 = vst [vmem:[%s3485_s13 + $0xb8] sm:$0xff] %v2666_v28  ;;  %v1618_v57 = vadd.f32 %v1617_v22, %v3521_v51  ;;  %v1731_v38 = vadd.f32 %v1730_v34, %v3521_v51  ;;  %v1619_v5 = vpop.f32.mrb[110].mxu0  ;;  %v1732_v39 = vpop.f32.mrb[110].mxu1 }
 0x268   : > { %v1829_v16 = vmax.f32 %v1616_v30, 0.0  ;;  %v1831_v40 = vmax.f32 %v1729_v32, 0.0  ;;  %v1620_v0 = vadd.f32 %v1619_v5, %v3523_v62  ;;  %v1733_v41 = vadd.f32 %v1732_v39, %v3523_v62  ;;  %v1621_v42 = vpop.f32.mrb[111].mxu0  ;;  %v1734_v43 = vpop.f32.mrb[111].mxu1 }
 0x269   : > { %v1830_v44 = vmax.f32 %v1618_v57, 0.0  ;;  %v1832_v45 = vmax.f32 %v1731_v38, 0.0  ;;  %v1622_v46 = vadd.f32 %v1621_v42, %v3523_v62  ;;  %v1735_v2 = vadd.f32 %v1734_v43, %v3523_v62 }
 0x26a   : > { %v1837_v47 = vmax.f32 %v1620_v0, 0.0  ;;  %v1839_v51 = vmax.f32 %v1733_v41, 0.0 }
 0x26b   : > { %v2669_v48 = vpack.c.bf16 %v1830_v44, %v1829_v16  ;;  %v2670_v58 = vpack.c.bf16 %v1832_v45, %v1831_v40  ;;  %v1838_v53 = vmax.f32 %v1622_v46, 0.0  ;;  %v1840_v49 = vmax.f32 %v1735_v2, 0.0 }
 0x26d   : > { %2315 = vst [vmem:[%s3485_s13 + $0xd0] sm:$0xff] %v2669_v48  ;;  %2316 = vst [vmem:[%s3485_s13 + $0xd8] sm:$0xff] %v2670_v58  ;;  %v2673_v52 = vpack.c.bf16 %v1838_v53, %v1837_v47  ;;  %v2674_v55 = vpack.c.bf16 %v1840_v49, %v1839_v51  ;;  %v1625_v63 = vpop.f32.mrb[112].mxu0  ;;  %v1738_v56 = vpop.f32.mrb[112].mxu1 }
 0x26e   : > { %v1626_v60 = vadd.f32 %v1625_v63, %v3541_v37  ;;  %v1739_v61 = vadd.f32 %v1738_v56, %v3541_v37  ;;  %v1627_v3 = vpop.f32.mrb[113].mxu0  ;;  %v1740_v62 = vpop.f32.mrb[113].mxu1 }
 0x26f   : > { %2319 = vst [vmem:[%s3485_s13 + $0xf0] sm:$0xff] %v2673_v52  ;;  %2320 = vst [vmem:[%s3485_s13 + $0xf8] sm:$0xff] %v2674_v55  ;;  %v1628_v4 = vadd.f32 %v1627_v3, %v3541_v37  ;;  %v1741_v54 = vadd.f32 %v1740_v62, %v3541_v37  ;;  %v1629_v1 = vpop.f32.mrb[114].mxu0  ;;  %v1742_v8 = vpop.f32.mrb[114].mxu1 }
 0x270   : > { %v1845_v9 = vmax.f32 %v1626_v60, 0.0  ;;  %v1847_v10 = vmax.f32 %v1739_v61, 0.0  ;;  %v1630_v59 = vadd.f32 %v1629_v1, %v3543_v27  ;;  %v1743_v12 = vadd.f32 %v1742_v8, %v3543_v27  ;;  %v1631_v15 = vpop.f32.mrb[115].mxu0  ;;  %v1744_v20 = vpop.f32.mrb[115].mxu1 }
 0x271   : > { %v1846_v17 = vmax.f32 %v1628_v4, 0.0  ;;  %v1848_v36 = vmax.f32 %v1741_v54, 0.0  ;;  %v1632_v18 = vadd.f32 %v1631_v15, %v3543_v27  ;;  %v1745_v19 = vadd.f32 %v1744_v20, %v3543_v27 }
 0x272   : > { %v1853_v23 = vmax.f32 %v1630_v59, 0.0  ;;  %v1855_v37 = vmax.f32 %v1743_v12, 0.0 }
 0x273   : > { %v2677_v33 = vpack.c.bf16 %v1846_v17, %v1845_v9  ;;  %v2678_v26 = vpack.c.bf16 %v1848_v36, %v1847_v10  ;;  %v1854_v24 = vmax.f32 %v1632_v18, 0.0  ;;  %v1856_v21 = vmax.f32 %v1745_v19, 0.0 }
 0x275   : > { %2323 = vst [vmem:[%s3485_s13 + $0x110] sm:$0xff] %v2677_v33  ;;  %2324 = vst [vmem:[%s3485_s13 + $0x118] sm:$0xff] %v2678_v26  ;;  %v2681_v35 = vpack.c.bf16 %v1854_v24, %v1853_v23  ;;  %v2682_v25 = vpack.c.bf16 %v1856_v21, %v1855_v37  ;;  %v1635_v28 = vpop.f32.mrb[116].mxu0  ;;  %v1748_v29 = vpop.f32.mrb[116].mxu1 }
 0x276   : > { %v1636_v31 = vadd.f32 %v1635_v28, %v3561_v6  ;;  %v1749_v30 = vadd.f32 %v1748_v29, %v3561_v6  ;;  %v1637_v32 = vpop.f32.mrb[117].mxu0  ;;  %v1750_v27 = vpop.f32.mrb[117].mxu1 }
 0x277   : > { %2327 = vst [vmem:[%s3485_s13 + $0x130] sm:$0xff] %v2681_v35  ;;  %2328 = vst [vmem:[%s3485_s13 + $0x138] sm:$0xff] %v2682_v25  ;;  %v1638_v22 = vadd.f32 %v1637_v32, %v3561_v6  ;;  %v1751_v34 = vadd.f32 %v1750_v27, %v3561_v6  ;;  %v1639_v57 = vpop.f32.mrb[118].mxu0  ;;  %v1752_v38 = vpop.f32.mrb[118].mxu1 }
 0x278   : > { %v1861_v5 = vmax.f32 %v1636_v31, 0.0  ;;  %v1863_v39 = vmax.f32 %v1749_v30, 0.0  ;;  %v1640_v16 = vadd.f32 %v1639_v57, %v3563_v7  ;;  %v1753_v40 = vadd.f32 %v1752_v38, %v3563_v7  ;;  %v1641_v0 = vpop.f32.mrb[119].mxu0  ;;  %v1754_v41 = vpop.f32.mrb[119].mxu1 }
 0x279   : > { %v1862_v42 = vmax.f32 %v1638_v22, 0.0  ;;  %v1864_v43 = vmax.f32 %v1751_v34, 0.0  ;;  %v1642_v44 = vadd.f32 %v1641_v0, %v3563_v7  ;;  %v1755_v45 = vadd.f32 %v1754_v41, %v3563_v7 }
 0x27a   : > { %v1869_v46 = vmax.f32 %v1640_v16, 0.0  ;;  %v1871_v6 = vmax.f32 %v1753_v40, 0.0 }
 0x27b   : > { %v2685_v2 = vpack.c.bf16 %v1862_v42, %v1861_v5  ;;  %v2686_v47 = vpack.c.bf16 %v1864_v43, %v1863_v39  ;;  %v1870_v51 = vmax.f32 %v1642_v44, 0.0  ;;  %v1872_v48 = vmax.f32 %v1755_v45, 0.0 }
 0x27d   : > { %2331 = vst [vmem:[%s3485_s13 + $0x150] sm:$0xff] %v2685_v2  ;;  %2332 = vst [vmem:[%s3485_s13 + $0x158] sm:$0xff] %v2686_v47  ;;  %v2689_v58 = vpack.c.bf16 %v1870_v51, %v1869_v46  ;;  %v2690_v53 = vpack.c.bf16 %v1872_v48, %v1871_v6  ;;  %v1645_v49 = vpop.f32.mrb[120].mxu0  ;;  %v1758_v52 = vpop.f32.mrb[120].mxu1 }
 0x27e   : > { %v1646_v55 = vadd.f32 %v1645_v49, %v3581_v11  ;;  %v1759_v63 = vadd.f32 %v1758_v52, %v3581_v11  ;;  %v1647_v56 = vpop.f32.mrb[121].mxu0  ;;  %v1760_v7 = vpop.f32.mrb[121].mxu1 }
 0x27f   : > { %2335 = vst [vmem:[%s3485_s13 + $0x170] sm:$0xff] %v2689_v58  ;;  %2336 = vst [vmem:[%s3485_s13 + $0x178] sm:$0xff] %v2690_v53  ;;  %v1648_v60 = vadd.f32 %v1647_v56, %v3581_v11  ;;  %v1761_v61 = vadd.f32 %v1760_v7, %v3581_v11  ;;  %v1649_v3 = vpop.f32.mrb[122].mxu0  ;;  %v1762_v62 = vpop.f32.mrb[122].mxu1 }
 0x280   : > { %v1877_v4 = vmax.f32 %v1646_v55, 0.0  ;;  %v1879_v54 = vmax.f32 %v1759_v63, 0.0  ;;  %v1650_v1 = vadd.f32 %v1649_v3, %v3583_v50  ;;  %v1763_v8 = vadd.f32 %v1762_v62, %v3583_v50  ;;  %v1651_v9 = vpop.f32.mrb[123].mxu0  ;;  %v1764_v10 = vpop.f32.mrb[123].mxu1 }
 0x281   : > { %v1878_v59 = vmax.f32 %v1648_v60, 0.0  ;;  %v1880_v12 = vmax.f32 %v1761_v61, 0.0  ;;  %v1652_v15 = vadd.f32 %v1651_v9, %v3583_v50  ;;  %v1765_v20 = vadd.f32 %v1764_v10, %v3583_v50 }
 0x282   : > { %v1885_v17 = vmax.f32 %v1650_v1, 0.0  ;;  %v1887_v11 = vmax.f32 %v1763_v8, 0.0 }
 0x283   : > { %v2693_v36 = vpack.c.bf16 %v1878_v59, %v1877_v4  ;;  %v2694_v18 = vpack.c.bf16 %v1880_v12, %v1879_v54  ;;  %v1886_v19 = vmax.f32 %v1652_v15, 0.0  ;;  %v1888_v23 = vmax.f32 %v1765_v20, 0.0 }
 0x285   : > { %2339 = vst [vmem:[%s3485_s13 + $0x190] sm:$0xff] %v2693_v36  ;;  %2340 = vst [vmem:[%s3485_s13 + $0x198] sm:$0xff] %v2694_v18  ;;  %v2697_v37 = vpack.c.bf16 %v1886_v19, %v1885_v17  ;;  %v2698_v33 = vpack.c.bf16 %v1888_v23, %v1887_v11  ;;  %v1655_v26 = vpop.f32.mrb[124].mxu0  ;;  %v1768_v24 = vpop.f32.mrb[124].mxu1 }
 0x286   : > { %v1656_v21 = vadd.f32 %v1655_v26, %v3601_v13  ;;  %v1769_v35 = vadd.f32 %v1768_v24, %v3601_v13  ;;  %v1657_v25 = vpop.f32.mrb[125].mxu0  ;;  %v1770_v50 = vpop.f32.mrb[125].mxu1 }
 0x287   : > { %2343 = vst [vmem:[%s3485_s13 + $0x1b0] sm:$0xff] %v2697_v37  ;;  %2344 = vst [vmem:[%s3485_s13 + $0x1b8] sm:$0xff] %v2698_v33  ;;  %v1658_v28 = vadd.f32 %v1657_v25, %v3601_v13  ;;  %v1771_v29 = vadd.f32 %v1770_v50, %v3601_v13  ;;  %v1659_v31 = vpop.f32.mrb[126].mxu0  ;;  %v1772_v30 = vpop.f32.mrb[126].mxu1 }
 0x288   : > { %v1893_v32 = vmax.f32 %v1656_v21, 0.0  ;;  %v1895_v27 = vmax.f32 %v1769_v35, 0.0  ;;  %v1660_v22 = vadd.f32 %v1659_v31, %v3603_v14  ;;  %v1773_v34 = vadd.f32 %v1772_v30, %v3603_v14  ;;  %v1661_v57 = vpop.f32.mrb[127].mxu0  ;;  %v1774_v38 = vpop.f32.mrb[127].mxu1 }
 0x289   : > { %v1894_v5 = vmax.f32 %v1658_v28, 0.0  ;;  %v1896_v39 = vmax.f32 %v1771_v29, 0.0  ;;  %v1662_v16 = vadd.f32 %v1661_v57, %v3603_v14  ;;  %v1775_v40 = vadd.f32 %v1774_v38, %v3603_v14 }
 0x28a   : > { %v1901_v13 = vmax.f32 %v1660_v22, 0.0  ;;  %v1903_v0 = vmax.f32 %v1773_v34, 0.0 }
 0x28b   : > { %v2701_v41 = vpack.c.bf16 %v1894_v5, %v1893_v32  ;;  %v2702_v42 = vpack.c.bf16 %v1896_v39, %v1895_v27  ;;  %v1902_v43 = vmax.f32 %v1662_v16, 0.0  ;;  %v1904_v44 = vmax.f32 %v1775_v40, 0.0 }
 0x28d   : > { %2347 = vst [vmem:[%s3485_s13 + $0x1d0] sm:$0xff] %v2701_v41  ;;  %2348 = vst [vmem:[%s3485_s13 + $0x1d8] sm:$0xff] %v2702_v42  ;;  %v2705_v14 = vpack.c.bf16 %v1902_v43, %v1901_v13  ;;  %v2706_v45 = vpack.c.bf16 %v1904_v44, %v1903_v0 }
 0x28f   : > { %2351 = vst [vmem:[%s3485_s13 + $0x1f0] sm:$0xff] %v2705_v14  ;;  %2352 = vst [vmem:[%s3485_s13 + $0x1f8] sm:$0xff] %v2706_v45 }
 0x290   : > { %2805 = shalt.err (!%p2802_p5)
}
 0x291   : > { %s2806_s28 = scalar_lea.hbm %s3724_s18, 8192  ;;  %s2810_s11 = scalar_lea.hbm %s3785_s5, 16384 }
 0x292   : > { %p2807_p6 = scmp.ne.s32.totalorder %s3724_s18, %s2806_s28  ;;  %p2811_p10 = scmp.lt.u32.totalorder %s3724_s18, %s3785_s5 }
 0x293   : > { %p2812_p11 = scmp.lt.u32.totalorder %s2810_s11, %s2806_s28  ;;  %p2814_p13 = scmp.lt.u32.totalorder %s2806_s28, %s3724_s18 }
 0x294   : > { %p2808_p7 = pnand %p2807_p6, %p2951_p4 }
 0x295   : > { %p2813_p12 = por %p2812_p11, %p2811_p10 }
 0x296   : > { %p2809_p9 = pneg %p2808_p7 }
 0x297   : > { %p2815_p0 = por %p2814_p13, %p2813_p12 }
 0x299   : > { %p2816_p1 = pnand %p2815_p0, %p2809_p9 }
 0x29b   : > { %2819 = shalt.err (!%p2816_p1)
}
 0x29c   : > { %s2874_s16 = smov 512   ;;  %s2875_s17 = smov 32  }
 0x29d   : > { %2708 = dma.vmem_to_hbm [thread:$0]  (%p2951_p4), %s3726_s15, 8192, %s3724_s18, %s3734_s24, %s2874_s16, %s2874_s16, %s2875_s17  }
 0x29e PF: > { %p2714_p2 = scmp.ge.s32.totalorder %s2870_s26, 2  ;;  %s2413_s19 = sand.u32 1, %s2850_s21  }
 0x29f   : > { %s2414_s20 = scalar_lea.sflag [#allocation3], %s2413_s19 }
 0x2a0   : > { %p2711_p3 = pnand %p2714_p2, %p2958_p8 }
 0x2a2   : > { %2845 = dma.done.wait (!%p2711_p3), %s2414_s20, 8192  }
 0x2a3   : > { %2847 = vsyncadd (!%p2711_p3), %s2414_s20, 4294959104  ;;  %s20_s26 = sadd.s32 1, %s2870_s26   ;;  %s3789_s21 = smov %s2854_s22 }
 0x2a4   : > { %p17_p5 = scmp.ge.s32.totalorder %s20_s26, 4   ;;  %s3790_s22 = smov %s2858_s23 }
 0x2a5   : > { %s3791_s23 = smov %s2964_s10  ;;  %s3792_s24 = smov %s2866_s25 }
 0x2a6   : > { %s3793_s25 = smov %s3795_s29  ;;  %19 = sbr.rel (!%p17_p5) target bundleno = 4 (0x4), region = 91 }
 0x2ad   :  { %2427 = vsyncpa [#allocation3], 1 }
 0x2ae   :  { %2429 = vsyncpa [#allocation3 + $0x1], 1 }

</bundles_post_ra>
